<compile_context>
chip_gen: v6e
topology: v6e:2x2x1
jax: 0.10.0
libtpu: 0.0.40
codegen_flags: <defaults>
</compile_context>

<pallas_src>
import jax
import jax.numpy as jnp
from jax.experimental import pallas as pl
from jax.experimental.pallas import tpu as pltpu


def _make_encoder_kernel(num_layers, seq_len, batch, hidden):
    """Builds the fused kernel.

    Ref order: x, (w_ih_t, w_hh_t, bias) * num_layers, out, h_n, c_n,
               scratch_a, scratch_b.
    """
    H = hidden
    G = 4 * H

    def kernel(*refs):
        x_ref = refs[0]
        w_refs = refs[1:1 + 3 * num_layers]
        out_ref, hN_ref, cN_ref = refs[1 + 3 * num_layers:1 + 3 * num_layers + 3]
        buf_a, buf_b = refs[1 + 3 * num_layers + 3:]
        bufs = (buf_a, buf_b)

        # Lane mask: tanh on the g-gate block [2H, 3H), sigmoid elsewhere.
        # Hoisted: computed once for the whole kernel.
        lane = jax.lax.broadcasted_iota(jnp.int32, (batch, G), 1)
        tanh_mask = (lane >= 2 * H) & (lane < 3 * H)

        for l in range(num_layers):
            wih = w_refs[3 * l][...]       # layer0: (in,4H); layers>=1: (4H,4H) rows!=[H,2H) zero
            whh = w_refs[3 * l + 1][...]   # (4H,4H), rows != [H,2H) zero
            bias = w_refs[3 * l + 2][...]  # (1, 4H)

            layer_in = x_ref[...] if l == 0 else bufs[(l - 1) % 2][...]
            dst = bufs[l % 2]

            # Input projection for ALL timesteps in a single MXU matmul,
            # bias folded in — off the sequential critical path.
            gates_x = jax.lax.dot_general(
                layer_in, wih, (((2,), (0,)), ((), ())),
                preferred_element_type=jnp.float32) + bias      # (seq, batch, 4H)

            h_full = jnp.zeros((batch, G), jnp.float32)   # real h in lanes [H, 2H)
            c_full = jnp.zeros((batch, G), jnp.float32)   # real c in lanes [H, 2H)

            # seq_len is small and static -> fully unrolled recurrence.
            for t in range(seq_len):
                gates = gates_x[t] + jnp.dot(
                    h_full, whh, preferred_element_type=jnp.float32)  # (batch, 4H)
                # Whole-vreg activation: blocks [i', f', g', o'].
                act = jnp.where(tanh_mask, jnp.tanh(gates), jax.nn.sigmoid(gates))
                act_r2 = pltpu.roll(act, 2 * H, axis=1)   # blocks [g', o', i', f']
                prod = act * act_r2                       # [i'g', f'o', g'i', o'f']
                ig = pltpu.roll(prod, H, axis=1)          # block [H,2H) == i'*g'
                c_full = act * c_full + ig                # block [H,2H): f'*c + i'*g'
                h_full = act_r2 * jnp.tanh(c_full)        # block [H,2H): o'*tanh(c)
                dst[t] = h_full                           # lane-dense per-step store

            hN_ref[l] = h_full[:, H:2 * H]
            cN_ref[l] = c_full[:, H:2 * H]
            # TODO(synk): inter-layer dropout (p=0.2) applies only in training
            # mode; eval-mode forward is identity, so it is omitted here.

        # Single bulk extraction of the last layer's hidden states (one lane
        # relayout, off the per-step path), then a slab store.
        out_ref[...] = bufs[(num_layers - 1) % 2][...][:, :, H:2 * H]

    return kernel


def lstm_encoder_forward(x_input, params):
    """Stacked-LSTM forward with the semantics of lstm_encoder.forward (eval).

    x_input: (seq_len, batch, input_size) float32
    returns: (lstm_out, (h_n, c_n))
             lstm_out: (seq_len, batch, hidden)
             h_n, c_n: (num_layers, batch, hidden)
    """
    seq_len, batch, _ = x_input.shape
    hidden = params[0]["bias"].shape[1] // 4
    num_layers = len(params)

    flat_weights = []
    for p in params:
        flat_weights += [p["w_ih_t"], p["w_hh_t"], p["bias"]]

    n_inputs = 1 + len(flat_weights)
    in_specs = [pl.BlockSpec(memory_space=pltpu.MemorySpace.VMEM)
                for _ in range(n_inputs)]
    out_specs = tuple(pl.BlockSpec(memory_space=pltpu.MemorySpace.VMEM)
                      for _ in range(3))

    out_shapes = (
        jax.ShapeDtypeStruct((seq_len, batch, hidden), jnp.float32),     # lstm_out
        jax.ShapeDtypeStruct((num_layers, batch, hidden), jnp.float32),  # h_n
        jax.ShapeDtypeStruct((num_layers, batch, hidden), jnp.float32),  # c_n
    )

    scratch = [pltpu.VMEM((seq_len, batch, 4 * hidden), jnp.float32),
               pltpu.VMEM((seq_len, batch, 4 * hidden), jnp.float32)]

    lstm_out, h_n, c_n = pl.pallas_call(
        _make_encoder_kernel(num_layers, seq_len, batch, hidden),
        out_shape=out_shapes,
        in_specs=in_specs,
        out_specs=out_specs,
        scratch_shapes=scratch,
    )(x_input, *flat_weights)
    return lstm_out, (h_n, c_n)


def init_lstm_params(key, input_size, hidden_size, num_layers):
    """nn.LSTM-style init: uniform(-k, k), k = 1/sqrt(hidden_size).

    Weights are stored pre-transposed as (in_features, 4H).  Recurrent
    matrices (and the input matrices of layers >= 1, whose input is the
    previous layer's hidden state) are embedded at rows [H, 2H) of a zero
    (4H, 4H) matrix so the kernel's full (batch, 4H) state vreg can feed the
    MXU with no slicing.  Gate order (i, f, g, o) matches nn.LSTM.
    """
    H = hidden_size
    k = 1.0 / jnp.sqrt(jnp.float32(H))
    params = []
    for layer in range(num_layers):
        in_feats = input_size if layer == 0 else H
        key, k1, k2, k3, k4 = jax.random.split(key, 5)
        w_ih = jax.random.uniform(k1, (4 * H, in_feats), jnp.float32, -k, k)
        w_hh = jax.random.uniform(k2, (4 * H, H), jnp.float32, -k, k)
        b_ih = jax.random.uniform(k3, (4 * H,), jnp.float32, -k, k)
        b_hh = jax.random.uniform(k4, (4 * H,), jnp.float32, -k, k)

        def embed(w_t):  # (H, 4H) -> (4H, 4H), real rows at [H, 2H)
            return jnp.zeros((4 * H, 4 * H), jnp.float32).at[H:2 * H].set(w_t)

        params.append({
            "w_ih_t": w_ih.T if layer == 0 else embed(w_ih.T),
            "w_hh_t": embed(w_hh.T),
            "bias": (b_ih + b_hh).reshape(1, 4 * H),
        })
    return params


def _lstm_reference(x, params):
    """Pure-JAX f32 reference (eval-mode stacked LSTM, nn.LSTM semantics)."""
    H = params[0]["bias"].shape[1] // 4
    layer_in = x
    h_list, c_list = [], []
    for l, p in enumerate(params):
        wih = p["w_ih_t"] if l == 0 else p["w_ih_t"][H:2 * H]  # un-embed padding
        whh = p["w_hh_t"][H:2 * H]
        b = p["bias"]
        h = jnp.zeros((x.shape[1], H), jnp.float32)
        c = jnp.zeros_like(h)
        outs = []
        for t in range(layer_in.shape[0]):
            g = layer_in[t] @ wih + h @ whh + b
            i_g = jax.nn.sigmoid(g[:, :H])
            f_g = jax.nn.sigmoid(g[:, H:2 * H])
            g_g = jnp.tanh(g[:, 2 * H:3 * H])
            o_g = jax.nn.sigmoid(g[:, 3 * H:])
            c = f_g * c + i_g * g_g
            h = o_g * jnp.tanh(c)
            outs.append(h)
        layer_in = jnp.stack(outs, 0)
        h_list.append(h)
        c_list.append(c)
    return layer_in, jnp.stack(h_list, 0), jnp.stack(c_list, 0)


if __name__ == "__main__":
    seq_len, batch, input_size, hidden_size, num_layers = 8, 2, 4, 32, 3

    key = jax.random.PRNGKey(0)
    key, kx = jax.random.split(key)
    x = jax.random.normal(kx, (seq_len, batch, input_size), dtype=jnp.float32)

    params = init_lstm_params(key, input_size, hidden_size, num_layers)

    lstm_out, (h_n, c_n) = lstm_encoder_forward(x, params)
    jax.block_until_ready((lstm_out, h_n, c_n))

    assert lstm_out.shape == (seq_len, batch, hidden_size)
    assert h_n.shape == (num_layers, batch, hidden_size)
    assert c_n.shape == (num_layers, batch, hidden_size)

    ref_out, ref_h, ref_c = _lstm_reference(x, params)
    # Loose bound covers default TPU matmul precision differences between the
    # in-kernel MXU dots and the XLA reference; gate-wiring errors are O(1).
    assert float(jnp.max(jnp.abs(lstm_out - ref_out))) < 5e-2
    assert float(jnp.max(jnp.abs(h_n - ref_h))) < 5e-2
    assert float(jnp.max(jnp.abs(c_n - ref_c))) < 5e-2

    print("KERNEL_OK")
</pallas_src>

<mosaic_0001>
module attributes {stable_mosaic.version = 11 : i64} {
  func.func @kernel(%arg0: memref<8x2x4xf32, #tpu.memory_space<vmem>>, %arg1: memref<4x128xf32, #tpu.memory_space<vmem>>, %arg2: memref<128x128xf32, #tpu.memory_space<vmem>>, %arg3: memref<1x128xf32, #tpu.memory_space<vmem>>, %arg4: memref<128x128xf32, #tpu.memory_space<vmem>>, %arg5: memref<128x128xf32, #tpu.memory_space<vmem>>, %arg6: memref<1x128xf32, #tpu.memory_space<vmem>>, %arg7: memref<128x128xf32, #tpu.memory_space<vmem>>, %arg8: memref<128x128xf32, #tpu.memory_space<vmem>>, %arg9: memref<1x128xf32, #tpu.memory_space<vmem>>, %arg10: memref<8x2x32xf32, #tpu.memory_space<vmem>>, %arg11: memref<3x2x32xf32, #tpu.memory_space<vmem>>, %arg12: memref<3x2x32xf32, #tpu.memory_space<vmem>>, %arg13: memref<8x2x128xf32, #tpu.memory_space<vmem>>, %arg14: memref<8x2x128xf32, #tpu.memory_space<vmem>>) attributes {dimension_semantics = [], scalar_prefetch = 0 : i64, scratch_operands = 2 : i64, tpu.core_type = #tpu.core_type<tc>} {
    %0 = tpu.iota {dimensions = array<i32: 1>} : vector<2x128xi32>
    %c64_i32 = arith.constant 64 : i32
    %1 = vector.broadcast %c64_i32 : i32 to vector<2x128xi32>
    %2 = arith.cmpi sge, %0, %1 : vector<2x128xi32>
    %c96_i32 = arith.constant 96 : i32
    %3 = vector.broadcast %c96_i32 : i32 to vector<2x128xi32>
    %4 = arith.cmpi slt, %0, %3 : vector<2x128xi32>
    %5 = arith.andi %2, %4 : vector<2x128xi1>
    %c0 = arith.constant 0 : index
    %c0_0 = arith.constant 0 : index
    %6 = vector.load %arg1[%c0, %c0_0] : memref<4x128xf32, #tpu.memory_space<vmem>>, vector<4x128xf32>
    %c0_1 = arith.constant 0 : index
    %c0_2 = arith.constant 0 : index
    %7 = vector.load %arg2[%c0_1, %c0_2] : memref<128x128xf32, #tpu.memory_space<vmem>>, vector<128x128xf32>
    %c0_3 = arith.constant 0 : index
    %c0_4 = arith.constant 0 : index
    %8 = vector.load %arg3[%c0_3, %c0_4] : memref<1x128xf32, #tpu.memory_space<vmem>>, vector<1x128xf32>
    %c0_5 = arith.constant 0 : index
    %c0_6 = arith.constant 0 : index
    %c0_7 = arith.constant 0 : index
    %9 = vector.load %arg0[%c0_5, %c0_6, %c0_7] : memref<8x2x4xf32, #tpu.memory_space<vmem>>, vector<8x2x4xf32>
    %cst = arith.constant dense<0.000000e+00> : vector<8x2x128xf32>
    %10 = tpu.matmul %9, %6, %cst {dimension_numbers = #tpu.dot_dimension_numbers<[2], [0], [0, 1], [1], [0, 0, 0, 1, 1, 1], [], []>} : vector<8x2x4xf32>, vector<4x128xf32>, vector<8x2x128xf32> -> vector<8x2x128xf32>
    %11 = vector.shape_cast %8 : vector<1x128xf32> to vector<1x1x128xf32>
    %12 = vector.broadcast %11 : vector<1x1x128xf32> to vector<8x2x128xf32>
    %13 = arith.addf %10, %12 : vector<8x2x128xf32>
    %cst_8 = arith.constant 0.000000e+00 : f32
    %14 = vector.broadcast %cst_8 : f32 to vector<2x128xf32>
    %cst_9 = arith.constant 0.000000e+00 : f32
    %15 = vector.broadcast %cst_9 : f32 to vector<2x128xf32>
    %16 = vector.extract_strided_slice %13 {offsets = [0, 0, 0], sizes = [1, 2, 128], strides = [1, 1, 1]} : vector<8x2x128xf32> to vector<1x2x128xf32>
    %17 = vector.shape_cast %16 : vector<1x2x128xf32> to vector<2x128xf32>
    %cst_10 = arith.constant dense<0.000000e+00> : vector<2x128xf32>
    %18 = tpu.matmul %14, %7, %cst_10 {dimension_numbers = #tpu.dot_dimension_numbers<[1], [0], [0], [1], [0, 0, 1, 1], [], []>} : vector<2x128xf32>, vector<128x128xf32>, vector<2x128xf32> -> vector<2x128xf32>
    %19 = arith.addf %17, %18 : vector<2x128xf32>
    %20 = math.tanh %19 : vector<2x128xf32>
    %21 = arith.negf %19 : vector<2x128xf32>
    %22 = math.exp %21 : vector<2x128xf32>
    %cst_11 = arith.constant 1.000000e+00 : f32
    %23 = vector.broadcast %cst_11 : f32 to vector<2x128xf32>
    %24 = arith.addf %23, %22 : vector<2x128xf32>
    %25 = arith.divf %23, %24 : vector<2x128xf32>
    %26 = arith.select %5, %20, %25 : vector<2x128xi1>, vector<2x128xf32>
    %c64_i32_12 = arith.constant 64 : i32
    %27 = tpu.dynamic_rotate %26 by %c64_i32_12 dim 1 : vector<2x128xf32>, i32 -> vector<2x128xf32>
    %28 = arith.mulf %26, %27 : vector<2x128xf32>
    %c32_i32 = arith.constant 32 : i32
    %29 = tpu.dynamic_rotate %28 by %c32_i32 dim 1 : vector<2x128xf32>, i32 -> vector<2x128xf32>
    %30 = arith.mulf %26, %15 : vector<2x128xf32>
    %31 = arith.addf %30, %29 : vector<2x128xf32>
    %32 = math.tanh %31 : vector<2x128xf32>
    %33 = arith.mulf %27, %32 : vector<2x128xf32>
    %c0_13 = arith.constant 0 : index
    %c0_14 = arith.constant 0 : index
    %c0_15 = arith.constant 0 : index
    %34 = vector.load %arg13[%c0_13, %c0_14, %c0_15] : memref<8x2x128xf32, #tpu.memory_space<vmem>>, vector<1x2x128xf32>
    %35 = vector.shape_cast %34 : vector<1x2x128xf32> to vector<2x128xf32>
    %36 = vector.shape_cast %33 : vector<2x128xf32> to vector<1x2x128xf32>
    tpu.vector_store %arg13[%c0_13, %c0_14, %c0_15], %36 {strides = array<i32>} : memref<8x2x128xf32, #tpu.memory_space<vmem>>, vector<1x2x128xf32>,
    %37 = vector.extract_strided_slice %13 {offsets = [1, 0, 0], sizes = [1, 2, 128], strides = [1, 1, 1]} : vector<8x2x128xf32> to vector<1x2x128xf32>
    %38 = vector.shape_cast %37 : vector<1x2x128xf32> to vector<2x128xf32>
    %cst_16 = arith.constant dense<0.000000e+00> : vector<2x128xf32>
    %39 = tpu.matmul %33, %7, %cst_16 {dimension_numbers = #tpu.dot_dimension_numbers<[1], [0], [0], [1], [0, 0, 1, 1], [], []>} : vector<2x128xf32>, vector<128x128xf32>, vector<2x128xf32> -> vector<2x128xf32>
    %40 = arith.addf %38, %39 : vector<2x128xf32>
    %41 = math.tanh %40 : vector<2x128xf32>
    %42 = arith.negf %40 : vector<2x128xf32>
    %43 = math.exp %42 : vector<2x128xf32>
    %cst_17 = arith.constant 1.000000e+00 : f32
    %44 = vector.broadcast %cst_17 : f32 to vector<2x128xf32>
    %45 = arith.addf %44, %43 : vector<2x128xf32>
    %46 = arith.divf %44, %45 : vector<2x128xf32>
    %47 = arith.select %5, %41, %46 : vector<2x128xi1>, vector<2x128xf32>
    %c64_i32_18 = arith.constant 64 : i32
    %48 = tpu.dynamic_rotate %47 by %c64_i32_18 dim 1 : vector<2x128xf32>, i32 -> vector<2x128xf32>
    %49 = arith.mulf %47, %48 : vector<2x128xf32>
    %c32_i32_19 = arith.constant 32 : i32
    %50 = tpu.dynamic_rotate %49 by %c32_i32_19 dim 1 : vector<2x128xf32>, i32 -> vector<2x128xf32>
    %51 = arith.mulf %47, %31 : vector<2x128xf32>
    %52 = arith.addf %51, %50 : vector<2x128xf32>
    %53 = math.tanh %52 : vector<2x128xf32>
    %54 = arith.mulf %48, %53 : vector<2x128xf32>
    %c1 = arith.constant 1 : index
    %c0_20 = arith.constant 0 : index
    %c0_21 = arith.constant 0 : index
    %55 = vector.load %arg13[%c1, %c0_20, %c0_21] : memref<8x2x128xf32, #tpu.memory_space<vmem>>, vector<1x2x128xf32>
    %56 = vector.shape_cast %55 : vector<1x2x128xf32> to vector<2x128xf32>
    %57 = vector.shape_cast %54 : vector<2x128xf32> to vector<1x2x128xf32>
    tpu.vector_store %arg13[%c1, %c0_20, %c0_21], %57 {strides = array<i32>} : memref<8x2x128xf32, #tpu.memory_space<vmem>>, vector<1x2x128xf32>,
    %58 = vector.extract_strided_slice %13 {offsets = [2, 0, 0], sizes = [1, 2, 128], strides = [1, 1, 1]} : vector<8x2x128xf32> to vector<1x2x128xf32>
    %59 = vector.shape_cast %58 : vector<1x2x128xf32> to vector<2x128xf32>
    %cst_22 = arith.constant dense<0.000000e+00> : vector<2x128xf32>
    %60 = tpu.matmul %54, %7, %cst_22 {dimension_numbers = #tpu.dot_dimension_numbers<[1], [0], [0], [1], [0, 0, 1, 1], [], []>} : vector<2x128xf32>, vector<128x128xf32>, vector<2x128xf32> -> vector<2x128xf32>
    %61 = arith.addf %59, %60 : vector<2x128xf32>
    %62 = math.tanh %61 : vector<2x128xf32>
    %63 = arith.negf %61 : vector<2x128xf32>
    %64 = math.exp %63 : vector<2x128xf32>
    %cst_23 = arith.constant 1.000000e+00 : f32
    %65 = vector.broadcast %cst_23 : f32 to vector<2x128xf32>
    %66 = arith.addf %65, %64 : vector<2x128xf32>
    %67 = arith.divf %65, %66 : vector<2x128xf32>
    %68 = arith.select %5, %62, %67 : vector<2x128xi1>, vector<2x128xf32>
    %c64_i32_24 = arith.constant 64 : i32
    %69 = tpu.dynamic_rotate %68 by %c64_i32_24 dim 1 : vector<2x128xf32>, i32 -> vector<2x128xf32>
    %70 = arith.mulf %68, %69 : vector<2x128xf32>
    %c32_i32_25 = arith.constant 32 : i32
    %71 = tpu.dynamic_rotate %70 by %c32_i32_25 dim 1 : vector<2x128xf32>, i32 -> vector<2x128xf32>
    %72 = arith.mulf %68, %52 : vector<2x128xf32>
    %73 = arith.addf %72, %71 : vector<2x128xf32>
    %74 = math.tanh %73 : vector<2x128xf32>
    %75 = arith.mulf %69, %74 : vector<2x128xf32>
    %c2 = arith.constant 2 : index
    %c0_26 = arith.constant 0 : index
    %c0_27 = arith.constant 0 : index
    %76 = vector.load %arg13[%c2, %c0_26, %c0_27] : memref<8x2x128xf32, #tpu.memory_space<vmem>>, vector<1x2x128xf32>
    %77 = vector.shape_cast %76 : vector<1x2x128xf32> to vector<2x128xf32>
    %78 = vector.shape_cast %75 : vector<2x128xf32> to vector<1x2x128xf32>
    tpu.vector_store %arg13[%c2, %c0_26, %c0_27], %78 {strides = array<i32>} : memref<8x2x128xf32, #tpu.memory_space<vmem>>, vector<1x2x128xf32>,
    %79 = vector.extract_strided_slice %13 {offsets = [3, 0, 0], sizes = [1, 2, 128], strides = [1, 1, 1]} : vector<8x2x128xf32> to vector<1x2x128xf32>
    %80 = vector.shape_cast %79 : vector<1x2x128xf32> to vector<2x128xf32>
    %cst_28 = arith.constant dense<0.000000e+00> : vector<2x128xf32>
    %81 = tpu.matmul %75, %7, %cst_28 {dimension_numbers = #tpu.dot_dimension_numbers<[1], [0], [0], [1], [0, 0, 1, 1], [], []>} : vector<2x128xf32>, vector<128x128xf32>, vector<2x128xf32> -> vector<2x128xf32>
    %82 = arith.addf %80, %81 : vector<2x128xf32>
    %83 = math.tanh %82 : vector<2x128xf32>
    %84 = arith.negf %82 : vector<2x128xf32>
    %85 = math.exp %84 : vector<2x128xf32>
    %cst_29 = arith.constant 1.000000e+00 : f32
    %86 = vector.broadcast %cst_29 : f32 to vector<2x128xf32>
    %87 = arith.addf %86, %85 : vector<2x128xf32>
    %88 = arith.divf %86, %87 : vector<2x128xf32>
    %89 = arith.select %5, %83, %88 : vector<2x128xi1>, vector<2x128xf32>
    %c64_i32_30 = arith.constant 64 : i32
    %90 = tpu.dynamic_rotate %89 by %c64_i32_30 dim 1 : vector<2x128xf32>, i32 -> vector<2x128xf32>
    %91 = arith.mulf %89, %90 : vector<2x128xf32>
    %c32_i32_31 = arith.constant 32 : i32
    %92 = tpu.dynamic_rotate %91 by %c32_i32_31 dim 1 : vector<2x128xf32>, i32 -> vector<2x128xf32>
    %93 = arith.mulf %89, %73 : vector<2x128xf32>
    %94 = arith.addf %93, %92 : vector<2x128xf32>
    %95 = math.tanh %94 : vector<2x128xf32>
    %96 = arith.mulf %90, %95 : vector<2x128xf32>
    %c3 = arith.constant 3 : index
    %c0_32 = arith.constant 0 : index
    %c0_33 = arith.constant 0 : index
    %97 = vector.load %arg13[%c3, %c0_32, %c0_33] : memref<8x2x128xf32, #tpu.memory_space<vmem>>, vector<1x2x128xf32>
    %98 = vector.shape_cast %97 : vector<1x2x128xf32> to vector<2x128xf32>
    %99 = vector.shape_cast %96 : vector<2x128xf32> to vector<1x2x128xf32>
    tpu.vector_store %arg13[%c3, %c0_32, %c0_33], %99 {strides = array<i32>} : memref<8x2x128xf32, #tpu.memory_space<vmem>>, vector<1x2x128xf32>,
    %100 = vector.extract_strided_slice %13 {offsets = [4, 0, 0], sizes = [1, 2, 128], strides = [1, 1, 1]} : vector<8x2x128xf32> to vector<1x2x128xf32>
    %101 = vector.shape_cast %100 : vector<1x2x128xf32> to vector<2x128xf32>
    %cst_34 = arith.constant dense<0.000000e+00> : vector<2x128xf32>
    %102 = tpu.matmul %96, %7, %cst_34 {dimension_numbers = #tpu.dot_dimension_numbers<[1], [0], [0], [1], [0, 0, 1, 1], [], []>} : vector<2x128xf32>, vector<128x128xf32>, vector<2x128xf32> -> vector<2x128xf32>
    %103 = arith.addf %101, %102 : vector<2x128xf32>
    %104 = math.tanh %103 : vector<2x128xf32>
    %105 = arith.negf %103 : vector<2x128xf32>
    %106 = math.exp %105 : vector<2x128xf32>
    %cst_35 = arith.constant 1.000000e+00 : f32
    %107 = vector.broadcast %cst_35 : f32 to vector<2x128xf32>
    %108 = arith.addf %107, %106 : vector<2x128xf32>
    %109 = arith.divf %107, %108 : vector<2x128xf32>
    %110 = arith.select %5, %104, %109 : vector<2x128xi1>, vector<2x128xf32>
    %c64_i32_36 = arith.constant 64 : i32
    %111 = tpu.dynamic_rotate %110 by %c64_i32_36 dim 1 : vector<2x128xf32>, i32 -> vector<2x128xf32>
    %112 = arith.mulf %110, %111 : vector<2x128xf32>
    %c32_i32_37 = arith.constant 32 : i32
    %113 = tpu.dynamic_rotate %112 by %c32_i32_37 dim 1 : vector<2x128xf32>, i32 -> vector<2x128xf32>
    %114 = arith.mulf %110, %94 : vector<2x128xf32>
    %115 = arith.addf %114, %113 : vector<2x128xf32>
    %116 = math.tanh %115 : vector<2x128xf32>
    %117 = arith.mulf %111, %116 : vector<2x128xf32>
    %c4 = arith.constant 4 : index
    %c0_38 = arith.constant 0 : index
    %c0_39 = arith.constant 0 : index
    %118 = vector.load %arg13[%c4, %c0_38, %c0_39] : memref<8x2x128xf32, #tpu.memory_space<vmem>>, vector<1x2x128xf32>
    %119 = vector.shape_cast %118 : vector<1x2x128xf32> to vector<2x128xf32>
    %120 = vector.shape_cast %117 : vector<2x128xf32> to vector<1x2x128xf32>
    tpu.vector_store %arg13[%c4, %c0_38, %c0_39], %120 {strides = array<i32>} : memref<8x2x128xf32, #tpu.memory_space<vmem>>, vector<1x2x128xf32>,
    %121 = vector.extract_strided_slice %13 {offsets = [5, 0, 0], sizes = [1, 2, 128], strides = [1, 1, 1]} : vector<8x2x128xf32> to vector<1x2x128xf32>
    %122 = vector.shape_cast %121 : vector<1x2x128xf32> to vector<2x128xf32>
    %cst_40 = arith.constant dense<0.000000e+00> : vector<2x128xf32>
    %123 = tpu.matmul %117, %7, %cst_40 {dimension_numbers = #tpu.dot_dimension_numbers<[1], [0], [0], [1], [0, 0, 1, 1], [], []>} : vector<2x128xf32>, vector<128x128xf32>, vector<2x128xf32> -> vector<2x128xf32>
    %124 = arith.addf %122, %123 : vector<2x128xf32>
    %125 = math.tanh %124 : vector<2x128xf32>
    %126 = arith.negf %124 : vector<2x128xf32>
    %127 = math.exp %126 : vector<2x128xf32>
    %cst_41 = arith.constant 1.000000e+00 : f32
    %128 = vector.broadcast %cst_41 : f32 to vector<2x128xf32>
    %129 = arith.addf %128, %127 : vector<2x128xf32>
    %130 = arith.divf %128, %129 : vector<2x128xf32>
    %131 = arith.select %5, %125, %130 : vector<2x128xi1>, vector<2x128xf32>
    %c64_i32_42 = arith.constant 64 : i32
    %132 = tpu.dynamic_rotate %131 by %c64_i32_42 dim 1 : vector<2x128xf32>, i32 -> vector<2x128xf32>
    %133 = arith.mulf %131, %132 : vector<2x128xf32>
    %c32_i32_43 = arith.constant 32 : i32
    %134 = tpu.dynamic_rotate %133 by %c32_i32_43 dim 1 : vector<2x128xf32>, i32 -> vector<2x128xf32>
    %135 = arith.mulf %131, %115 : vector<2x128xf32>
    %136 = arith.addf %135, %134 : vector<2x128xf32>
    %137 = math.tanh %136 : vector<2x128xf32>
    %138 = arith.mulf %132, %137 : vector<2x128xf32>
    %c5 = arith.constant 5 : index
    %c0_44 = arith.constant 0 : index
    %c0_45 = arith.constant 0 : index
    %139 = vector.load %arg13[%c5, %c0_44, %c0_45] : memref<8x2x128xf32, #tpu.memory_space<vmem>>, vector<1x2x128xf32>
    %140 = vector.shape_cast %139 : vector<1x2x128xf32> to vector<2x128xf32>
    %141 = vector.shape_cast %138 : vector<2x128xf32> to vector<1x2x128xf32>
    tpu.vector_store %arg13[%c5, %c0_44, %c0_45], %141 {strides = array<i32>} : memref<8x2x128xf32, #tpu.memory_space<vmem>>, vector<1x2x128xf32>,
    %142 = vector.extract_strided_slice %13 {offsets = [6, 0, 0], sizes = [1, 2, 128], strides = [1, 1, 1]} : vector<8x2x128xf32> to vector<1x2x128xf32>
    %143 = vector.shape_cast %142 : vector<1x2x128xf32> to vector<2x128xf32>
    %cst_46 = arith.constant dense<0.000000e+00> : vector<2x128xf32>
    %144 = tpu.matmul %138, %7, %cst_46 {dimension_numbers = #tpu.dot_dimension_numbers<[1], [0], [0], [1], [0, 0, 1, 1], [], []>} : vector<2x128xf32>, vector<128x128xf32>, vector<2x128xf32> -> vector<2x128xf32>
    %145 = arith.addf %143, %144 : vector<2x128xf32>
    %146 = math.tanh %145 : vector<2x128xf32>
    %147 = arith.negf %145 : vector<2x128xf32>
    %148 = math.exp %147 : vector<2x128xf32>
    %cst_47 = arith.constant 1.000000e+00 : f32
    %149 = vector.broadcast %cst_47 : f32 to vector<2x128xf32>
    %150 = arith.addf %149, %148 : vector<2x128xf32>
    %151 = arith.divf %149, %150 : vector<2x128xf32>
    %152 = arith.select %5, %146, %151 : vector<2x128xi1>, vector<2x128xf32>
    %c64_i32_48 = arith.constant 64 : i32
    %153 = tpu.dynamic_rotate %152 by %c64_i32_48 dim 1 : vector<2x128xf32>, i32 -> vector<2x128xf32>
    %154 = arith.mulf %152, %153 : vector<2x128xf32>
    %c32_i32_49 = arith.constant 32 : i32
    %155 = tpu.dynamic_rotate %154 by %c32_i32_49 dim 1 : vector<2x128xf32>, i32 -> vector<2x128xf32>
    %156 = arith.mulf %152, %136 : vector<2x128xf32>
    %157 = arith.addf %156, %155 : vector<2x128xf32>
    %158 = math.tanh %157 : vector<2x128xf32>
    %159 = arith.mulf %153, %158 : vector<2x128xf32>
    %c6 = arith.constant 6 : index
    %c0_50 = arith.constant 0 : index
    %c0_51 = arith.constant 0 : index
    %160 = vector.load %arg13[%c6, %c0_50, %c0_51] : memref<8x2x128xf32, #tpu.memory_space<vmem>>, vector<1x2x128xf32>
    %161 = vector.shape_cast %160 : vector<1x2x128xf32> to vector<2x128xf32>
    %162 = vector.shape_cast %159 : vector<2x128xf32> to vector<1x2x128xf32>
    tpu.vector_store %arg13[%c6, %c0_50, %c0_51], %162 {strides = array<i32>} : memref<8x2x128xf32, #tpu.memory_space<vmem>>, vector<1x2x128xf32>,
    %163 = vector.extract_strided_slice %13 {offsets = [7, 0, 0], sizes = [1, 2, 128], strides = [1, 1, 1]} : vector<8x2x128xf32> to vector<1x2x128xf32>
    %164 = vector.shape_cast %163 : vector<1x2x128xf32> to vector<2x128xf32>
    %cst_52 = arith.constant dense<0.000000e+00> : vector<2x128xf32>
    %165 = tpu.matmul %159, %7, %cst_52 {dimension_numbers = #tpu.dot_dimension_numbers<[1], [0], [0], [1], [0, 0, 1, 1], [], []>} : vector<2x128xf32>, vector<128x128xf32>, vector<2x128xf32> -> vector<2x128xf32>
    %166 = arith.addf %164, %165 : vector<2x128xf32>
    %167 = math.tanh %166 : vector<2x128xf32>
    %168 = arith.negf %166 : vector<2x128xf32>
    %169 = math.exp %168 : vector<2x128xf32>
    %cst_53 = arith.constant 1.000000e+00 : f32
    %170 = vector.broadcast %cst_53 : f32 to vector<2x128xf32>
    %171 = arith.addf %170, %169 : vector<2x128xf32>
    %172 = arith.divf %170, %171 : vector<2x128xf32>
    %173 = arith.select %5, %167, %172 : vector<2x128xi1>, vector<2x128xf32>
    %c64_i32_54 = arith.constant 64 : i32
    %174 = tpu.dynamic_rotate %173 by %c64_i32_54 dim 1 : vector<2x128xf32>, i32 -> vector<2x128xf32>
    %175 = arith.mulf %173, %174 : vector<2x128xf32>
    %c32_i32_55 = arith.constant 32 : i32
    %176 = tpu.dynamic_rotate %175 by %c32_i32_55 dim 1 : vector<2x128xf32>, i32 -> vector<2x128xf32>
    %177 = arith.mulf %173, %157 : vector<2x128xf32>
    %178 = arith.addf %177, %176 : vector<2x128xf32>
    %179 = math.tanh %178 : vector<2x128xf32>
    %180 = arith.mulf %174, %179 : vector<2x128xf32>
    %c7 = arith.constant 7 : index
    %c0_56 = arith.constant 0 : index
    %c0_57 = arith.constant 0 : index
    %181 = vector.load %arg13[%c7, %c0_56, %c0_57] : memref<8x2x128xf32, #tpu.memory_space<vmem>>, vector<1x2x128xf32>
    %182 = vector.shape_cast %181 : vector<1x2x128xf32> to vector<2x128xf32>
    %183 = vector.shape_cast %180 : vector<2x128xf32> to vector<1x2x128xf32>
    tpu.vector_store %arg13[%c7, %c0_56, %c0_57], %183 {strides = array<i32>} : memref<8x2x128xf32, #tpu.memory_space<vmem>>, vector<1x2x128xf32>,
    %184 = vector.extract_strided_slice %180 {offsets = [0, 32], sizes = [2, 32], strides = [1, 1]} : vector<2x128xf32> to vector<2x32xf32>
    %c0_58 = arith.constant 0 : index
    %c0_59 = arith.constant 0 : index
    %c0_60 = arith.constant 0 : index
    %185 = vector.load %arg11[%c0_58, %c0_59, %c0_60] : memref<3x2x32xf32, #tpu.memory_space<vmem>>, vector<1x2x32xf32>
    %186 = vector.shape_cast %185 : vector<1x2x32xf32> to vector<2x32xf32>
    %187 = vector.shape_cast %184 : vector<2x32xf32> to vector<1x2x32xf32>
    tpu.vector_store %arg11[%c0_58, %c0_59, %c0_60], %187 {strides = array<i32>} : memref<3x2x32xf32, #tpu.memory_space<vmem>>, vector<1x2x32xf32>,
    %188 = vector.extract_strided_slice %178 {offsets = [0, 32], sizes = [2, 32], strides = [1, 1]} : vector<2x128xf32> to vector<2x32xf32>
    %c0_61 = arith.constant 0 : index
    %c0_62 = arith.constant 0 : index
    %c0_63 = arith.constant 0 : index
    %189 = vector.load %arg12[%c0_61, %c0_62, %c0_63] : memref<3x2x32xf32, #tpu.memory_space<vmem>>, vector<1x2x32xf32>
    %190 = vector.shape_cast %189 : vector<1x2x32xf32> to vector<2x32xf32>
    %191 = vector.shape_cast %188 : vector<2x32xf32> to vector<1x2x32xf32>
    tpu.vector_store %arg12[%c0_61, %c0_62, %c0_63], %191 {strides = array<i32>} : memref<3x2x32xf32, #tpu.memory_space<vmem>>, vector<1x2x32xf32>,
    %c0_64 = arith.constant 0 : index
    %c0_65 = arith.constant 0 : index
    %192 = vector.load %arg4[%c0_64, %c0_65] : memref<128x128xf32, #tpu.memory_space<vmem>>, vector<128x128xf32>
    %c0_66 = arith.constant 0 : index
    %c0_67 = arith.constant 0 : index
    %193 = vector.load %arg5[%c0_66, %c0_67] : memref<128x128xf32, #tpu.memory_space<vmem>>, vector<128x128xf32>
    %c0_68 = arith.constant 0 : index
    %c0_69 = arith.constant 0 : index
    %194 = vector.load %arg6[%c0_68, %c0_69] : memref<1x128xf32, #tpu.memory_space<vmem>>, vector<1x128xf32>
    %c0_70 = arith.constant 0 : index
    %c0_71 = arith.constant 0 : index
    %c0_72 = arith.constant 0 : index
    %195 = vector.load %arg13[%c0_70, %c0_71, %c0_72] : memref<8x2x128xf32, #tpu.memory_space<vmem>>, vector<8x2x128xf32>
    %cst_73 = arith.constant dense<0.000000e+00> : vector<8x2x128xf32>
    %196 = tpu.matmul %195, %192, %cst_73 {dimension_numbers = #tpu.dot_dimension_numbers<[2], [0], [0, 1], [1], [0, 0, 0, 1, 1, 1], [], []>} : vector<8x2x128xf32>, vector<128x128xf32>, vector<8x2x128xf32> -> vector<8x2x128xf32>
    %197 = vector.shape_cast %194 : vector<1x128xf32> to vector<1x1x128xf32>
    %198 = vector.broadcast %197 : vector<1x1x128xf32> to vector<8x2x128xf32>
    %199 = arith.addf %196, %198 : vector<8x2x128xf32>
    %cst_74 = arith.constant 0.000000e+00 : f32
    %200 = vector.broadcast %cst_74 : f32 to vector<2x128xf32>
    %cst_75 = arith.constant 0.000000e+00 : f32
    %201 = vector.broadcast %cst_75 : f32 to vector<2x128xf32>
    %202 = vector.extract_strided_slice %199 {offsets = [0, 0, 0], sizes = [1, 2, 128], strides = [1, 1, 1]} : vector<8x2x128xf32> to vector<1x2x128xf32>
    %203 = vector.shape_cast %202 : vector<1x2x128xf32> to vector<2x128xf32>
    %cst_76 = arith.constant dense<0.000000e+00> : vector<2x128xf32>
    %204 = tpu.matmul %200, %193, %cst_76 {dimension_numbers = #tpu.dot_dimension_numbers<[1], [0], [0], [1], [0, 0, 1, 1], [], []>} : vector<2x128xf32>, vector<128x128xf32>, vector<2x128xf32> -> vector<2x128xf32>
    %205 = arith.addf %203, %204 : vector<2x128xf32>
    %206 = math.tanh %205 : vector<2x128xf32>
    %207 = arith.negf %205 : vector<2x128xf32>
    %208 = math.exp %207 : vector<2x128xf32>
    %cst_77 = arith.constant 1.000000e+00 : f32
    %209 = vector.broadcast %cst_77 : f32 to vector<2x128xf32>
    %210 = arith.addf %209, %208 : vector<2x128xf32>
    %211 = arith.divf %209, %210 : vector<2x128xf32>
    %212 = arith.select %5, %206, %211 : vector<2x128xi1>, vector<2x128xf32>
    %c64_i32_78 = arith.constant 64 : i32
    %213 = tpu.dynamic_rotate %212 by %c64_i32_78 dim 1 : vector<2x128xf32>, i32 -> vector<2x128xf32>
    %214 = arith.mulf %212, %213 : vector<2x128xf32>
    %c32_i32_79 = arith.constant 32 : i32
    %215 = tpu.dynamic_rotate %214 by %c32_i32_79 dim 1 : vector<2x128xf32>, i32 -> vector<2x128xf32>
    %216 = arith.mulf %212, %201 : vector<2x128xf32>
    %217 = arith.addf %216, %215 : vector<2x128xf32>
    %218 = math.tanh %217 : vector<2x128xf32>
    %219 = arith.mulf %213, %218 : vector<2x128xf32>
    %c0_80 = arith.constant 0 : index
    %c0_81 = arith.constant 0 : index
    %c0_82 = arith.constant 0 : index
    %220 = vector.load %arg14[%c0_80, %c0_81, %c0_82] : memref<8x2x128xf32, #tpu.memory_space<vmem>>, vector<1x2x128xf32>
    %221 = vector.shape_cast %220 : vector<1x2x128xf32> to vector<2x128xf32>
    %222 = vector.shape_cast %219 : vector<2x128xf32> to vector<1x2x128xf32>
    tpu.vector_store %arg14[%c0_80, %c0_81, %c0_82], %222 {strides = array<i32>} : memref<8x2x128xf32, #tpu.memory_space<vmem>>, vector<1x2x128xf32>,
    %223 = vector.extract_strided_slice %199 {offsets = [1, 0, 0], sizes = [1, 2, 128], strides = [1, 1, 1]} : vector<8x2x128xf32> to vector<1x2x128xf32>
    %224 = vector.shape_cast %223 : vector<1x2x128xf32> to vector<2x128xf32>
    %cst_83 = arith.constant dense<0.000000e+00> : vector<2x128xf32>
    %225 = tpu.matmul %219, %193, %cst_83 {dimension_numbers = #tpu.dot_dimension_numbers<[1], [0], [0], [1], [0, 0, 1, 1], [], []>} : vector<2x128xf32>, vector<128x128xf32>, vector<2x128xf32> -> vector<2x128xf32>
    %226 = arith.addf %224, %225 : vector<2x128xf32>
    %227 = math.tanh %226 : vector<2x128xf32>
    %228 = arith.negf %226 : vector<2x128xf32>
    %229 = math.exp %228 : vector<2x128xf32>
    %cst_84 = arith.constant 1.000000e+00 : f32
    %230 = vector.broadcast %cst_84 : f32 to vector<2x128xf32>
    %231 = arith.addf %230, %229 : vector<2x128xf32>
    %232 = arith.divf %230, %231 : vector<2x128xf32>
    %233 = arith.select %5, %227, %232 : vector<2x128xi1>, vector<2x128xf32>
    %c64_i32_85 = arith.constant 64 : i32
    %234 = tpu.dynamic_rotate %233 by %c64_i32_85 dim 1 : vector<2x128xf32>, i32 -> vector<2x128xf32>
    %235 = arith.mulf %233, %234 : vector<2x128xf32>
    %c32_i32_86 = arith.constant 32 : i32
    %236 = tpu.dynamic_rotate %235 by %c32_i32_86 dim 1 : vector<2x128xf32>, i32 -> vector<2x128xf32>
    %237 = arith.mulf %233, %217 : vector<2x128xf32>
    %238 = arith.addf %237, %236 : vector<2x128xf32>
    %239 = math.tanh %238 : vector<2x128xf32>
    %240 = arith.mulf %234, %239 : vector<2x128xf32>
    %c1_87 = arith.constant 1 : index
    %c0_88 = arith.constant 0 : index
    %c0_89 = arith.constant 0 : index
    %241 = vector.load %arg14[%c1_87, %c0_88, %c0_89] : memref<8x2x128xf32, #tpu.memory_space<vmem>>, vector<1x2x128xf32>
    %242 = vector.shape_cast %241 : vector<1x2x128xf32> to vector<2x128xf32>
    %243 = vector.shape_cast %240 : vector<2x128xf32> to vector<1x2x128xf32>
    tpu.vector_store %arg14[%c1_87, %c0_88, %c0_89], %243 {strides = array<i32>} : memref<8x2x128xf32, #tpu.memory_space<vmem>>, vector<1x2x128xf32>,
    %244 = vector.extract_strided_slice %199 {offsets = [2, 0, 0], sizes = [1, 2, 128], strides = [1, 1, 1]} : vector<8x2x128xf32> to vector<1x2x128xf32>
    %245 = vector.shape_cast %244 : vector<1x2x128xf32> to vector<2x128xf32>
    %cst_90 = arith.constant dense<0.000000e+00> : vector<2x128xf32>
    %246 = tpu.matmul %240, %193, %cst_90 {dimension_numbers = #tpu.dot_dimension_numbers<[1], [0], [0], [1], [0, 0, 1, 1], [], []>} : vector<2x128xf32>, vector<128x128xf32>, vector<2x128xf32> -> vector<2x128xf32>
    %247 = arith.addf %245, %246 : vector<2x128xf32>
    %248 = math.tanh %247 : vector<2x128xf32>
    %249 = arith.negf %247 : vector<2x128xf32>
    %250 = math.exp %249 : vector<2x128xf32>
    %cst_91 = arith.constant 1.000000e+00 : f32
    %251 = vector.broadcast %cst_91 : f32 to vector<2x128xf32>
    %252 = arith.addf %251, %250 : vector<2x128xf32>
    %253 = arith.divf %251, %252 : vector<2x128xf32>
    %254 = arith.select %5, %248, %253 : vector<2x128xi1>, vector<2x128xf32>
    %c64_i32_92 = arith.constant 64 : i32
    %255 = tpu.dynamic_rotate %254 by %c64_i32_92 dim 1 : vector<2x128xf32>, i32 -> vector<2x128xf32>
    %256 = arith.mulf %254, %255 : vector<2x128xf32>
    %c32_i32_93 = arith.constant 32 : i32
    %257 = tpu.dynamic_rotate %256 by %c32_i32_93 dim 1 : vector<2x128xf32>, i32 -> vector<2x128xf32>
    %258 = arith.mulf %254, %238 : vector<2x128xf32>
    %259 = arith.addf %258, %257 : vector<2x128xf32>
    %260 = math.tanh %259 : vector<2x128xf32>
    %261 = arith.mulf %255, %260 : vector<2x128xf32>
    %c2_94 = arith.constant 2 : index
    %c0_95 = arith.constant 0 : index
    %c0_96 = arith.constant 0 : index
    %262 = vector.load %arg14[%c2_94, %c0_95, %c0_96] : memref<8x2x128xf32, #tpu.memory_space<vmem>>, vector<1x2x128xf32>
    %263 = vector.shape_cast %262 : vector<1x2x128xf32> to vector<2x128xf32>
    %264 = vector.shape_cast %261 : vector<2x128xf32> to vector<1x2x128xf32>
    tpu.vector_store %arg14[%c2_94, %c0_95, %c0_96], %264 {strides = array<i32>} : memref<8x2x128xf32, #tpu.memory_space<vmem>>, vector<1x2x128xf32>,
    %265 = vector.extract_strided_slice %199 {offsets = [3, 0, 0], sizes = [1, 2, 128], strides = [1, 1, 1]} : vector<8x2x128xf32> to vector<1x2x128xf32>
    %266 = vector.shape_cast %265 : vector<1x2x128xf32> to vector<2x128xf32>
    %cst_97 = arith.constant dense<0.000000e+00> : vector<2x128xf32>
    %267 = tpu.matmul %261, %193, %cst_97 {dimension_numbers = #tpu.dot_dimension_numbers<[1], [0], [0], [1], [0, 0, 1, 1], [], []>} : vector<2x128xf32>, vector<128x128xf32>, vector<2x128xf32> -> vector<2x128xf32>
    %268 = arith.addf %266, %267 : vector<2x128xf32>
    %269 = math.tanh %268 : vector<2x128xf32>
    %270 = arith.negf %268 : vector<2x128xf32>
    %271 = math.exp %270 : vector<2x128xf32>
    %cst_98 = arith.constant 1.000000e+00 : f32
    %272 = vector.broadcast %cst_98 : f32 to vector<2x128xf32>
    %273 = arith.addf %272, %271 : vector<2x128xf32>
    %274 = arith.divf %272, %273 : vector<2x128xf32>
    %275 = arith.select %5, %269, %274 : vector<2x128xi1>, vector<2x128xf32>
    %c64_i32_99 = arith.constant 64 : i32
    %276 = tpu.dynamic_rotate %275 by %c64_i32_99 dim 1 : vector<2x128xf32>, i32 -> vector<2x128xf32>
    %277 = arith.mulf %275, %276 : vector<2x128xf32>
    %c32_i32_100 = arith.constant 32 : i32
    %278 = tpu.dynamic_rotate %277 by %c32_i32_100 dim 1 : vector<2x128xf32>, i32 -> vector<2x128xf32>
    %279 = arith.mulf %275, %259 : vector<2x128xf32>
    %280 = arith.addf %279, %278 : vector<2x128xf32>
    %281 = math.tanh %280 : vector<2x128xf32>
    %282 = arith.mulf %276, %281 : vector<2x128xf32>
    %c3_101 = arith.constant 3 : index
    %c0_102 = arith.constant 0 : index
    %c0_103 = arith.constant 0 : index
    %283 = vector.load %arg14[%c3_101, %c0_102, %c0_103] : memref<8x2x128xf32, #tpu.memory_space<vmem>>, vector<1x2x128xf32>
    %284 = vector.shape_cast %283 : vector<1x2x128xf32> to vector<2x128xf32>
    %285 = vector.shape_cast %282 : vector<2x128xf32> to vector<1x2x128xf32>
    tpu.vector_store %arg14[%c3_101, %c0_102, %c0_103], %285 {strides = array<i32>} : memref<8x2x128xf32, #tpu.memory_space<vmem>>, vector<1x2x128xf32>,
    %286 = vector.extract_strided_slice %199 {offsets = [4, 0, 0], sizes = [1, 2, 128], strides = [1, 1, 1]} : vector<8x2x128xf32> to vector<1x2x128xf32>
    %287 = vector.shape_cast %286 : vector<1x2x128xf32> to vector<2x128xf32>
    %cst_104 = arith.constant dense<0.000000e+00> : vector<2x128xf32>
    %288 = tpu.matmul %282, %193, %cst_104 {dimension_numbers = #tpu.dot_dimension_numbers<[1], [0], [0], [1], [0, 0, 1, 1], [], []>} : vector<2x128xf32>, vector<128x128xf32>, vector<2x128xf32> -> vector<2x128xf32>
    %289 = arith.addf %287, %288 : vector<2x128xf32>
    %290 = math.tanh %289 : vector<2x128xf32>
    %291 = arith.negf %289 : vector<2x128xf32>
    %292 = math.exp %291 : vector<2x128xf32>
    %cst_105 = arith.constant 1.000000e+00 : f32
    %293 = vector.broadcast %cst_105 : f32 to vector<2x128xf32>
    %294 = arith.addf %293, %292 : vector<2x128xf32>
    %295 = arith.divf %293, %294 : vector<2x128xf32>
    %296 = arith.select %5, %290, %295 : vector<2x128xi1>, vector<2x128xf32>
    %c64_i32_106 = arith.constant 64 : i32
    %297 = tpu.dynamic_rotate %296 by %c64_i32_106 dim 1 : vector<2x128xf32>, i32 -> vector<2x128xf32>
    %298 = arith.mulf %296, %297 : vector<2x128xf32>
    %c32_i32_107 = arith.constant 32 : i32
    %299 = tpu.dynamic_rotate %298 by %c32_i32_107 dim 1 : vector<2x128xf32>, i32 -> vector<2x128xf32>
    %300 = arith.mulf %296, %280 : vector<2x128xf32>
    %301 = arith.addf %300, %299 : vector<2x128xf32>
    %302 = math.tanh %301 : vector<2x128xf32>
    %303 = arith.mulf %297, %302 : vector<2x128xf32>
    %c4_108 = arith.constant 4 : index
    %c0_109 = arith.constant 0 : index
    %c0_110 = arith.constant 0 : index
    %304 = vector.load %arg14[%c4_108, %c0_109, %c0_110] : memref<8x2x128xf32, #tpu.memory_space<vmem>>, vector<1x2x128xf32>
    %305 = vector.shape_cast %304 : vector<1x2x128xf32> to vector<2x128xf32>
    %306 = vector.shape_cast %303 : vector<2x128xf32> to vector<1x2x128xf32>
    tpu.vector_store %arg14[%c4_108, %c0_109, %c0_110], %306 {strides = array<i32>} : memref<8x2x128xf32, #tpu.memory_space<vmem>>, vector<1x2x128xf32>,
    %307 = vector.extract_strided_slice %199 {offsets = [5, 0, 0], sizes = [1, 2, 128], strides = [1, 1, 1]} : vector<8x2x128xf32> to vector<1x2x128xf32>
    %308 = vector.shape_cast %307 : vector<1x2x128xf32> to vector<2x128xf32>
    %cst_111 = arith.constant dense<0.000000e+00> : vector<2x128xf32>
    %309 = tpu.matmul %303, %193, %cst_111 {dimension_numbers = #tpu.dot_dimension_numbers<[1], [0], [0], [1], [0, 0, 1, 1], [], []>} : vector<2x128xf32>, vector<128x128xf32>, vector<2x128xf32> -> vector<2x128xf32>
    %310 = arith.addf %308, %309 : vector<2x128xf32>
    %311 = math.tanh %310 : vector<2x128xf32>
    %312 = arith.negf %310 : vector<2x128xf32>
    %313 = math.exp %312 : vector<2x128xf32>
    %cst_112 = arith.constant 1.000000e+00 : f32
    %314 = vector.broadcast %cst_112 : f32 to vector<2x128xf32>
    %315 = arith.addf %314, %313 : vector<2x128xf32>
    %316 = arith.divf %314, %315 : vector<2x128xf32>
    %317 = arith.select %5, %311, %316 : vector<2x128xi1>, vector<2x128xf32>
    %c64_i32_113 = arith.constant 64 : i32
    %318 = tpu.dynamic_rotate %317 by %c64_i32_113 dim 1 : vector<2x128xf32>, i32 -> vector<2x128xf32>
    %319 = arith.mulf %317, %318 : vector<2x128xf32>
    %c32_i32_114 = arith.constant 32 : i32
    %320 = tpu.dynamic_rotate %319 by %c32_i32_114 dim 1 : vector<2x128xf32>, i32 -> vector<2x128xf32>
    %321 = arith.mulf %317, %301 : vector<2x128xf32>
    %322 = arith.addf %321, %320 : vector<2x128xf32>
    %323 = math.tanh %322 : vector<2x128xf32>
    %324 = arith.mulf %318, %323 : vector<2x128xf32>
    %c5_115 = arith.constant 5 : index
    %c0_116 = arith.constant 0 : index
    %c0_117 = arith.constant 0 : index
    %325 = vector.load %arg14[%c5_115, %c0_116, %c0_117] : memref<8x2x128xf32, #tpu.memory_space<vmem>>, vector<1x2x128xf32>
    %326 = vector.shape_cast %325 : vector<1x2x128xf32> to vector<2x128xf32>
    %327 = vector.shape_cast %324 : vector<2x128xf32> to vector<1x2x128xf32>
    tpu.vector_store %arg14[%c5_115, %c0_116, %c0_117], %327 {strides = array<i32>} : memref<8x2x128xf32, #tpu.memory_space<vmem>>, vector<1x2x128xf32>,
    %328 = vector.extract_strided_slice %199 {offsets = [6, 0, 0], sizes = [1, 2, 128], strides = [1, 1, 1]} : vector<8x2x128xf32> to vector<1x2x128xf32>
    %329 = vector.shape_cast %328 : vector<1x2x128xf32> to vector<2x128xf32>
    %cst_118 = arith.constant dense<0.000000e+00> : vector<2x128xf32>
    %330 = tpu.matmul %324, %193, %cst_118 {dimension_numbers = #tpu.dot_dimension_numbers<[1], [0], [0], [1], [0, 0, 1, 1], [], []>} : vector<2x128xf32>, vector<128x128xf32>, vector<2x128xf32> -> vector<2x128xf32>
    %331 = arith.addf %329, %330 : vector<2x128xf32>
    %332 = math.tanh %331 : vector<2x128xf32>
    %333 = arith.negf %331 : vector<2x128xf32>
    %334 = math.exp %333 : vector<2x128xf32>
    %cst_119 = arith.constant 1.000000e+00 : f32
    %335 = vector.broadcast %cst_119 : f32 to vector<2x128xf32>
    %336 = arith.addf %335, %334 : vector<2x128xf32>
    %337 = arith.divf %335, %336 : vector<2x128xf32>
    %338 = arith.select %5, %332, %337 : vector<2x128xi1>, vector<2x128xf32>
    %c64_i32_120 = arith.constant 64 : i32
    %339 = tpu.dynamic_rotate %338 by %c64_i32_120 dim 1 : vector<2x128xf32>, i32 -> vector<2x128xf32>
    %340 = arith.mulf %338, %339 : vector<2x128xf32>
    %c32_i32_121 = arith.constant 32 : i32
    %341 = tpu.dynamic_rotate %340 by %c32_i32_121 dim 1 : vector<2x128xf32>, i32 -> vector<2x128xf32>
    %342 = arith.mulf %338, %322 : vector<2x128xf32>
    %343 = arith.addf %342, %341 : vector<2x128xf32>
    %344 = math.tanh %343 : vector<2x128xf32>
    %345 = arith.mulf %339, %344 : vector<2x128xf32>
    %c6_122 = arith.constant 6 : index
    %c0_123 = arith.constant 0 : index
    %c0_124 = arith.constant 0 : index
    %346 = vector.load %arg14[%c6_122, %c0_123, %c0_124] : memref<8x2x128xf32, #tpu.memory_space<vmem>>, vector<1x2x128xf32>
    %347 = vector.shape_cast %346 : vector<1x2x128xf32> to vector<2x128xf32>
    %348 = vector.shape_cast %345 : vector<2x128xf32> to vector<1x2x128xf32>
    tpu.vector_store %arg14[%c6_122, %c0_123, %c0_124], %348 {strides = array<i32>} : memref<8x2x128xf32, #tpu.memory_space<vmem>>, vector<1x2x128xf32>,
    %349 = vector.extract_strided_slice %199 {offsets = [7, 0, 0], sizes = [1, 2, 128], strides = [1, 1, 1]} : vector<8x2x128xf32> to vector<1x2x128xf32>
    %350 = vector.shape_cast %349 : vector<1x2x128xf32> to vector<2x128xf32>
    %cst_125 = arith.constant dense<0.000000e+00> : vector<2x128xf32>
    %351 = tpu.matmul %345, %193, %cst_125 {dimension_numbers = #tpu.dot_dimension_numbers<[1], [0], [0], [1], [0, 0, 1, 1], [], []>} : vector<2x128xf32>, vector<128x128xf32>, vector<2x128xf32> -> vector<2x128xf32>
    %352 = arith.addf %350, %351 : vector<2x128xf32>
    %353 = math.tanh %352 : vector<2x128xf32>
    %354 = arith.negf %352 : vector<2x128xf32>
    %355 = math.exp %354 : vector<2x128xf32>
    %cst_126 = arith.constant 1.000000e+00 : f32
    %356 = vector.broadcast %cst_126 : f32 to vector<2x128xf32>
    %357 = arith.addf %356, %355 : vector<2x128xf32>
    %358 = arith.divf %356, %357 : vector<2x128xf32>
    %359 = arith.select %5, %353, %358 : vector<2x128xi1>, vector<2x128xf32>
    %c64_i32_127 = arith.constant 64 : i32
    %360 = tpu.dynamic_rotate %359 by %c64_i32_127 dim 1 : vector<2x128xf32>, i32 -> vector<2x128xf32>
    %361 = arith.mulf %359, %360 : vector<2x128xf32>
    %c32_i32_128 = arith.constant 32 : i32
    %362 = tpu.dynamic_rotate %361 by %c32_i32_128 dim 1 : vector<2x128xf32>, i32 -> vector<2x128xf32>
    %363 = arith.mulf %359, %343 : vector<2x128xf32>
    %364 = arith.addf %363, %362 : vector<2x128xf32>
    %365 = math.tanh %364 : vector<2x128xf32>
    %366 = arith.mulf %360, %365 : vector<2x128xf32>
    %c7_129 = arith.constant 7 : index
    %c0_130 = arith.constant 0 : index
    %c0_131 = arith.constant 0 : index
    %367 = vector.load %arg14[%c7_129, %c0_130, %c0_131] : memref<8x2x128xf32, #tpu.memory_space<vmem>>, vector<1x2x128xf32>
    %368 = vector.shape_cast %367 : vector<1x2x128xf32> to vector<2x128xf32>
    %369 = vector.shape_cast %366 : vector<2x128xf32> to vector<1x2x128xf32>
    tpu.vector_store %arg14[%c7_129, %c0_130, %c0_131], %369 {strides = array<i32>} : memref<8x2x128xf32, #tpu.memory_space<vmem>>, vector<1x2x128xf32>,
    %370 = vector.extract_strided_slice %366 {offsets = [0, 32], sizes = [2, 32], strides = [1, 1]} : vector<2x128xf32> to vector<2x32xf32>
    %c1_132 = arith.constant 1 : index
    %c0_133 = arith.constant 0 : index
    %c0_134 = arith.constant 0 : index
    %371 = vector.load %arg11[%c1_132, %c0_133, %c0_134] : memref<3x2x32xf32, #tpu.memory_space<vmem>>, vector<1x2x32xf32>
    %372 = vector.shape_cast %371 : vector<1x2x32xf32> to vector<2x32xf32>
    %373 = vector.shape_cast %370 : vector<2x32xf32> to vector<1x2x32xf32>
    tpu.vector_store %arg11[%c1_132, %c0_133, %c0_134], %373 {strides = array<i32>} : memref<3x2x32xf32, #tpu.memory_space<vmem>>, vector<1x2x32xf32>,
    %374 = vector.extract_strided_slice %364 {offsets = [0, 32], sizes = [2, 32], strides = [1, 1]} : vector<2x128xf32> to vector<2x32xf32>
    %c1_135 = arith.constant 1 : index
    %c0_136 = arith.constant 0 : index
    %c0_137 = arith.constant 0 : index
    %375 = vector.load %arg12[%c1_135, %c0_136, %c0_137] : memref<3x2x32xf32, #tpu.memory_space<vmem>>, vector<1x2x32xf32>
    %376 = vector.shape_cast %375 : vector<1x2x32xf32> to vector<2x32xf32>
    %377 = vector.shape_cast %374 : vector<2x32xf32> to vector<1x2x32xf32>
    tpu.vector_store %arg12[%c1_135, %c0_136, %c0_137], %377 {strides = array<i32>} : memref<3x2x32xf32, #tpu.memory_space<vmem>>, vector<1x2x32xf32>,
    %c0_138 = arith.constant 0 : index
    %c0_139 = arith.constant 0 : index
    %378 = vector.load %arg7[%c0_138, %c0_139] : memref<128x128xf32, #tpu.memory_space<vmem>>, vector<128x128xf32>
    %c0_140 = arith.constant 0 : index
    %c0_141 = arith.constant 0 : index
    %379 = vector.load %arg8[%c0_140, %c0_141] : memref<128x128xf32, #tpu.memory_space<vmem>>, vector<128x128xf32>
    %c0_142 = arith.constant 0 : index
    %c0_143 = arith.constant 0 : index
    %380 = vector.load %arg9[%c0_142, %c0_143] : memref<1x128xf32, #tpu.memory_space<vmem>>, vector<1x128xf32>
    %c0_144 = arith.constant 0 : index
    %c0_145 = arith.constant 0 : index
    %c0_146 = arith.constant 0 : index
    %381 = vector.load %arg14[%c0_144, %c0_145, %c0_146] : memref<8x2x128xf32, #tpu.memory_space<vmem>>, vector<8x2x128xf32>
    %cst_147 = arith.constant dense<0.000000e+00> : vector<8x2x128xf32>
    %382 = tpu.matmul %381, %378, %cst_147 {dimension_numbers = #tpu.dot_dimension_numbers<[2], [0], [0, 1], [1], [0, 0, 0, 1, 1, 1], [], []>} : vector<8x2x128xf32>, vector<128x128xf32>, vector<8x2x128xf32> -> vector<8x2x128xf32>
    %383 = vector.shape_cast %380 : vector<1x128xf32> to vector<1x1x128xf32>
    %384 = vector.broadcast %383 : vector<1x1x128xf32> to vector<8x2x128xf32>
    %385 = arith.addf %382, %384 : vector<8x2x128xf32>
    %cst_148 = arith.constant 0.000000e+00 : f32
    %386 = vector.broadcast %cst_148 : f32 to vector<2x128xf32>
    %cst_149 = arith.constant 0.000000e+00 : f32
    %387 = vector.broadcast %cst_149 : f32 to vector<2x128xf32>
    %388 = vector.extract_strided_slice %385 {offsets = [0, 0, 0], sizes = [1, 2, 128], strides = [1, 1, 1]} : vector<8x2x128xf32> to vector<1x2x128xf32>
    %389 = vector.shape_cast %388 : vector<1x2x128xf32> to vector<2x128xf32>
    %cst_150 = arith.constant dense<0.000000e+00> : vector<2x128xf32>
    %390 = tpu.matmul %386, %379, %cst_150 {dimension_numbers = #tpu.dot_dimension_numbers<[1], [0], [0], [1], [0, 0, 1, 1], [], []>} : vector<2x128xf32>, vector<128x128xf32>, vector<2x128xf32> -> vector<2x128xf32>
    %391 = arith.addf %389, %390 : vector<2x128xf32>
    %392 = math.tanh %391 : vector<2x128xf32>
    %393 = arith.negf %391 : vector<2x128xf32>
    %394 = math.exp %393 : vector<2x128xf32>
    %cst_151 = arith.constant 1.000000e+00 : f32
    %395 = vector.broadcast %cst_151 : f32 to vector<2x128xf32>
    %396 = arith.addf %395, %394 : vector<2x128xf32>
    %397 = arith.divf %395, %396 : vector<2x128xf32>
    %398 = arith.select %5, %392, %397 : vector<2x128xi1>, vector<2x128xf32>
    %c64_i32_152 = arith.constant 64 : i32
    %399 = tpu.dynamic_rotate %398 by %c64_i32_152 dim 1 : vector<2x128xf32>, i32 -> vector<2x128xf32>
    %400 = arith.mulf %398, %399 : vector<2x128xf32>
    %c32_i32_153 = arith.constant 32 : i32
    %401 = tpu.dynamic_rotate %400 by %c32_i32_153 dim 1 : vector<2x128xf32>, i32 -> vector<2x128xf32>
    %402 = arith.mulf %398, %387 : vector<2x128xf32>
    %403 = arith.addf %402, %401 : vector<2x128xf32>
    %404 = math.tanh %403 : vector<2x128xf32>
    %405 = arith.mulf %399, %404 : vector<2x128xf32>
    %c0_154 = arith.constant 0 : index
    %c0_155 = arith.constant 0 : index
    %c0_156 = arith.constant 0 : index
    %406 = vector.load %arg13[%c0_154, %c0_155, %c0_156] : memref<8x2x128xf32, #tpu.memory_space<vmem>>, vector<1x2x128xf32>
    %407 = vector.shape_cast %406 : vector<1x2x128xf32> to vector<2x128xf32>
    %408 = vector.shape_cast %405 : vector<2x128xf32> to vector<1x2x128xf32>
    tpu.vector_store %arg13[%c0_154, %c0_155, %c0_156], %408 {strides = array<i32>} : memref<8x2x128xf32, #tpu.memory_space<vmem>>, vector<1x2x128xf32>,
    %409 = vector.extract_strided_slice %385 {offsets = [1, 0, 0], sizes = [1, 2, 128], strides = [1, 1, 1]} : vector<8x2x128xf32> to vector<1x2x128xf32>
    %410 = vector.shape_cast %409 : vector<1x2x128xf32> to vector<2x128xf32>
    %cst_157 = arith.constant dense<0.000000e+00> : vector<2x128xf32>
    %411 = tpu.matmul %405, %379, %cst_157 {dimension_numbers = #tpu.dot_dimension_numbers<[1], [0], [0], [1], [0, 0, 1, 1], [], []>} : vector<2x128xf32>, vector<128x128xf32>, vector<2x128xf32> -> vector<2x128xf32>
    %412 = arith.addf %410, %411 : vector<2x128xf32>
    %413 = math.tanh %412 : vector<2x128xf32>
    %414 = arith.negf %412 : vector<2x128xf32>
    %415 = math.exp %414 : vector<2x128xf32>
    %cst_158 = arith.constant 1.000000e+00 : f32
    %416 = vector.broadcast %cst_158 : f32 to vector<2x128xf32>
    %417 = arith.addf %416, %415 : vector<2x128xf32>
    %418 = arith.divf %416, %417 : vector<2x128xf32>
    %419 = arith.select %5, %413, %418 : vector<2x128xi1>, vector<2x128xf32>
    %c64_i32_159 = arith.constant 64 : i32
    %420 = tpu.dynamic_rotate %419 by %c64_i32_159 dim 1 : vector<2x128xf32>, i32 -> vector<2x128xf32>
    %421 = arith.mulf %419, %420 : vector<2x128xf32>
    %c32_i32_160 = arith.constant 32 : i32
    %422 = tpu.dynamic_rotate %421 by %c32_i32_160 dim 1 : vector<2x128xf32>, i32 -> vector<2x128xf32>
    %423 = arith.mulf %419, %403 : vector<2x128xf32>
    %424 = arith.addf %423, %422 : vector<2x128xf32>
    %425 = math.tanh %424 : vector<2x128xf32>
    %426 = arith.mulf %420, %425 : vector<2x128xf32>
    %c1_161 = arith.constant 1 : index
    %c0_162 = arith.constant 0 : index
    %c0_163 = arith.constant 0 : index
    %427 = vector.load %arg13[%c1_161, %c0_162, %c0_163] : memref<8x2x128xf32, #tpu.memory_space<vmem>>, vector<1x2x128xf32>
    %428 = vector.shape_cast %427 : vector<1x2x128xf32> to vector<2x128xf32>
    %429 = vector.shape_cast %426 : vector<2x128xf32> to vector<1x2x128xf32>
    tpu.vector_store %arg13[%c1_161, %c0_162, %c0_163], %429 {strides = array<i32>} : memref<8x2x128xf32, #tpu.memory_space<vmem>>, vector<1x2x128xf32>,
    %430 = vector.extract_strided_slice %385 {offsets = [2, 0, 0], sizes = [1, 2, 128], strides = [1, 1, 1]} : vector<8x2x128xf32> to vector<1x2x128xf32>
    %431 = vector.shape_cast %430 : vector<1x2x128xf32> to vector<2x128xf32>
    %cst_164 = arith.constant dense<0.000000e+00> : vector<2x128xf32>
    %432 = tpu.matmul %426, %379, %cst_164 {dimension_numbers = #tpu.dot_dimension_numbers<[1], [0], [0], [1], [0, 0, 1, 1], [], []>} : vector<2x128xf32>, vector<128x128xf32>, vector<2x128xf32> -> vector<2x128xf32>
    %433 = arith.addf %431, %432 : vector<2x128xf32>
    %434 = math.tanh %433 : vector<2x128xf32>
    %435 = arith.negf %433 : vector<2x128xf32>
    %436 = math.exp %435 : vector<2x128xf32>
    %cst_165 = arith.constant 1.000000e+00 : f32
    %437 = vector.broadcast %cst_165 : f32 to vector<2x128xf32>
    %438 = arith.addf %437, %436 : vector<2x128xf32>
    %439 = arith.divf %437, %438 : vector<2x128xf32>
    %440 = arith.select %5, %434, %439 : vector<2x128xi1>, vector<2x128xf32>
    %c64_i32_166 = arith.constant 64 : i32
    %441 = tpu.dynamic_rotate %440 by %c64_i32_166 dim 1 : vector<2x128xf32>, i32 -> vector<2x128xf32>
    %442 = arith.mulf %440, %441 : vector<2x128xf32>
    %c32_i32_167 = arith.constant 32 : i32
    %443 = tpu.dynamic_rotate %442 by %c32_i32_167 dim 1 : vector<2x128xf32>, i32 -> vector<2x128xf32>
    %444 = arith.mulf %440, %424 : vector<2x128xf32>
    %445 = arith.addf %444, %443 : vector<2x128xf32>
    %446 = math.tanh %445 : vector<2x128xf32>
    %447 = arith.mulf %441, %446 : vector<2x128xf32>
    %c2_168 = arith.constant 2 : index
    %c0_169 = arith.constant 0 : index
    %c0_170 = arith.constant 0 : index
    %448 = vector.load %arg13[%c2_168, %c0_169, %c0_170] : memref<8x2x128xf32, #tpu.memory_space<vmem>>, vector<1x2x128xf32>
    %449 = vector.shape_cast %448 : vector<1x2x128xf32> to vector<2x128xf32>
    %450 = vector.shape_cast %447 : vector<2x128xf32> to vector<1x2x128xf32>
    tpu.vector_store %arg13[%c2_168, %c0_169, %c0_170], %450 {strides = array<i32>} : memref<8x2x128xf32, #tpu.memory_space<vmem>>, vector<1x2x128xf32>,
    %451 = vector.extract_strided_slice %385 {offsets = [3, 0, 0], sizes = [1, 2, 128], strides = [1, 1, 1]} : vector<8x2x128xf32> to vector<1x2x128xf32>
    %452 = vector.shape_cast %451 : vector<1x2x128xf32> to vector<2x128xf32>
    %cst_171 = arith.constant dense<0.000000e+00> : vector<2x128xf32>
    %453 = tpu.matmul %447, %379, %cst_171 {dimension_numbers = #tpu.dot_dimension_numbers<[1], [0], [0], [1], [0, 0, 1, 1], [], []>} : vector<2x128xf32>, vector<128x128xf32>, vector<2x128xf32> -> vector<2x128xf32>
    %454 = arith.addf %452, %453 : vector<2x128xf32>
    %455 = math.tanh %454 : vector<2x128xf32>
    %456 = arith.negf %454 : vector<2x128xf32>
    %457 = math.exp %456 : vector<2x128xf32>
    %cst_172 = arith.constant 1.000000e+00 : f32
    %458 = vector.broadcast %cst_172 : f32 to vector<2x128xf32>
    %459 = arith.addf %458, %457 : vector<2x128xf32>
    %460 = arith.divf %458, %459 : vector<2x128xf32>
    %461 = arith.select %5, %455, %460 : vector<2x128xi1>, vector<2x128xf32>
    %c64_i32_173 = arith.constant 64 : i32
    %462 = tpu.dynamic_rotate %461 by %c64_i32_173 dim 1 : vector<2x128xf32>, i32 -> vector<2x128xf32>
    %463 = arith.mulf %461, %462 : vector<2x128xf32>
    %c32_i32_174 = arith.constant 32 : i32
    %464 = tpu.dynamic_rotate %463 by %c32_i32_174 dim 1 : vector<2x128xf32>, i32 -> vector<2x128xf32>
    %465 = arith.mulf %461, %445 : vector<2x128xf32>
    %466 = arith.addf %465, %464 : vector<2x128xf32>
    %467 = math.tanh %466 : vector<2x128xf32>
    %468 = arith.mulf %462, %467 : vector<2x128xf32>
    %c3_175 = arith.constant 3 : index
    %c0_176 = arith.constant 0 : index
    %c0_177 = arith.constant 0 : index
    %469 = vector.load %arg13[%c3_175, %c0_176, %c0_177] : memref<8x2x128xf32, #tpu.memory_space<vmem>>, vector<1x2x128xf32>
    %470 = vector.shape_cast %469 : vector<1x2x128xf32> to vector<2x128xf32>
    %471 = vector.shape_cast %468 : vector<2x128xf32> to vector<1x2x128xf32>
    tpu.vector_store %arg13[%c3_175, %c0_176, %c0_177], %471 {strides = array<i32>} : memref<8x2x128xf32, #tpu.memory_space<vmem>>, vector<1x2x128xf32>,
    %472 = vector.extract_strided_slice %385 {offsets = [4, 0, 0], sizes = [1, 2, 128], strides = [1, 1, 1]} : vector<8x2x128xf32> to vector<1x2x128xf32>
    %473 = vector.shape_cast %472 : vector<1x2x128xf32> to vector<2x128xf32>
    %cst_178 = arith.constant dense<0.000000e+00> : vector<2x128xf32>
    %474 = tpu.matmul %468, %379, %cst_178 {dimension_numbers = #tpu.dot_dimension_numbers<[1], [0], [0], [1], [0, 0, 1, 1], [], []>} : vector<2x128xf32>, vector<128x128xf32>, vector<2x128xf32> -> vector<2x128xf32>
    %475 = arith.addf %473, %474 : vector<2x128xf32>
    %476 = math.tanh %475 : vector<2x128xf32>
    %477 = arith.negf %475 : vector<2x128xf32>
    %478 = math.exp %477 : vector<2x128xf32>
    %cst_179 = arith.constant 1.000000e+00 : f32
    %479 = vector.broadcast %cst_179 : f32 to vector<2x128xf32>
    %480 = arith.addf %479, %478 : vector<2x128xf32>
    %481 = arith.divf %479, %480 : vector<2x128xf32>
    %482 = arith.select %5, %476, %481 : vector<2x128xi1>, vector<2x128xf32>
    %c64_i32_180 = arith.constant 64 : i32
    %483 = tpu.dynamic_rotate %482 by %c64_i32_180 dim 1 : vector<2x128xf32>, i32 -> vector<2x128xf32>
    %484 = arith.mulf %482, %483 : vector<2x128xf32>
    %c32_i32_181 = arith.constant 32 : i32
    %485 = tpu.dynamic_rotate %484 by %c32_i32_181 dim 1 : vector<2x128xf32>, i32 -> vector<2x128xf32>
    %486 = arith.mulf %482, %466 : vector<2x128xf32>
    %487 = arith.addf %486, %485 : vector<2x128xf32>
    %488 = math.tanh %487 : vector<2x128xf32>
    %489 = arith.mulf %483, %488 : vector<2x128xf32>
    %c4_182 = arith.constant 4 : index
    %c0_183 = arith.constant 0 : index
    %c0_184 = arith.constant 0 : index
    %490 = vector.load %arg13[%c4_182, %c0_183, %c0_184] : memref<8x2x128xf32, #tpu.memory_space<vmem>>, vector<1x2x128xf32>
    %491 = vector.shape_cast %490 : vector<1x2x128xf32> to vector<2x128xf32>
    %492 = vector.shape_cast %489 : vector<2x128xf32> to vector<1x2x128xf32>
    tpu.vector_store %arg13[%c4_182, %c0_183, %c0_184], %492 {strides = array<i32>} : memref<8x2x128xf32, #tpu.memory_space<vmem>>, vector<1x2x128xf32>,
    %493 = vector.extract_strided_slice %385 {offsets = [5, 0, 0], sizes = [1, 2, 128], strides = [1, 1, 1]} : vector<8x2x128xf32> to vector<1x2x128xf32>
    %494 = vector.shape_cast %493 : vector<1x2x128xf32> to vector<2x128xf32>
    %cst_185 = arith.constant dense<0.000000e+00> : vector<2x128xf32>
    %495 = tpu.matmul %489, %379, %cst_185 {dimension_numbers = #tpu.dot_dimension_numbers<[1], [0], [0], [1], [0, 0, 1, 1], [], []>} : vector<2x128xf32>, vector<128x128xf32>, vector<2x128xf32> -> vector<2x128xf32>
    %496 = arith.addf %494, %495 : vector<2x128xf32>
    %497 = math.tanh %496 : vector<2x128xf32>
    %498 = arith.negf %496 : vector<2x128xf32>
    %499 = math.exp %498 : vector<2x128xf32>
    %cst_186 = arith.constant 1.000000e+00 : f32
    %500 = vector.broadcast %cst_186 : f32 to vector<2x128xf32>
    %501 = arith.addf %500, %499 : vector<2x128xf32>
    %502 = arith.divf %500, %501 : vector<2x128xf32>
    %503 = arith.select %5, %497, %502 : vector<2x128xi1>, vector<2x128xf32>
    %c64_i32_187 = arith.constant 64 : i32
    %504 = tpu.dynamic_rotate %503 by %c64_i32_187 dim 1 : vector<2x128xf32>, i32 -> vector<2x128xf32>
    %505 = arith.mulf %503, %504 : vector<2x128xf32>
    %c32_i32_188 = arith.constant 32 : i32
    %506 = tpu.dynamic_rotate %505 by %c32_i32_188 dim 1 : vector<2x128xf32>, i32 -> vector<2x128xf32>
    %507 = arith.mulf %503, %487 : vector<2x128xf32>
    %508 = arith.addf %507, %506 : vector<2x128xf32>
    %509 = math.tanh %508 : vector<2x128xf32>
    %510 = arith.mulf %504, %509 : vector<2x128xf32>
    %c5_189 = arith.constant 5 : index
    %c0_190 = arith.constant 0 : index
    %c0_191 = arith.constant 0 : index
    %511 = vector.load %arg13[%c5_189, %c0_190, %c0_191] : memref<8x2x128xf32, #tpu.memory_space<vmem>>, vector<1x2x128xf32>
    %512 = vector.shape_cast %511 : vector<1x2x128xf32> to vector<2x128xf32>
    %513 = vector.shape_cast %510 : vector<2x128xf32> to vector<1x2x128xf32>
    tpu.vector_store %arg13[%c5_189, %c0_190, %c0_191], %513 {strides = array<i32>} : memref<8x2x128xf32, #tpu.memory_space<vmem>>, vector<1x2x128xf32>,
    %514 = vector.extract_strided_slice %385 {offsets = [6, 0, 0], sizes = [1, 2, 128], strides = [1, 1, 1]} : vector<8x2x128xf32> to vector<1x2x128xf32>
    %515 = vector.shape_cast %514 : vector<1x2x128xf32> to vector<2x128xf32>
    %cst_192 = arith.constant dense<0.000000e+00> : vector<2x128xf32>
    %516 = tpu.matmul %510, %379, %cst_192 {dimension_numbers = #tpu.dot_dimension_numbers<[1], [0], [0], [1], [0, 0, 1, 1], [], []>} : vector<2x128xf32>, vector<128x128xf32>, vector<2x128xf32> -> vector<2x128xf32>
    %517 = arith.addf %515, %516 : vector<2x128xf32>
    %518 = math.tanh %517 : vector<2x128xf32>
    %519 = arith.negf %517 : vector<2x128xf32>
    %520 = math.exp %519 : vector<2x128xf32>
    %cst_193 = arith.constant 1.000000e+00 : f32
    %521 = vector.broadcast %cst_193 : f32 to vector<2x128xf32>
    %522 = arith.addf %521, %520 : vector<2x128xf32>
    %523 = arith.divf %521, %522 : vector<2x128xf32>
    %524 = arith.select %5, %518, %523 : vector<2x128xi1>, vector<2x128xf32>
    %c64_i32_194 = arith.constant 64 : i32
    %525 = tpu.dynamic_rotate %524 by %c64_i32_194 dim 1 : vector<2x128xf32>, i32 -> vector<2x128xf32>
    %526 = arith.mulf %524, %525 : vector<2x128xf32>
    %c32_i32_195 = arith.constant 32 : i32
    %527 = tpu.dynamic_rotate %526 by %c32_i32_195 dim 1 : vector<2x128xf32>, i32 -> vector<2x128xf32>
    %528 = arith.mulf %524, %508 : vector<2x128xf32>
    %529 = arith.addf %528, %527 : vector<2x128xf32>
    %530 = math.tanh %529 : vector<2x128xf32>
    %531 = arith.mulf %525, %530 : vector<2x128xf32>
    %c6_196 = arith.constant 6 : index
    %c0_197 = arith.constant 0 : index
    %c0_198 = arith.constant 0 : index
    %532 = vector.load %arg13[%c6_196, %c0_197, %c0_198] : memref<8x2x128xf32, #tpu.memory_space<vmem>>, vector<1x2x128xf32>
    %533 = vector.shape_cast %532 : vector<1x2x128xf32> to vector<2x128xf32>
    %534 = vector.shape_cast %531 : vector<2x128xf32> to vector<1x2x128xf32>
    tpu.vector_store %arg13[%c6_196, %c0_197, %c0_198], %534 {strides = array<i32>} : memref<8x2x128xf32, #tpu.memory_space<vmem>>, vector<1x2x128xf32>,
    %535 = vector.extract_strided_slice %385 {offsets = [7, 0, 0], sizes = [1, 2, 128], strides = [1, 1, 1]} : vector<8x2x128xf32> to vector<1x2x128xf32>
    %536 = vector.shape_cast %535 : vector<1x2x128xf32> to vector<2x128xf32>
    %cst_199 = arith.constant dense<0.000000e+00> : vector<2x128xf32>
    %537 = tpu.matmul %531, %379, %cst_199 {dimension_numbers = #tpu.dot_dimension_numbers<[1], [0], [0], [1], [0, 0, 1, 1], [], []>} : vector<2x128xf32>, vector<128x128xf32>, vector<2x128xf32> -> vector<2x128xf32>
    %538 = arith.addf %536, %537 : vector<2x128xf32>
    %539 = math.tanh %538 : vector<2x128xf32>
    %540 = arith.negf %538 : vector<2x128xf32>
    %541 = math.exp %540 : vector<2x128xf32>
    %cst_200 = arith.constant 1.000000e+00 : f32
    %542 = vector.broadcast %cst_200 : f32 to vector<2x128xf32>
    %543 = arith.addf %542, %541 : vector<2x128xf32>
    %544 = arith.divf %542, %543 : vector<2x128xf32>
    %545 = arith.select %5, %539, %544 : vector<2x128xi1>, vector<2x128xf32>
    %c64_i32_201 = arith.constant 64 : i32
    %546 = tpu.dynamic_rotate %545 by %c64_i32_201 dim 1 : vector<2x128xf32>, i32 -> vector<2x128xf32>
    %547 = arith.mulf %545, %546 : vector<2x128xf32>
    %c32_i32_202 = arith.constant 32 : i32
    %548 = tpu.dynamic_rotate %547 by %c32_i32_202 dim 1 : vector<2x128xf32>, i32 -> vector<2x128xf32>
    %549 = arith.mulf %545, %529 : vector<2x128xf32>
    %550 = arith.addf %549, %548 : vector<2x128xf32>
    %551 = math.tanh %550 : vector<2x128xf32>
    %552 = arith.mulf %546, %551 : vector<2x128xf32>
    %c7_203 = arith.constant 7 : index
    %c0_204 = arith.constant 0 : index
    %c0_205 = arith.constant 0 : index
    %553 = vector.load %arg13[%c7_203, %c0_204, %c0_205] : memref<8x2x128xf32, #tpu.memory_space<vmem>>, vector<1x2x128xf32>
    %554 = vector.shape_cast %553 : vector<1x2x128xf32> to vector<2x128xf32>
    %555 = vector.shape_cast %552 : vector<2x128xf32> to vector<1x2x128xf32>
    tpu.vector_store %arg13[%c7_203, %c0_204, %c0_205], %555 {strides = array<i32>} : memref<8x2x128xf32, #tpu.memory_space<vmem>>, vector<1x2x128xf32>,
    %556 = vector.extract_strided_slice %552 {offsets = [0, 32], sizes = [2, 32], strides = [1, 1]} : vector<2x128xf32> to vector<2x32xf32>
    %c2_206 = arith.constant 2 : index
    %c0_207 = arith.constant 0 : index
    %c0_208 = arith.constant 0 : index
    %557 = vector.load %arg11[%c2_206, %c0_207, %c0_208] : memref<3x2x32xf32, #tpu.memory_space<vmem>>, vector<1x2x32xf32>
    %558 = vector.shape_cast %557 : vector<1x2x32xf32> to vector<2x32xf32>
    %559 = vector.shape_cast %556 : vector<2x32xf32> to vector<1x2x32xf32>
    tpu.vector_store %arg11[%c2_206, %c0_207, %c0_208], %559 {strides = array<i32>} : memref<3x2x32xf32, #tpu.memory_space<vmem>>, vector<1x2x32xf32>,
    %560 = vector.extract_strided_slice %550 {offsets = [0, 32], sizes = [2, 32], strides = [1, 1]} : vector<2x128xf32> to vector<2x32xf32>
    %c2_209 = arith.constant 2 : index
    %c0_210 = arith.constant 0 : index
    %c0_211 = arith.constant 0 : index
    %561 = vector.load %arg12[%c2_209, %c0_210, %c0_211] : memref<3x2x32xf32, #tpu.memory_space<vmem>>, vector<1x2x32xf32>
    %562 = vector.shape_cast %561 : vector<1x2x32xf32> to vector<2x32xf32>
    %563 = vector.shape_cast %560 : vector<2x32xf32> to vector<1x2x32xf32>
    tpu.vector_store %arg12[%c2_209, %c0_210, %c0_211], %563 {strides = array<i32>} : memref<3x2x32xf32, #tpu.memory_space<vmem>>, vector<1x2x32xf32>,
    %c0_212 = arith.constant 0 : index
    %c0_213 = arith.constant 0 : index
    %c0_214 = arith.constant 0 : index
    %564 = vector.load %arg13[%c0_212, %c0_213, %c0_214] : memref<8x2x128xf32, #tpu.memory_space<vmem>>, vector<8x2x128xf32>
    %565 = vector.extract_strided_slice %564 {offsets = [0, 0, 32], sizes = [8, 2, 32], strides = [1, 1, 1]} : vector<8x2x128xf32> to vector<8x2x32xf32>
    %c0_215 = arith.constant 0 : index
    %c0_216 = arith.constant 0 : index
    %c0_217 = arith.constant 0 : index
    %566 = vector.load %arg10[%c0_215, %c0_216, %c0_217] : memref<8x2x32xf32, #tpu.memory_space<vmem>>, vector<8x2x32xf32>
    tpu.vector_store %arg10[%c0_215, %c0_216, %c0_217], %565 {strides = array<i32>} : memref<8x2x32xf32, #tpu.memory_space<vmem>>, vector<8x2x32xf32>,
    return
  }
}

</mosaic_0001>

<bundles_post_ra>
// kernel: tpu_custom_call.1
= control target key start
LH: loop header
LB: loop body
LE: loop exit
PB: predicated region body
PF: predicated region fallthrough
CT: control target
= control target key end

     0   :  { %18 = vsyncpa [#allocation5], 0  ;;  %s6130_s0 = inlined_call_operand.vmem [shape: f32[8,2,4], index: 0, kind: input, shape index: {}]   ;;  %s6131_s1 = inlined_call_operand.vmem [shape: f32[4,128], index: 1, kind: input, shape index: {}]   ;;  %s6132_s2 = inlined_call_operand.hbm [shape: f32[128,128], index: 2, kind: input, shape index: {}]   ;;  %s6133_s3 = inlined_call_operand.vmem [shape: f32[1,128], index: 3, kind: input, shape index: {}]   ;;  %s6134_s4 = inlined_call_operand.hbm [shape: f32[128,128], index: 4, kind: input, shape index: {}]   ;;  %s6135_s5 = inlined_call_operand.hbm [shape: f32[128,128], index: 5, kind: input, shape index: {}]   ;;  %s6136_s6 = inlined_call_operand.vmem [shape: f32[1,128], index: 6, kind: input, shape index: {}]   ;;  %s6137_s7 = inlined_call_operand.hbm [shape: f32[128,128], index: 7, kind: input, shape index: {}]   ;;  %s6138_s8 = inlined_call_operand.hbm [shape: f32[128,128], index: 8, kind: input, shape index: {}]   ;;  %s6139_s9 = inlined_call_operand.vmem [shape: f32[1,128], index: 9, kind: input, shape index: {}]   ;;  %s6140_s10 = inlined_call_operand.hbm [shape: f32[8,2,32], index: 10, kind: output, shape index: {0}]   ;;  %s6141_s11 = inlined_call_operand.hbm [shape: f32[3,2,32], index: 11, kind: output, shape index: {1}]   ;;  %s6142_s12 = inlined_call_operand.hbm [shape: f32[3,2,32], index: 12, kind: output, shape index: {2}]  }
   0x1   :  { %19 = vsyncpa [#allocation8], 0 }
   0x2   :  { %20 = vsyncpa [#allocation11], 0 }
   0x3   :  { %21 = vsyncpa [#allocation6], 0 }
   0x4   :  { %22 = vsyncpa [#allocation15], 0  ;;  %s4816_s21 = smov [#allocation7]   ;;  %s4817_s23 = smov [#allocation10]  }
   0x5   :  { %s46_s22 = sshll.u32 %s4816_s21, 4  ;;  %s72_s24 = sshll.u32 %s4817_s23, 4  ;;  %s47_s22 = int_to_ptr.vmem [resolvable:$true] %s46_s22  ;;  %s73_s24 = int_to_ptr.vmem [resolvable:$true] %s72_s24 }
   0x6   :  { %s4654_s25 = scalar_lea.vmem %s47_s22, 2048  ;;  %p4659_p1 = scmp.lt.s32.totalorder %s47_s22, %s47_s22 }
   0x7   :  { %p4655_p0 = scmp.ne.s32.totalorder %s47_s22, %s4654_s25  ;;  %p4660_p2 = scmp.lt.s32.totalorder %s4654_s25, %s4654_s25 }
   0x9   :  { %p4661_p3 = por %p4660_p2, %p4659_p1 }
   0xb   :  { %p4662_p4 = pnand %p4661_p3, %p4655_p0 }
   0xd   :  { %4665 = shalt.err (!%p4662_p4)
}
   0xe   :  { %s4818_s26 = smov 128   ;;  %s4819_s27 = smov 8  }
   0xf   :  { %52 = dma.hbm_to_vmem [thread:$0]  %s6134_s4, 2048, %s47_s22, [#allocation8], %s4818_s26, %s4818_s26, %s4819_s27  }
  0x10   :  { %s4674_s30 = scalar_lea.vmem %s73_s24, 2048  ;;  %p4679_p6 = scmp.lt.s32.totalorder %s73_s24, %s73_s24 }
  0x11   :  { %p4675_p5 = scmp.ne.s32.totalorder %s73_s24, %s4674_s30  ;;  %p4680_p7 = scmp.lt.s32.totalorder %s4674_s30, %s4674_s30 }
  0x13   :  { %p4681_p8 = por %p4680_p7, %p4679_p6 }
  0x15   :  { %p4682_p9 = pnand %p4681_p8, %p4675_p5 }
  0x17   :  { %4685 = shalt.err (!%p4682_p9)
}
  0x18   :  { %78 = dma.hbm_to_vmem [thread:$0]  %s6137_s7, 2048, %s73_s24, [#allocation11], %s4818_s26, %s4818_s26, %s4819_s27  }
  0x19   :  { %s4820_s15 = smov [#allocation4]   ;;  %s4821_s17 = smov [#allocation9]  }
  0x1a   :  { %s32_s16 = sshll.u32 %s4820_s15, 4  ;;  %s58_s18 = sshll.u32 %s4821_s17, 4  ;;  %s33_s16 = int_to_ptr.vmem [resolvable:$true] %s32_s16  ;;  %s59_s18 = int_to_ptr.vmem [resolvable:$true] %s58_s18 }
  0x1b   :  { %s4694_s4 = scalar_lea.vmem %s33_s16, 2048  ;;  %p4699_p11 = scmp.lt.s32.totalorder %s33_s16, %s33_s16 }
  0x1c   :  { %p4695_p10 = scmp.ne.s32.totalorder %s33_s16, %s4694_s4  ;;  %p4700_p12 = scmp.lt.s32.totalorder %s4694_s4, %s4694_s4 }
  0x1e   :  { %p4701_p13 = por %p4700_p12, %p4699_p11 }
  0x20   :  { %p4702_p0 = pnand %p4701_p13, %p4695_p10 }
  0x22   :  { %4705 = shalt.err (!%p4702_p0)
}
  0x23   :  { %38 = dma.hbm_to_vmem [thread:$0]  %s6132_s2, 2048, %s33_s16, [#allocation5], %s4818_s26, %s4818_s26, %s4819_s27  }
  0x24   :  { %s4714_s7 = scalar_lea.vmem %s59_s18, 2048  ;;  %p4719_p2 = scmp.lt.s32.totalorder %s59_s18, %s59_s18 }
  0x25   :  { %p4715_p1 = scmp.ne.s32.totalorder %s59_s18, %s4714_s7  ;;  %p4720_p3 = scmp.lt.s32.totalorder %s4714_s7, %s4714_s7 }
  0x27   :  { %p4721_p4 = por %p4720_p3, %p4719_p2 }
  0x29   :  { %p4722_p5 = pnand %p4721_p4, %p4715_p1 }
  0x2b   :  { %4725 = shalt.err (!%p4722_p5)
}
  0x2c   :  { %64 = dma.hbm_to_vmem [thread:$0]  %s6135_s5, 2048, %s59_s18, [#allocation8], %s4818_s26, %s4818_s26, %s4819_s27  }
  0x2d   :  { %s4822_s23 = smov [#allocation12]  }
  0x2e   :  { %s84_s24 = sshll.u32 %s4822_s23, 4  ;;  %s85_s24 = int_to_ptr.vmem [resolvable:$true] %s84_s24 }
  0x2f   :  { %s4734_s25 = scalar_lea.vmem %s85_s24, 2048  ;;  %p4739_p7 = scmp.lt.s32.totalorder %s85_s24, %s85_s24 }
  0x30   :  { %p4735_p6 = scmp.ne.s32.totalorder %s85_s24, %s4734_s25  ;;  %p4740_p8 = scmp.lt.s32.totalorder %s4734_s25, %s4734_s25 }
  0x32   :  { %p4741_p9 = por %p4740_p8, %p4739_p7 }
  0x34   :  { %p4742_p10 = pnand %p4741_p9, %p4735_p6 }
  0x36   :  { %4745 = shalt.err (!%p4742_p10)
}
  0x37   :  { %90 = dma.hbm_to_vmem [thread:$0]  %s6138_s8, 2048, %s85_s24, [#allocation11], %s4818_s26, %s4818_s26, %s4819_s27  }
  0x38   :  { %4806 = dma.done.wait [#allocation5], 2048  }
  0x39   :  { %4807 = vsyncadd [#allocation5], 4294965248 }
  0x3a   :  { %4808 = dma.done.wait [#allocation8], 4096  }
  0x3b   :  { %4809 = vsyncadd [#allocation8], 4294963200 }
  0x3c   :  { %4810 = dma.done.wait [#allocation11], 4096  }
  0x3d   :  { %4811 = vsyncadd [#allocation11], 4294963200  ;;  %v4823_v0 = vmov 0.0   ;;  %v108_v1 = vlaneseq  ;;  %v4824_v2 = vmov 1983009808   ;;  %vm4825_vm0 = vmmov 0  }
  0x3e   :  { %3527 = vmatprep.subr.mxu1 %v4823_v0  ;;  %v155_v3 = vunpack.c.l.s4 %v4824_v2  ;;  %3559 = vmatprep.mubr.msk.f32.mxu1 %vm4825_vm0, %v4823_v0  ;;  %v4932_v6 = vld [vmem:[#allocation4 + $0x78] sm:$0xff]  ;;  %v4934_v7 = vld [vmem:[#allocation4 + $0x70] sm:$0xff]  ;;  %vm201_vm1 = vcmask 1043456   ;;  %v4938_v8 = vld [vmem:[#allocation4 + $0x68] sm:$0xff]  ;;  %vm196_vm2 = vcmask 31744   ;;  %s4827_s23 = smov 32  }
  0x3f   :  { %v158_v5 = vshrl.u32 %v108_v1, 7  ;;  %3528 = vmatpush3.msra.mxu1 %v4932_v6  ;;  %v4941_v9 = vld [vmem:[#allocation4 + $0x60] sm:$0xff]  ;;  %v4959_v15 = vld [vmem:[#allocation4 + $0x58] sm:$0xff]  ;;  %v135_v18 = vld [vmem:[%s6130_s0 + $0x8] sm:$0x3]  ;;  %v109_v57 = vand.u32 127, %v108_v1 }
  0x40   :  { %v156_v4 = vunpack.c.0.s8 %v155_v3  ;;  %3529 = vmatprep.subr.mxu1 %v4823_v0  ;;  %v113_v10 = vld [vmem:[%s6131_s1] sm:$0xf]  ;;  %v133_v14 = vld [vmem:[%s6130_s0 + $0x4] sm:$0x3]  ;;  %v134_v16 = vld [vmem:[%s6130_s0 + $0x6] sm:$0x3] }
  0x41   :  { %3530 = vmatpush3.msra.mxu1 %v4934_v7  ;;  %3522 = vmatprep.subr.msk.mxu0 %vm201_vm1, %v113_v10  ;;  %v131_v12 = vld [vmem:[%s6130_s0] sm:$0x3]  ;;  %v132_v13 = vld [vmem:[%s6130_s0 + $0x2] sm:$0x3]  ;;  %v153_v19 = vcombine.low %v133_v14, %v134_v16  ;;  %v136_v20 = vld [vmem:[%s6130_s0 + $0xa] sm:$0x3] }
  0x42   :  { %v4946_v11 = vsub.s32 %v156_v4, %v158_v5  ;;  %3531 = vmatprep.subr.mxu1 %v4823_v0  ;;  %3523 = vmatpush3.msk.msra.mxu0 %vm201_vm1, %v113_v10  ;;  %v152_v17 = vcombine.low %v131_v12, %v132_v13  ;;  %v137_v21 = vld [vmem:[%s6130_s0 + $0xc] sm:$0x3]  ;;  %v138_v22 = vld [vmem:[%s6130_s0 + $0xe] sm:$0x3]  ;;  %v169_v24 = vcombine.low %v135_v18, %v136_v20  ;;  %v4981_v26 = vld [vmem:[#allocation4 + $0x50] sm:$0xff]  ;;  %vm110_vm3 = vcmp.ge.s32.totalorder %v109_v57, 64 }
  0x43   :  { %3532 = vmatpush3.msra.mxu1 %v4938_v8  ;;  %3562 = vmatprep.subr.mxu0 %v4823_v0  ;;  %v170_v25 = vcombine.low %v137_v21, %v138_v22  ;;  %v4988_v30 = vld [vmem:[#allocation4 + $0x48] sm:$0xff]  ;;  %v4992_v33 = vld [vmem:[#allocation4 + $0x40] sm:$0xff]  ;;  %v4996_v34 = vld [vmem:[#allocation4 + $0x38] sm:$0xff]  ;;  %vm111_vm4 = vcmp.lt.s32.totalorder %v109_v57, 96  ;;  %vm1047_vm6 = vcmask 254976   ;;  %s4829_s28 = smov [#allocation14]  }
  0x44   :  { %3533 = vmatprep.subr.mxu1 %v4823_v0  ;;  %v160_v23 = vrot.slane %v152_v17, %v4946_v11  ;;  %v167_v27 = vrot.slane %v153_v19, %v4946_v11  ;;  %v177_v28 = vrot.slane %v169_v24, %v4946_v11  ;;  %v5002_v35 = vld [vmem:[#allocation4 + $0x30] sm:$0xff]  ;;  %v5008_v36 = vld [vmem:[#allocation4 + $0x28] sm:$0xff]  ;;  %v5014_v37 = vld [vmem:[#allocation4 + $0x20] sm:$0xff]  ;;  %s3012_s5 = sshll.u32 %s4829_s28, 4  ;;  %s4830_s8 = smov [#allocation16]   ;;  %s3013_s5 = int_to_ptr.vmem [resolvable:$true] %s3012_s5 }
  0x45   :  { %3534 = vmatpush3.msra.mxu1 %v4941_v9  ;;  %v184_v29 = vrot.slane %v170_v25, %v4946_v11  ;;  %v5020_v38 = vld [vmem:[#allocation4 + $0x18] sm:$0xff]  ;;  %v5026_v39 = vld [vmem:[#allocation4 + $0x10] sm:$0xff]  ;;  %v5032_v40 = vld [vmem:[#allocation4 + $0x8] sm:$0xff]  ;;  %s3024_s26 = sshll.u32 %s4830_s8, 4  ;;  %s4746_s27 = scalar_lea.vmem %s3013_s5, 96  ;;  %s3025_s26 = int_to_ptr.vmem [resolvable:$true] %s3024_s26 }
  0x46   :  { %3535 = vmatprep.subr.mxu1 %v4823_v0  ;;  %v168_v31 = vcombine.low %v160_v23, %v167_v27  ;;  %v5038_v41 = vld [vmem:[#allocation4] sm:$0xff]  ;;  %vm5113_vm5 = vmand %vm110_vm3, %vm111_vm4  ;;  %p4747_p11 = scmp.ne.s32.totalorder %s3013_s5, %s4746_s27  ;;  %p4751_p12 = scmp.lt.s32.totalorder %s3013_s5, %s3013_s5 }
  0x47   :  { %3536 = vmatpush3.msra.mxu1 %v4959_v15  ;;  %v185_v32 = vcombine.low %v177_v28, %v184_v29  ;;  %v3045_v42 = vld [vmem:[%s6133_s3] ss:$0 sm:$0xff]  ;;  %s4826_s3 = smov 64   ;;  %p4752_p13 = scmp.lt.s32.totalorder %s4746_s27, %s4746_s27 }
  0x48   :  { %3537 = vmatprep.subr.mxu1 %v4823_v0  ;;  %3524 = vmatprep.mubr.msk.f32.mxu0 %vm196_vm2, %v168_v31  ;;  %v186_v43 = vcombine.low %v3045_v42, %v3045_v42 }
  0x49   :  { %3538 = vmatpush3.msra.mxu1 %v4981_v26  ;;  %3525 = vmatmul.mubr.msk.f32.vlgmr.msra.gmra.mxu0 %vm196_vm2, %v185_v32  ;;  %p4753_p0 = por %p4752_p13, %p4751_p12 }
  0x4a   :  { %3539 = vmatprep.subr.mxu1 %v4823_v0  ;;  %3563 = vmatpush3.msra.mxu0 %v4932_v6  ;;  %v193_v44 = vrot.slane %v186_v43, %v4946_v11 }
  0x4b   :  { %3540 = vmatpush3.msra.mxu1 %v4988_v30  ;;  %3564 = vmatprep.subr.mxu0 %v4823_v0  ;;  %p4754_p1 = pnand %p4753_p0, %p4747_p11 }
  0x4c   :  { %3541 = vmatprep.subr.mxu1 %v4823_v0  ;;  %3565 = vmatpush3.msra.mxu0 %v4934_v7  ;;  %v194_v45 = vcombine.low %v193_v44, %v193_v44 }
  0x4d   :  { %3542 = vmatpush3.msra.mxu1 %v4992_v33  ;;  %3566 = vmatprep.subr.mxu0 %v4823_v0 }
  0x4e   :  { %3543 = vmatprep.subr.mxu1 %v4823_v0  ;;  %3567 = vmatpush3.msra.mxu0 %v4938_v8 }
  0x4f   :  { %3544 = vmatpush3.msra.mxu1 %v4996_v34  ;;  %3568 = vmatprep.subr.mxu0 %v4823_v0 }
  0x50   :  { %3545 = vmatprep.subr.mxu1 %v4823_v0  ;;  %3569 = vmatpush3.msra.mxu0 %v4941_v9 }
  0x51   :  { %3546 = vmatpush3.msra.mxu1 %v5002_v35  ;;  %3570 = vmatprep.subr.mxu0 %v4823_v0 }
  0x52   :  { %3547 = vmatprep.subr.mxu1 %v4823_v0  ;;  %3571 = vmatpush3.msra.mxu0 %v4959_v15 }
  0x53   :  { %3548 = vmatpush3.msra.mxu1 %v5008_v36  ;;  %3572 = vmatprep.subr.mxu0 %v4823_v0 }
  0x54   :  { %3549 = vmatprep.subr.mxu1 %v4823_v0  ;;  %3573 = vmatpush3.msra.mxu0 %v4981_v26 }
  0x55   :  { %3550 = vmatpush3.msra.mxu1 %v5014_v37  ;;  %3574 = vmatprep.subr.mxu0 %v4823_v0 }
  0x56   :  { %3551 = vmatprep.subr.mxu1 %v4823_v0  ;;  %3575 = vmatpush3.msra.mxu0 %v4988_v30 }
  0x57   :  { %3552 = vmatpush3.msra.mxu1 %v5020_v38  ;;  %3576 = vmatprep.subr.mxu0 %v4823_v0 }
  0x58   :  { %3553 = vmatprep.subr.mxu1 %v4823_v0  ;;  %3577 = vmatpush3.msra.mxu0 %v4992_v33 }
  0x59   :  { %3554 = vmatpush3.msra.mxu1 %v5026_v39  ;;  %3578 = vmatprep.subr.mxu0 %v4823_v0 }
  0x5a   :  { %3555 = vmatprep.subr.mxu1 %v4823_v0  ;;  %3579 = vmatpush3.msra.mxu0 %v4996_v34 }
  0x5b   :  { %3556 = vmatpush3.msra.mxu1 %v5032_v40  ;;  %3580 = vmatprep.subr.mxu0 %v4823_v0 }
  0x5c   :  { %3557 = vmatprep.subr.mxu1 %v4823_v0  ;;  %3581 = vmatpush3.msra.mxu0 %v5002_v35 }
  0x5d   :  { %3558 = vmatpush3.msra.mxu1 %v5038_v41  ;;  %3582 = vmatprep.subr.mxu0 %v4823_v0 }
  0x5e   :  { %3560 = vmatmul.mubr.f32.vlgmr.msra.gmra.mxu1 %v4823_v0  ;;  %3594 = vmatprep.mubr.msk.f32.mxu0 %vm4825_vm0, %v4823_v0 }
  0x5f   :  { %3583 = vmatpush3.msra.mxu0 %v5008_v36  ;;  %3597 = vmatprep.subr.mxu1 %v4823_v0 }
  0x60   :  { %3584 = vmatprep.subr.mxu0 %v4823_v0  ;;  %3598 = vmatpush3.msra.mxu1 %v4932_v6 }
  0x61   :  { %3585 = vmatpush3.msra.mxu0 %v5014_v37  ;;  %3599 = vmatprep.subr.mxu1 %v4823_v0 }
  0x62   :  { %3586 = vmatprep.subr.mxu0 %v4823_v0  ;;  %3600 = vmatpush3.msra.mxu1 %v4934_v7 }
  0x63   :  { %3587 = vmatpush3.msra.mxu0 %v5020_v38  ;;  %3601 = vmatprep.subr.mxu1 %v4823_v0 }
  0x64   :  { %3588 = vmatprep.subr.mxu0 %v4823_v0  ;;  %3602 = vmatpush3.msra.mxu1 %v4938_v8 }
  0x65   :  { %3589 = vmatpush3.msra.mxu0 %v5026_v39  ;;  %3603 = vmatprep.subr.mxu1 %v4823_v0 }
  0x66   :  { %3590 = vmatprep.subr.mxu0 %v4823_v0  ;;  %3604 = vmatpush3.msra.mxu1 %v4941_v9 }
  0x67   :  { %3591 = vmatpush3.msra.mxu0 %v5032_v40  ;;  %3605 = vmatprep.subr.mxu1 %v4823_v0 }
  0x68   :  { %3592 = vmatprep.subr.mxu0 %v4823_v0  ;;  %3606 = vmatpush3.msra.mxu1 %v4959_v15 }
  0x69   :  { %3593 = vmatpush3.msra.mxu0 %v5038_v41  ;;  %3607 = vmatprep.subr.mxu1 %v4823_v0 }
  0x6a   :  { %3608 = vmatpush3.msra.mxu1 %v4981_v26  ;;  %3629 = vmatprep.mubr.msk.f32.mxu1 %vm4825_vm0, %v4823_v0 }
  0x6b   :  { %3609 = vmatprep.subr.mxu1 %v4823_v0  ;;  %3632 = vmatprep.subr.mxu0 %v4823_v0 }
  0x6c   :  { %3610 = vmatpush3.msra.mxu1 %v4988_v30 }
  0x6d   :  { %3611 = vmatprep.subr.mxu1 %v4823_v0 }
  0x6e   :  { %3612 = vmatpush3.msra.mxu1 %v4992_v33 }
  0x6f   :  { %3613 = vmatprep.subr.mxu1 %v4823_v0 }
  0x70   :  { %3614 = vmatpush3.msra.mxu1 %v4996_v34 }
  0x71   :  { %3615 = vmatprep.subr.mxu1 %v4823_v0 }
  0x72   :  { %3616 = vmatpush3.msra.mxu1 %v5002_v35 }
  0x73   :  { %3617 = vmatprep.subr.mxu1 %v4823_v0 }
  0x74   :  { %3618 = vmatpush3.msra.mxu1 %v5008_v36 }
  0x75   :  { %3619 = vmatprep.subr.mxu1 %v4823_v0 }
  0x76   :  { %3620 = vmatpush3.msra.mxu1 %v5014_v37 }
  0x77   :  { %3621 = vmatprep.subr.mxu1 %v4823_v0 }
  0x78   :  { %3622 = vmatpush3.msra.mxu1 %v5020_v38 }
  0x79   :  { %3623 = vmatprep.subr.mxu1 %v4823_v0 }
  0x7a   :  { %3624 = vmatpush3.msra.mxu1 %v5026_v39 }
  0x7b   :  { %3625 = vmatprep.subr.mxu1 %v4823_v0 }
  0x7c   :  { %3626 = vmatpush3.msra.mxu1 %v5032_v40 }
  0x7d   :  { %3627 = vmatprep.subr.mxu1 %v4823_v0 }
  0x7e   :  { %3628 = vmatpush3.msra.mxu1 %v5038_v41 }
  0x7f   :  { %3667 = vmatprep.subr.mxu1 %v4823_v0 }
 0x109   :  { %v3526_v46 = vpop.f32.mrf.mxu0 }
 0x10a   :  { %v5103_v47 = vadd.f32 %v3526_v46, %v194_v45 }
 0x10b   :  { %v271_v48 = vpop.f32.mrf.mxu0 }
 0x10c   :  { %v5105_v49 = vadd.f32 %v271_v48, %v194_v45 }
 0x10e   :  { %v5109_v50 = vrot.slane %v5105_v49, %v4946_v11  ;;  %v282_v31 = vcombine.high %v5105_v49, %v5105_v49 }
 0x110   :  { %v297_v10 = vcombine.high %v5109_v50, %v5109_v50  ;;  %v296_v32 = vrot.slane %v282_v31, %v4946_v11 }
 0x11e   :  { %v390_v51 = vpop.f32.mrf.mxu1 }
 0x11f   :  { %v394_v52 = vadd.f32 %v390_v51, %v5109_v50 }
 0x120   :  { %v3561_v53 = vpop.f32.mrf.mxu1 }
 0x121   :  { %v3049_v54 = vmul.f32 -1.442695, %v394_v52 }
 0x123   :  { %4454 = vpow2.f32 %v3049_v54 }
 0x124   :  { %4456 = vtanh.f32 %v394_v52 }
 0x130   :  { %v4455_v55 = vpop.eup %4454 }
 0x131   :  { %v399_v56 = vadd.f32 1.0, %v4455_v55  ;;  %v4457_v59 = vpop.eup %4456 }
 0x133   :  { %4458 = vrcp.f32 %v399_v56 }
 0x140   :  { %v4459_v60 = vpop.eup %4458 }
 0x141   :  { %v402_v61 = vsel %vm5113_vm5, %v4457_v59, %v4459_v60  ;;  %v298_v60 = vcombine.high %v296_v32, %v296_v32 }
 0x142   :  { %403 = vrot.lane.b32.xlu0 %v402_v61, %s4826_s3  ;;  %v408_v1 = vmul.f32 0.0, %v402_v61 }
 0x1b4   :  { %v404_v62 = vpop.permute.xlu0 %403 }
 0x1b5   :  { %v405_v63 = vmul.f32 %v404_v62, %v402_v61 }
 0x1b7   :  { %406 = vrot.lane.b32.xlu0 %v405_v63, %s4827_s23 }
 0x229   :  { %v407_v2 = vpop.permute.xlu0 %406 }
 0x22a   :  { %v409_v3 = vadd.f32 %v408_v1, %v407_v2 }
 0x22c   :  { %4460 = vtanh.f32 %v409_v3 }
 0x239   :  { %v4461_v4 = vpop.eup %4460 }
 0x23a   :  { %v411_v5 = vmul.f32 %v4461_v4, %v404_v62 }
 0x23c   :  { %412 = vst [vmem:[#allocation2] sm:$0x3] %v411_v5  ;;  %3595 = vmatmul.mubr.f32.vlgmr.msra.gmra.mxu0 %v411_v5 }
 0x23d   :  { %3633 = vmatpush3.msra.mxu0 %v4932_v6  ;;  %3664 = vmatprep.mubr.msk.f32.mxu0 %vm4825_vm0, %v4823_v0 }
 0x23e   :  { %3634 = vmatprep.subr.mxu0 %v4823_v0 }
 0x23f   :  { %3635 = vmatpush3.msra.mxu0 %v4934_v7 }
 0x240   :  { %3636 = vmatprep.subr.mxu0 %v4823_v0 }
 0x241   :  { %3637 = vmatpush3.msra.mxu0 %v4938_v8 }
 0x242   :  { %3638 = vmatprep.subr.mxu0 %v4823_v0 }
 0x243   :  { %3639 = vmatpush3.msra.mxu0 %v4941_v9 }
 0x244   :  { %3640 = vmatprep.subr.mxu0 %v4823_v0 }
 0x245   :  { %3641 = vmatpush3.msra.mxu0 %v4959_v15 }
 0x246   :  { %3642 = vmatprep.subr.mxu0 %v4823_v0 }
 0x247   :  { %3643 = vmatpush3.msra.mxu0 %v4981_v26 }
 0x248   :  { %3644 = vmatprep.subr.mxu0 %v4823_v0 }
 0x249   :  { %3645 = vmatpush3.msra.mxu0 %v4988_v30 }
 0x24a   :  { %3646 = vmatprep.subr.mxu0 %v4823_v0 }
 0x24b   :  { %3647 = vmatpush3.msra.mxu0 %v4992_v33 }
 0x24c   :  { %3648 = vmatprep.subr.mxu0 %v4823_v0 }
 0x24d   :  { %3649 = vmatpush3.msra.mxu0 %v4996_v34 }
 0x24e   :  { %3650 = vmatprep.subr.mxu0 %v4823_v0 }
 0x24f   :  { %3651 = vmatpush3.msra.mxu0 %v5002_v35 }
 0x250   :  { %3652 = vmatprep.subr.mxu0 %v4823_v0 }
 0x251   :  { %3653 = vmatpush3.msra.mxu0 %v5008_v36 }
 0x252   :  { %3654 = vmatprep.subr.mxu0 %v4823_v0 }
 0x253   :  { %3655 = vmatpush3.msra.mxu0 %v5014_v37 }
 0x254   :  { %3656 = vmatprep.subr.mxu0 %v4823_v0 }
 0x255   :  { %3657 = vmatpush3.msra.mxu0 %v5020_v38 }
 0x256   :  { %3658 = vmatprep.subr.mxu0 %v4823_v0 }
 0x257   :  { %3659 = vmatpush3.msra.mxu0 %v5026_v39 }
 0x258   :  { %3660 = vmatprep.subr.mxu0 %v4823_v0 }
 0x259   :  { %3661 = vmatpush3.msra.mxu0 %v5032_v40 }
 0x25a   :  { %3662 = vmatprep.subr.mxu0 %v4823_v0 }
 0x25b   :  { %3663 = vmatpush3.msra.mxu0 %v5038_v41 }
 0x25c   :  { %3702 = vmatprep.subr.mxu0 %v4823_v0 }
 0x2fc   :  { %v479_v12 = vpop.f32.mrf.mxu0 }
 0x2fd   :  { %v483_v13 = vadd.f32 %v479_v12, %v297_v10 }
 0x2fe   :  { %v3596_v14 = vpop.f32.mrf.mxu0 }
 0x2ff   :  { %v3050_v16 = vmul.f32 -1.442695, %v483_v13 }
 0x301   :  { %4462 = vpow2.f32 %v3050_v16 }
 0x302   :  { %4464 = vtanh.f32 %v483_v13 }
 0x30e   :  { %v4463_v17 = vpop.eup %4462 }
 0x30f   :  { %v488_v18 = vadd.f32 1.0, %v4463_v17  ;;  %v4465_v19 = vpop.eup %4464 }
 0x311   :  { %4466 = vrcp.f32 %v488_v18 }
 0x31e   :  { %v4467_v20 = vpop.eup %4466 }
 0x31f   :  { %v491_v21 = vsel %vm5113_vm5, %v4465_v19, %v4467_v20  ;;  %v306_v20 = vrot.slane %v5103_v47, %v4946_v11 }
 0x320   :  { %492 = vrot.lane.b32.xlu1 %v491_v21, %s4826_s3  ;;  %v497_v24 = vmul.f32 %v491_v21, %v409_v3 }
 0x392   :  { %v493_v22 = vpop.permute.xlu1 %492 }
 0x393   :  { %v494_v23 = vmul.f32 %v493_v22, %v491_v21 }
 0x395   :  { %495 = vrot.lane.b32.xlu1 %v494_v23, %s4827_s23 }
 0x407   :  { %v496_v25 = vpop.permute.xlu1 %495 }
 0x408   :  { %v498_v27 = vadd.f32 %v497_v24, %v496_v25 }
 0x40a   :  { %4468 = vtanh.f32 %v498_v27 }
 0x417   :  { %v4469_v28 = vpop.eup %4468 }
 0x418   :  { %v500_v29 = vmul.f32 %v4469_v28, %v493_v22 }
 0x41a   :  { %502 = vst [vmem:[#allocation2 + $0x2] sm:$0x3] %v500_v29  ;;  %3630 = vmatmul.mubr.f32.vlgmr.msra.gmra.mxu1 %v500_v29 }
 0x41b   :  { %3668 = vmatpush3.msra.mxu1 %v4932_v6  ;;  %3699 = vmatprep.mubr.msk.f32.mxu1 %vm4825_vm0, %v4823_v0 }
 0x41c   :  { %3669 = vmatprep.subr.mxu1 %v4823_v0 }
 0x41d   :  { %3670 = vmatpush3.msra.mxu1 %v4934_v7 }
 0x41e   :  { %3671 = vmatprep.subr.mxu1 %v4823_v0 }
 0x41f   :  { %3672 = vmatpush3.msra.mxu1 %v4938_v8 }
 0x420   :  { %3673 = vmatprep.subr.mxu1 %v4823_v0 }
 0x421   :  { %3674 = vmatpush3.msra.mxu1 %v4941_v9 }
 0x422   :  { %3675 = vmatprep.subr.mxu1 %v4823_v0 }
 0x423   :  { %3676 = vmatpush3.msra.mxu1 %v4959_v15 }
 0x424   :  { %3677 = vmatprep.subr.mxu1 %v4823_v0 }
 0x425   :  { %3678 = vmatpush3.msra.mxu1 %v4981_v26 }
 0x426   :  { %3679 = vmatprep.subr.mxu1 %v4823_v0 }
 0x427   :  { %3680 = vmatpush3.msra.mxu1 %v4988_v30 }
 0x428   :  { %3681 = vmatprep.subr.mxu1 %v4823_v0 }
 0x429   :  { %3682 = vmatpush3.msra.mxu1 %v4992_v33 }
 0x42a   :  { %3683 = vmatprep.subr.mxu1 %v4823_v0 }
 0x42b   :  { %3684 = vmatpush3.msra.mxu1 %v4996_v34 }
 0x42c   :  { %3685 = vmatprep.subr.mxu1 %v4823_v0 }
 0x42d   :  { %3686 = vmatpush3.msra.mxu1 %v5002_v35 }
 0x42e   :  { %3687 = vmatprep.subr.mxu1 %v4823_v0 }
 0x42f   :  { %3688 = vmatpush3.msra.mxu1 %v5008_v36 }
 0x430   :  { %3689 = vmatprep.subr.mxu1 %v4823_v0 }
 0x431   :  { %3690 = vmatpush3.msra.mxu1 %v5014_v37 }
 0x432   :  { %3691 = vmatprep.subr.mxu1 %v4823_v0 }
 0x433   :  { %3692 = vmatpush3.msra.mxu1 %v5020_v38 }
 0x434   :  { %3693 = vmatprep.subr.mxu1 %v4823_v0 }
 0x435   :  { %3694 = vmatpush3.msra.mxu1 %v5026_v39 }
 0x436   :  { %3695 = vmatprep.subr.mxu1 %v4823_v0 }
 0x437   :  { %3696 = vmatpush3.msra.mxu1 %v5032_v40 }
 0x438   :  { %3697 = vmatprep.subr.mxu1 %v4823_v0 }
 0x439   :  { %3698 = vmatpush3.msra.mxu1 %v5038_v41 }
 0x43a   :  { %3737 = vmatprep.subr.mxu1 %v4823_v0 }
 0x4da   :  { %v569_v42 = vpop.f32.mrf.mxu1 }
 0x4db   :  { %v573_v43 = vadd.f32 %v569_v42, %v296_v32 }
 0x4dc   :  { %v3631_v44 = vpop.f32.mrf.mxu1 }
 0x4dd   :  { %v3051_v45 = vmul.f32 -1.442695, %v573_v43 }
 0x4df   :  { %4470 = vpow2.f32 %v3051_v45 }
 0x4e0   :  { %4472 = vtanh.f32 %v573_v43 }
 0x4ec   :  { %v4471_v46 = vpop.eup %4470 }
 0x4ed   :  { %v578_v48 = vadd.f32 1.0, %v4471_v46  ;;  %v4473_v50 = vpop.eup %4472 }
 0x4ef   :  { %4474 = vrcp.f32 %v578_v48 }
 0x4fc   :  { %v4475_v51 = vpop.eup %4474 }
 0x4fd   :  { %v581_v52 = vsel %vm5113_vm5, %v4473_v50, %v4475_v51  ;;  %v1088_v50 = vld [vmem:[#allocation2 + $0x2] sm:$0x3] }
 0x4fe   :  { %582 = vrot.lane.b32.xlu0 %v581_v52, %s4826_s3  ;;  %v587_v54 = vmul.f32 %v581_v52, %v498_v27 }
 0x570   :  { %v583_v53 = vpop.permute.xlu0 %582 }
 0x571   :  { %v584_v49 = vmul.f32 %v583_v53, %v581_v52 }
 0x573   :  { %585 = vrot.lane.b32.xlu1 %v584_v49, %s4827_s23 }
 0x5e5   :  { %v586_v55 = vpop.permute.xlu1 %585 }
 0x5e6   :  { %v588_v56 = vadd.f32 %v587_v54, %v586_v55 }
 0x5e8   :  { %4476 = vtanh.f32 %v588_v56 }
 0x5f5   :  { %v4477_v57 = vpop.eup %4476 }
 0x5f6   :  { %v590_v59 = vmul.f32 %v4477_v57, %v583_v53  ;;  %v1087_v53 = vld [vmem:[#allocation2] sm:$0x3] }
 0x5f7   :  { %v1108_v49 = vcombine.low %v1087_v53, %v1088_v50  ;;  %v5376_v50 = vld [vmem:[#allocation9 + $0x30] sm:$0xff] }
 0x5f8   :  { %592 = vst [vmem:[#allocation2 + $0x4] sm:$0x3] %v590_v59  ;;  %3665 = vmatmul.mubr.f32.vlgmr.msra.gmra.mxu0 %v590_v59  ;;  %v1056_v53 = vld [vmem:[#allocation7 + $0x10] sm:$0xff] }
 0x5f9   :  { %3703 = vmatpush3.msra.mxu0 %v4932_v6  ;;  %3734 = vmatprep.mubr.msk.f32.mxu0 %vm4825_vm0, %v4823_v0 }
 0x5fa   :  { %3704 = vmatprep.subr.mxu0 %v4823_v0 }
 0x5fb   :  { %3705 = vmatpush3.msra.mxu0 %v4934_v7 }
 0x5fc   :  { %3706 = vmatprep.subr.mxu0 %v4823_v0 }
 0x5fd   :  { %3707 = vmatpush3.msra.mxu0 %v4938_v8 }
 0x5fe   :  { %3708 = vmatprep.subr.mxu0 %v4823_v0 }
 0x5ff   :  { %3709 = vmatpush3.msra.mxu0 %v4941_v9  ;;  %v1089_v51 = vld [vmem:[#allocation2 + $0x4] sm:$0x3] }
 0x600   :  { %3710 = vmatprep.subr.mxu0 %v4823_v0 }
 0x601   :  { %3711 = vmatpush3.msra.mxu0 %v4959_v15 }
 0x602   :  { %3712 = vmatprep.subr.mxu0 %v4823_v0 }
 0x603   :  { %3713 = vmatpush3.msra.mxu0 %v4981_v26 }
 0x604   :  { %3714 = vmatprep.subr.mxu0 %v4823_v0 }
 0x605   :  { %3715 = vmatpush3.msra.mxu0 %v4988_v30 }
 0x606   :  { %3716 = vmatprep.subr.mxu0 %v4823_v0 }
 0x607   :  { %3717 = vmatpush3.msra.mxu0 %v4992_v33 }
 0x608   :  { %3718 = vmatprep.subr.mxu0 %v4823_v0 }
 0x609   :  { %3719 = vmatpush3.msra.mxu0 %v4996_v34 }
 0x60a   :  { %3720 = vmatprep.subr.mxu0 %v4823_v0 }
 0x60b   :  { %3721 = vmatpush3.msra.mxu0 %v5002_v35 }
 0x60c   :  { %3722 = vmatprep.subr.mxu0 %v4823_v0 }
 0x60d   :  { %3723 = vmatpush3.msra.mxu0 %v5008_v36 }
 0x60e   :  { %3724 = vmatprep.subr.mxu0 %v4823_v0 }
 0x60f   :  { %3725 = vmatpush3.msra.mxu0 %v5014_v37 }
 0x610   :  { %3726 = vmatprep.subr.mxu0 %v4823_v0 }
 0x611   :  { %3727 = vmatpush3.msra.mxu0 %v5020_v38 }
 0x612   :  { %3728 = vmatprep.subr.mxu0 %v4823_v0 }
 0x613   :  { %3729 = vmatpush3.msra.mxu0 %v5026_v39 }
 0x614   :  { %3730 = vmatprep.subr.mxu0 %v4823_v0 }
 0x615   :  { %3731 = vmatpush3.msra.mxu0 %v5032_v40 }
 0x616   :  { %3732 = vmatprep.subr.mxu0 %v4823_v0 }
 0x617   :  { %3733 = vmatpush3.msra.mxu0 %v5038_v41 }
 0x618   :  { %3772 = vmatprep.subr.mxu0 %v4823_v0 }
 0x6b8   :  { %v659_v61 = vpop.f32.mrf.mxu0 }
 0x6b9   :  { %v663_v62 = vadd.f32 %v659_v61, %v298_v60  ;;  %v299_v60 = vcombine.high %v5103_v47, %v5103_v47 }
 0x6ba   :  { %v3666_v63 = vpop.f32.mrf.mxu0 }
 0x6bb   :  { %v3052_v1 = vmul.f32 -1.442695, %v663_v62  ;;  %v313_v61 = vrot.slane %v299_v60, %v4946_v11  ;;  %v5401_v60 = vld [vmem:[#allocation9] sm:$0xff] }
 0x6bd   :  { %4478 = vpow2.f32 %v3052_v1 }
 0x6be   :  { %4480 = vtanh.f32 %v663_v62 }
 0x6ca   :  { %v4479_v2 = vpop.eup %4478 }
 0x6cb   :  { %v668_v3 = vadd.f32 1.0, %v4479_v2  ;;  %v4481_v4 = vpop.eup %4480 }
 0x6cd   :  { %4482 = vrcp.f32 %v668_v3 }
 0x6da   :  { %v4483_v5 = vpop.eup %4482 }
 0x6db   :  { %v671_v10 = vsel %vm5113_vm5, %v4481_v4, %v4483_v5 }
 0x6dc   :  { %672 = vrot.lane.b32.xlu0 %v671_v10, %s4826_s3  ;;  %v677_v14 = vmul.f32 %v671_v10, %v588_v56  ;;  %v1116_v56 = vrot.slane %v1108_v49, %v4946_v11  ;;  %v5384_v49 = vld [vmem:[#allocation9 + $0x20] sm:$0xff] }
 0x74e   :  { %v673_v12 = vpop.permute.xlu0 %672 }
 0x74f   :  { %v674_v13 = vmul.f32 %v673_v12, %v671_v10 }
 0x751   :  { %675 = vrot.lane.b32.xlu1 %v674_v13, %s4827_s23 }
 0x7c3   :  { %v676_v16 = vpop.permute.xlu1 %675 }
 0x7c4   :  { %v678_v17 = vadd.f32 %v677_v14, %v676_v16 }
 0x7c6   :  { %4484 = vtanh.f32 %v678_v17 }
 0x7d3   :  { %v4485_v18 = vpop.eup %4484 }
 0x7d4   :  { %v680_v19 = vmul.f32 %v4485_v18, %v673_v12 }
 0x7d6   :  { %682 = vst [vmem:[#allocation2 + $0x6] sm:$0x3] %v680_v19  ;;  %3700 = vmatmul.mubr.f32.vlgmr.msra.gmra.mxu1 %v680_v19 }
 0x7d7   :  { %3738 = vmatpush3.msra.mxu1 %v4932_v6  ;;  %3769 = vmatprep.mubr.msk.f32.mxu1 %vm4825_vm0, %v4823_v0 }
 0x7d8   :  { %3739 = vmatprep.subr.mxu1 %v4823_v0 }
 0x7d9   :  { %3740 = vmatpush3.msra.mxu1 %v4934_v7 }
 0x7da   :  { %3741 = vmatprep.subr.mxu1 %v4823_v0 }
 0x7db   :  { %3742 = vmatpush3.msra.mxu1 %v4938_v8 }
 0x7dc   :  { %3743 = vmatprep.subr.mxu1 %v4823_v0 }
 0x7dd   :  { %3744 = vmatpush3.msra.mxu1 %v4941_v9 }
 0x7de   :  { %3745 = vmatprep.subr.mxu1 %v4823_v0 }
 0x7df   :  { %3746 = vmatpush3.msra.mxu1 %v4959_v15 }
 0x7e0   :  { %3747 = vmatprep.subr.mxu1 %v4823_v0 }
 0x7e1   :  { %3748 = vmatpush3.msra.mxu1 %v4981_v26 }
 0x7e2   :  { %3749 = vmatprep.subr.mxu1 %v4823_v0 }
 0x7e3   :  { %3750 = vmatpush3.msra.mxu1 %v4988_v30 }
 0x7e4   :  { %3751 = vmatprep.subr.mxu1 %v4823_v0 }
 0x7e5   :  { %3752 = vmatpush3.msra.mxu1 %v4992_v33 }
 0x7e6   :  { %3753 = vmatprep.subr.mxu1 %v4823_v0 }
 0x7e7   :  { %3754 = vmatpush3.msra.mxu1 %v4996_v34 }
 0x7e8   :  { %3755 = vmatprep.subr.mxu1 %v4823_v0 }
 0x7e9   :  { %3756 = vmatpush3.msra.mxu1 %v5002_v35 }
 0x7ea   :  { %3757 = vmatprep.subr.mxu1 %v4823_v0 }
 0x7eb   :  { %3758 = vmatpush3.msra.mxu1 %v5008_v36 }
 0x7ec   :  { %3759 = vmatprep.subr.mxu1 %v4823_v0 }
 0x7ed   :  { %3760 = vmatpush3.msra.mxu1 %v5014_v37 }
 0x7ee   :  { %3761 = vmatprep.subr.mxu1 %v4823_v0 }
 0x7ef   :  { %3762 = vmatpush3.msra.mxu1 %v5020_v38 }
 0x7f0   :  { %3763 = vmatprep.subr.mxu1 %v4823_v0 }
 0x7f1   :  { %3764 = vmatpush3.msra.mxu1 %v5026_v39 }
 0x7f2   :  { %3765 = vmatprep.subr.mxu1 %v4823_v0 }
 0x7f3   :  { %3766 = vmatpush3.msra.mxu1 %v5032_v40 }
 0x7f4   :  { %3767 = vmatprep.subr.mxu1 %v4823_v0 }
 0x7f5   :  { %3768 = vmatpush3.msra.mxu1 %v5038_v41 }
 0x896   :  { %v749_v21 = vpop.f32.mrf.mxu1 }
 0x897   :  { %v753_v22 = vadd.f32 %v749_v21, %v306_v20 }
 0x898   :  { %v3701_v23 = vpop.f32.mrf.mxu1 }
 0x899   :  { %v3053_v24 = vmul.f32 -1.442695, %v753_v22 }
 0x89b   :  { %4486 = vpow2.f32 %v3053_v24 }
 0x89c   :  { %4488 = vtanh.f32 %v753_v22 }
 0x8a8   :  { %v4487_v25 = vpop.eup %4486 }
 0x8a9   :  { %v758_v27 = vadd.f32 1.0, %v4487_v25  ;;  %v4489_v28 = vpop.eup %4488 }
 0x8ab   :  { %4490 = vrcp.f32 %v758_v27 }
 0x8b8   :  { %v4491_v29 = vpop.eup %4490 }
 0x8b9   :  { %v761_v31 = vsel %vm5113_vm5, %v4489_v28, %v4491_v29 }
 0x8ba   :  { %762 = vrot.lane.b32.xlu0 %v761_v31, %s4826_s3  ;;  %v767_v43 = vmul.f32 %v761_v31, %v678_v17 }
 0x92c   :  { %v763_v32 = vpop.permute.xlu0 %762 }
 0x92d   :  { %v764_v42 = vmul.f32 %v763_v32, %v761_v31 }
 0x92f   :  { %765 = vrot.lane.b32.xlu1 %v764_v42, %s4827_s23  ;;  %v1068_v42 = vld [vmem:[#allocation7 + $0x70] sm:$0xff] }
 0x9a1   :  { %v766_v44 = vpop.permute.xlu1 %765 }
 0x9a2   :  { %v768_v45 = vadd.f32 %v767_v43, %v766_v44  ;;  %v1067_v43 = vld [vmem:[#allocation7 + $0x68] sm:$0xff]  ;;  %v5337_v44 = vld [vmem:[#allocation9 + $0x78] sm:$0xff] }
 0x9a4   :  { %4492 = vtanh.f32 %v768_v45 }
 0x9b1   :  { %v4493_v46 = vpop.eup %4492 }
 0x9b2   :  { %v770_v48 = vmul.f32 %v4493_v46, %v763_v32  ;;  %v1069_v32 = vld [vmem:[#allocation7 + $0x78] sm:$0xff]  ;;  %v5341_v46 = vld [vmem:[#allocation9 + $0x70] sm:$0xff] }
 0x9b3   :  { %3807 = vmatprep.subr.mxu1 %v1069_v32 }
 0x9b4   :  { %772 = vst [vmem:[#allocation2 + $0x8] sm:$0x3] %v770_v48  ;;  %3735 = vmatmul.mubr.f32.vlgmr.msra.gmra.mxu0 %v770_v48  ;;  %v1065_v48 = vld [vmem:[#allocation7 + $0x58] sm:$0xff] }
 0x9b5   :  { %3773 = vmatpush3.msra.mxu0 %v4932_v6  ;;  %3804 = vmatprep.mubr.msk.f32.mxu0 %vm4825_vm0, %v4823_v0  ;;  %v314_v6 = vcombine.high %v306_v20, %v306_v20  ;;  %v315_v20 = vcombine.high %v313_v61, %v313_v61 }
 0x9b6   :  { %3774 = vmatprep.subr.mxu0 %v4823_v0 }
 0x9b7   :  { %3775 = vmatpush3.msra.mxu0 %v4934_v7 }
 0x9b8   :  { %3776 = vmatprep.subr.mxu0 %v4823_v0 }
 0x9b9   :  { %3777 = vmatpush3.msra.mxu0 %v4938_v8 }
 0x9ba   :  { %3778 = vmatprep.subr.mxu0 %v4823_v0 }
 0x9bb   :  { %3779 = vmatpush3.msra.mxu0 %v4941_v9 }
 0x9bc   :  { %3780 = vmatprep.subr.mxu0 %v4823_v0 }
 0x9bd   :  { %3781 = vmatpush3.msra.mxu0 %v4959_v15 }
 0x9be   :  { %3782 = vmatprep.subr.mxu0 %v4823_v0 }
 0x9bf   :  { %3783 = vmatpush3.msra.mxu0 %v4981_v26 }
 0x9c0   :  { %3784 = vmatprep.subr.mxu0 %v4823_v0 }
 0x9c1   :  { %3785 = vmatpush3.msra.mxu0 %v4988_v30 }
 0x9c2   :  { %3786 = vmatprep.subr.mxu0 %v4823_v0 }
 0x9c3   :  { %3787 = vmatpush3.msra.mxu0 %v4992_v33 }
 0x9c4   :  { %3788 = vmatprep.subr.mxu0 %v4823_v0 }
 0x9c5   :  { %3789 = vmatpush3.msra.mxu0 %v4996_v34 }
 0x9c6   :  { %3790 = vmatprep.subr.mxu0 %v4823_v0 }
 0x9c7   :  { %3791 = vmatpush3.msra.mxu0 %v5002_v35 }
 0x9c8   :  { %3792 = vmatprep.subr.mxu0 %v4823_v0 }
 0x9c9   :  { %3793 = vmatpush3.msra.mxu0 %v5008_v36 }
 0x9ca   :  { %3794 = vmatprep.subr.mxu0 %v4823_v0 }
 0x9cb   :  { %3795 = vmatpush3.msra.mxu0 %v5014_v37 }
 0x9cc   :  { %3796 = vmatprep.subr.mxu0 %v4823_v0 }
 0x9cd   :  { %3797 = vmatpush3.msra.mxu0 %v5020_v38 }
 0x9ce   :  { %3798 = vmatprep.subr.mxu0 %v4823_v0 }
 0x9cf   :  { %3799 = vmatpush3.msra.mxu0 %v5026_v39 }
 0x9d0   :  { %3800 = vmatprep.subr.mxu0 %v4823_v0 }
 0x9d1   :  { %3801 = vmatpush3.msra.mxu0 %v5032_v40 }
 0x9d2   :  { %3802 = vmatprep.subr.mxu0 %v4823_v0 }
 0x9d3   :  { %3803 = vmatpush3.msra.mxu0 %v5038_v41  ;;  %v1090_v41 = vld [vmem:[#allocation2 + $0x6] sm:$0x3] }
 0x9d4   :  { %3842 = vmatprep.subr.mxu0 %v4823_v0  ;;  %v1109_v52 = vcombine.low %v1089_v51, %v1090_v41  ;;  %v1058_v41 = vld [vmem:[#allocation7 + $0x20] sm:$0xff]  ;;  %v1057_v51 = vld [vmem:[#allocation7 + $0x18] sm:$0xff] }
 0x9d6   :  { %v1123_v54 = vrot.slane %v1109_v52, %v4946_v11  ;;  %v5380_v52 = vld [vmem:[#allocation9 + $0x28] sm:$0xff] }
 0x9d8   :  { %v1124_v59 = vcombine.low %v1116_v56, %v1123_v54  ;;  %v1055_v54 = vld [vmem:[#allocation7 + $0x8] sm:$0xff]  ;;  %v1054_v56 = vld [vmem:[#allocation7] sm:$0xff] }
 0xa74   :  { %v839_v7 = vpop.f32.mrf.mxu0 }
 0xa75   :  { %v843_v8 = vadd.f32 %v839_v7, %v314_v6  ;;  %v5345_v6 = vld [vmem:[#allocation9 + $0x68] sm:$0xff]  ;;  %v1064_v7 = vld [vmem:[#allocation7 + $0x50] sm:$0xff] }
 0xa76   :  { %v3736_v9 = vpop.f32.mrf.mxu0 }
 0xa77   :  { %v3054_v15 = vmul.f32 -1.442695, %v843_v8  ;;  %v5351_v9 = vld [vmem:[#allocation9 + $0x60] sm:$0xff] }
 0xa79   :  { %4494 = vpow2.f32 %v3054_v15 }
 0xa7a   :  { %4496 = vtanh.f32 %v843_v8 }
 0xa86   :  { %v4495_v26 = vpop.eup %4494 }
 0xa87   :  { %v848_v30 = vadd.f32 1.0, %v4495_v26  ;;  %v4497_v33 = vpop.eup %4496  ;;  %v1063_v26 = vld [vmem:[#allocation7 + $0x48] sm:$0xff] }
 0xa89   :  { %4498 = vrcp.f32 %v848_v30  ;;  %v5357_v30 = vld [vmem:[#allocation9 + $0x58] sm:$0xff] }
 0xa96   :  { %v4499_v34 = vpop.eup %4498 }
 0xa97   :  { %v851_v35 = vsel %vm5113_vm5, %v4497_v33, %v4499_v34  ;;  %v1062_v33 = vld [vmem:[#allocation7 + $0x40] sm:$0xff]  ;;  %v5361_v34 = vld [vmem:[#allocation9 + $0x50] sm:$0xff] }
 0xa98   :  { %852 = vrot.lane.b32.xlu0 %v851_v35, %s4826_s3  ;;  %v857_v38 = vmul.f32 %v851_v35, %v768_v45  ;;  %v1066_v45 = vld [vmem:[#allocation7 + $0x60] sm:$0xff] }
 0xb0a   :  { %v853_v36 = vpop.permute.xlu0 %852 }
 0xb0b   :  { %v854_v37 = vmul.f32 %v853_v36, %v851_v35  ;;  %v1061_v35 = vld [vmem:[#allocation7 + $0x38] sm:$0xff] }
 0xb0d   :  { %855 = vrot.lane.b32.xlu1 %v854_v37, %s4827_s23  ;;  %v1060_v37 = vld [vmem:[#allocation7 + $0x30] sm:$0xff] }
 0xb7f   :  { %v856_v39 = vpop.permute.xlu1 %855 }
 0xb80   :  { %v858_v40 = vadd.f32 %v857_v38, %v856_v39  ;;  %v5369_v38 = vld [vmem:[#allocation9 + $0x40] sm:$0xff]  ;;  %v1059_v39 = vld [vmem:[#allocation7 + $0x28] sm:$0xff] }
 0xb82   :  { %4500 = vtanh.f32 %v858_v40 }
 0xb8f   :  { %v4501_v55 = vpop.eup %4500 }
 0xb90   :  { %v860_v57 = vmul.f32 %v4501_v55, %v853_v36  ;;  %v5365_v36 = vld [vmem:[#allocation9 + $0x48] sm:$0xff]  ;;  %v5388_v55 = vld [vmem:[#allocation9 + $0x18] sm:$0xff] }
 0xb92   :  { %862 = vst [vmem:[#allocation2 + $0xa] sm:$0x3] %v860_v57  ;;  %3770 = vmatmul.mubr.f32.vlgmr.msra.gmra.mxu1 %v860_v57  ;;  %v5392_v57 = vld [vmem:[#allocation9 + $0x10] sm:$0xff] }
 0xb93   :  { %3839 = vmatprep.mubr.f32.mxu1 %v1124_v59  ;;  %3808 = vmatpush3.msra.mxu1 %v1069_v32  ;;  %v5397_v59 = vld [vmem:[#allocation9 + $0x8] sm:$0xff] }
 0xb94   :  { %3809 = vmatprep.subr.mxu1 %v1068_v42 }
 0xb95   :  { %3810 = vmatpush3.msra.mxu1 %v1068_v42 }
 0xb96   :  { %3811 = vmatprep.subr.mxu1 %v1067_v43 }
 0xb97   :  { %3812 = vmatpush3.msra.mxu1 %v1067_v43 }
 0xb98   :  { %3813 = vmatprep.subr.mxu1 %v1066_v45 }
 0xb99   :  { %3814 = vmatpush3.msra.mxu1 %v1066_v45 }
 0xb9a   :  { %3815 = vmatprep.subr.mxu1 %v1065_v48 }
 0xb9b   :  { %3816 = vmatpush3.msra.mxu1 %v1065_v48 }
 0xb9c   :  { %3817 = vmatprep.subr.mxu1 %v1064_v7 }
 0xb9d   :  { %3818 = vmatpush3.msra.mxu1 %v1064_v7 }
 0xb9e   :  { %3819 = vmatprep.subr.mxu1 %v1063_v26 }
 0xb9f   :  { %3820 = vmatpush3.msra.mxu1 %v1063_v26 }
 0xba0   :  { %3821 = vmatprep.subr.mxu1 %v1062_v33 }
 0xba1   :  { %3822 = vmatpush3.msra.mxu1 %v1062_v33 }
 0xba2   :  { %3823 = vmatprep.subr.mxu1 %v1061_v35 }
 0xba3   :  { %3824 = vmatpush3.msra.mxu1 %v1061_v35 }
 0xba4   :  { %3825 = vmatprep.subr.mxu1 %v1060_v37 }
 0xba5   :  { %3826 = vmatpush3.msra.mxu1 %v1060_v37 }
 0xba6   :  { %3827 = vmatprep.subr.mxu1 %v1059_v39 }
 0xba7   :  { %3828 = vmatpush3.msra.mxu1 %v1059_v39 }
 0xba8   :  { %3829 = vmatprep.subr.mxu1 %v1058_v41 }
 0xba9   :  { %3830 = vmatpush3.msra.mxu1 %v1058_v41 }
 0xbaa   :  { %3831 = vmatprep.subr.mxu1 %v1057_v51 }
 0xbab   :  { %3832 = vmatpush3.msra.mxu1 %v1057_v51 }
 0xbac   :  { %3833 = vmatprep.subr.mxu1 %v1056_v53 }
 0xbad   :  { %3834 = vmatpush3.msra.mxu1 %v1056_v53 }
 0xbae   :  { %3835 = vmatprep.subr.mxu1 %v1055_v54 }
 0xbaf   :  { %3836 = vmatpush3.msra.mxu1 %v1055_v54 }
 0xbb0   :  { %3837 = vmatprep.subr.mxu1 %v1054_v56 }
 0xbb1   :  { %3838 = vmatpush3.msra.mxu1 %v1054_v56 }
 0xbb2   :  { %3877 = vmatprep.subr.mxu1 %v4823_v0 }
 0xc52   :  { %v929_v62 = vpop.f32.mrf.mxu1 }
 0xc53   :  { %v933_v63 = vadd.f32 %v929_v62, %v313_v61 }
 0xc54   :  { %v3771_v1 = vpop.f32.mrf.mxu1 }
 0xc55   :  { %v3055_v2 = vmul.f32 -1.442695, %v933_v63 }
 0xc57   :  { %4502 = vpow2.f32 %v3055_v2 }
 0xc58   :  { %4504 = vtanh.f32 %v933_v63 }
 0xc64   :  { %v4503_v3 = vpop.eup %4502 }
 0xc65   :  { %v938_v4 = vadd.f32 1.0, %v4503_v3  ;;  %v4505_v5 = vpop.eup %4504  ;;  %v1092_v3 = vld [vmem:[#allocation2 + $0xa] sm:$0x3] }
 0xc67   :  { %4506 = vrcp.f32 %v938_v4  ;;  %v1091_v4 = vld [vmem:[#allocation2 + $0x8] sm:$0x3] }
 0xc74   :  { %v4507_v10 = vpop.eup %4506 }
 0xc75   :  { %v941_v12 = vsel %vm5113_vm5, %v4505_v5, %v4507_v10  ;;  %v1125_v5 = vcombine.low %v1091_v4, %v1092_v3 }
 0xc76   :  { %942 = vrot.lane.b32.xlu0 %v941_v12, %s4826_s3  ;;  %v947_v14 = vmul.f32 %v941_v12, %v858_v40  ;;  %v5372_v40 = vld [vmem:[#allocation9 + $0x38] sm:$0xff] }
 0xce8   :  { %v943_v13 = vpop.permute.xlu0 %942 }
 0xce9   :  { %v944_v47 = vmul.f32 %v943_v13, %v941_v12 }
 0xceb   :  { %945 = vrot.lane.b32.xlu1 %v944_v47, %s4827_s23  ;;  %v1133_v47 = vrot.slane %v1125_v5, %v4946_v11 }
 0xd5d   :  { %v946_v16 = vpop.permute.xlu1 %945 }
 0xd5e   :  { %v5326_v17 = vadd.f32 %v947_v14, %v946_v16 }
 0xd60   :  { %4508 = vtanh.f32 %v5326_v17 }
 0xd6d   :  { %v4509_v18 = vpop.eup %4508 }
 0xd6e   :  { %v950_v19 = vmul.f32 %v4509_v18, %v943_v13 }
 0xd70   :  { %952 = vst [vmem:[#allocation2 + $0xc] sm:$0x3] %v950_v19  ;;  %3805 = vmatmul.mubr.f32.vlgmr.msra.gmra.mxu0 %v950_v19  ;;  %v3057_v19 = vld [vmem:[%s6136_s6] ss:$0 sm:$0xff] }
 0xd71   :  { %3874 = vmatprep.mubr.msk.f32.mxu0 %vm4825_vm0, %v4823_v0  ;;  %3843 = vmatpush3.msra.mxu0 %v5337_v44 }
 0xd72   :  { %3844 = vmatprep.subr.mxu0 %v4823_v0 }
 0xd73   :  { %3845 = vmatpush3.msra.mxu0 %v5341_v46 }
 0xd74   :  { %3846 = vmatprep.subr.mxu0 %v4823_v0 }
 0xd75   :  { %3847 = vmatpush3.msra.mxu0 %v5345_v6 }
 0xd76   :  { %3848 = vmatprep.subr.mxu0 %v4823_v0 }
 0xd77   :  { %3849 = vmatpush3.msra.mxu0 %v5351_v9  ;;  %v1093_v10 = vld [vmem:[#allocation2 + $0xc] sm:$0x3] }
 0xd78   :  { %3850 = vmatprep.subr.mxu0 %v4823_v0 }
 0xd79   :  { %3851 = vmatpush3.msra.mxu0 %v5357_v30 }
 0xd7a   :  { %3852 = vmatprep.subr.mxu0 %v4823_v0 }
 0xd7b   :  { %3853 = vmatpush3.msra.mxu0 %v5361_v34 }
 0xd7c   :  { %3854 = vmatprep.subr.mxu0 %v4823_v0 }
 0xd7d   :  { %3855 = vmatpush3.msra.mxu0 %v5365_v36 }
 0xd7e   :  { %3856 = vmatprep.subr.mxu0 %v4823_v0 }
 0xd7f   :  { %3857 = vmatpush3.msra.mxu0 %v5369_v38 }
 0xd80   :  { %3858 = vmatprep.subr.mxu0 %v4823_v0 }
 0xd81   :  { %3859 = vmatpush3.msra.mxu0 %v5372_v40 }
 0xd82   :  { %3860 = vmatprep.subr.mxu0 %v4823_v0 }
 0xd83   :  { %3861 = vmatpush3.msra.mxu0 %v5376_v50 }
 0xd84   :  { %3862 = vmatprep.subr.mxu0 %v4823_v0 }
 0xd85   :  { %3863 = vmatpush3.msra.mxu0 %v5380_v52 }
 0xd86   :  { %3864 = vmatprep.subr.mxu0 %v4823_v0 }
 0xd87   :  { %3865 = vmatpush3.msra.mxu0 %v5384_v49 }
 0xd88   :  { %3866 = vmatprep.subr.mxu0 %v4823_v0 }
 0xd89   :  { %3867 = vmatpush3.msra.mxu0 %v5388_v55 }
 0xd8a   :  { %3868 = vmatprep.subr.mxu0 %v4823_v0 }
 0xd8b   :  { %3869 = vmatpush3.msra.mxu0 %v5392_v57 }
 0xd8c   :  { %3870 = vmatprep.subr.mxu0 %v4823_v0 }
 0xd8d   :  { %3871 = vmatpush3.msra.mxu0 %v5397_v59 }
 0xd8e   :  { %3872 = vmatprep.subr.mxu0 %v4823_v0 }
 0xd8f   :  { %3873 = vmatpush3.msra.mxu0 %v5401_v60 }
 0xd90   :  { %3875 = vmatmul.mubr.f32.vlgmr.msra.gmra.mxu0 %v4823_v0  ;;  %3912 = vmatprep.subr.mxu0 %v4823_v0 }
 0xd91   :  { %3913 = vmatpush3.msra.mxu0 %v5337_v44  ;;  %3944 = vmatprep.mubr.msk.f32.mxu0 %vm4825_vm0, %v4823_v0 }
 0xd92   :  { %3914 = vmatprep.subr.mxu0 %v4823_v0 }
 0xd93   :  { %3915 = vmatpush3.msra.mxu0 %v5341_v46 }
 0xd94   :  { %3916 = vmatprep.subr.mxu0 %v4823_v0 }
 0xd95   :  { %3917 = vmatpush3.msra.mxu0 %v5345_v6 }
 0xd96   :  { %3918 = vmatprep.subr.mxu0 %v4823_v0 }
 0xd97   :  { %3919 = vmatpush3.msra.mxu0 %v5351_v9 }
 0xd98   :  { %3920 = vmatprep.subr.mxu0 %v4823_v0 }
 0xd99   :  { %3921 = vmatpush3.msra.mxu0 %v5357_v30 }
 0xd9a   :  { %3922 = vmatprep.subr.mxu0 %v4823_v0 }
 0xd9b   :  { %3923 = vmatpush3.msra.mxu0 %v5361_v34 }
 0xd9c   :  { %3924 = vmatprep.subr.mxu0 %v4823_v0 }
 0xd9d   :  { %3925 = vmatpush3.msra.mxu0 %v5365_v36 }
 0xd9e   :  { %3926 = vmatprep.subr.mxu0 %v4823_v0 }
 0xd9f   :  { %3927 = vmatpush3.msra.mxu0 %v5369_v38 }
 0xda0   :  { %3928 = vmatprep.subr.mxu0 %v4823_v0 }
 0xda1   :  { %3929 = vmatpush3.msra.mxu0 %v5372_v40 }
 0xda2   :  { %3930 = vmatprep.subr.mxu0 %v4823_v0 }
 0xda3   :  { %3931 = vmatpush3.msra.mxu0 %v5376_v50 }
 0xda4   :  { %3932 = vmatprep.subr.mxu0 %v4823_v0 }
 0xda5   :  { %3933 = vmatpush3.msra.mxu0 %v5380_v52 }
 0xda6   :  { %3934 = vmatprep.subr.mxu0 %v4823_v0 }
 0xda7   :  { %3935 = vmatpush3.msra.mxu0 %v5384_v49 }
 0xda8   :  { %3936 = vmatprep.subr.mxu0 %v4823_v0 }
 0xda9   :  { %3937 = vmatpush3.msra.mxu0 %v5388_v55 }
 0xdaa   :  { %3938 = vmatprep.subr.mxu0 %v4823_v0 }
 0xdab   :  { %3939 = vmatpush3.msra.mxu0 %v5392_v57 }
 0xdac   :  { %3940 = vmatprep.subr.mxu0 %v4823_v0 }
 0xdad   :  { %3941 = vmatpush3.msra.mxu0 %v5397_v59 }
 0xdae   :  { %3942 = vmatprep.subr.mxu0 %v4823_v0 }
 0xdaf   :  { %3943 = vmatpush3.msra.mxu0 %v5401_v60 }
 0xdb0   :  { %3982 = vmatprep.subr.mxu0 %v4823_v0 }
 0xe30   :  { %v1019_v21 = vpop.f32.mrf.mxu0 }
 0xe31   :  { %v1023_v22 = vadd.f32 %v1019_v21, %v315_v20  ;;  %v1144_v20 = vcombine.low %v3057_v19, %v3057_v19 }
 0xe32   :  { %v3806_v23 = vpop.f32.mrf.mxu0 }
 0xe33   :  { %v3056_v24 = vmul.f32 -1.442695, %v1023_v22  ;;  %v1151_v21 = vrot.slane %v1144_v20, %v4946_v11 }
 0xe35   :  { %4510 = vpow2.f32 %v3056_v24 }
 0xe36   :  { %4512 = vtanh.f32 %v1023_v22  ;;  %v1152_v22 = vcombine.low %v1151_v21, %v1151_v21 }
 0xe42   :  { %v4511_v25 = vpop.eup %4510 }
 0xe43   :  { %v1028_v27 = vadd.f32 1.0, %v4511_v25  ;;  %v4513_v28 = vpop.eup %4512 }
 0xe45   :  { %4514 = vrcp.f32 %v1028_v27 }
 0xe52   :  { %v4515_v29 = vpop.eup %4514 }
 0xe53   :  { %v5333_v31 = vsel %vm5113_vm5, %v4513_v28, %v4515_v29 }
 0xe54   :  { %1032 = vrot.lane.b32.xlu0 %v5333_v31, %s4826_s3  ;;  %v1037_v61 = vmul.f32 %v5333_v31, %v5326_v17  ;;  %v1339_v17 = vpop.f32.mrf.mxu0 }
 0xe56   :  { %v3876_v18 = vpop.f32.mrf.mxu0 }
 0xec6   :  { %v5348_v8 = vpop.permute.xlu0 %1032 }
 0xec7   :  { %v1034_v15 = vmul.f32 %v5348_v8, %v5333_v31 }
 0xec9   :  { %1035 = vrot.lane.b32.xlu1 %v1034_v15, %s4827_s23 }
 0xf3b   :  { %v1036_v62 = vpop.permute.xlu1 %1035 }
 0xf3c   :  { %v5444_v63 = vadd.f32 %v1037_v61, %v1036_v62 }
 0xf3e   :  { %4516 = vtanh.f32 %v5444_v63 }
 0xf4b   :  { %v4517_v1 = vpop.eup %4516 }
 0xf4c   :  { %v5448_v2 = vmul.f32 %v4517_v1, %v5348_v8 }
 0xf4e   :  { %1042 = vst [vmem:[#allocation2 + $0xe] sm:$0x3] %v5448_v2 }
 0xf55   :  { %v1094_v12 = vld [vmem:[#allocation2 + $0xe] sm:$0x3] }
 0xf56   :  { %v1126_v13 = vcombine.low %v1093_v10, %v1094_v12 }
 0xf58   :  { %v1140_v14 = vrot.slane %v1126_v13, %v4946_v11 }
 0xf5a   :  { %v1141_v16 = vcombine.low %v1133_v47, %v1140_v14 }
 0xf5c   :  { %3840 = vmatmul.mubr.f32.vlgmr.msra.gmra.mxu1 %v1141_v16 }
 0xf5d   :  { %3878 = vmatpush3.msra.mxu1 %v5337_v44  ;;  %3909 = vmatprep.mubr.msk.f32.mxu1 %vm4825_vm0, %v4823_v0 }
 0xf5e   :  { %3879 = vmatprep.subr.mxu1 %v4823_v0 }
 0xf5f   :  { %3880 = vmatpush3.msra.mxu1 %v5341_v46 }
 0xf60   :  { %3881 = vmatprep.subr.mxu1 %v4823_v0 }
 0xf61   :  { %3882 = vmatpush3.msra.mxu1 %v5345_v6 }
 0xf62   :  { %3883 = vmatprep.subr.mxu1 %v4823_v0 }
 0xf63   :  { %3884 = vmatpush3.msra.mxu1 %v5351_v9 }
 0xf64   :  { %3885 = vmatprep.subr.mxu1 %v4823_v0 }
 0xf65   :  { %3886 = vmatpush3.msra.mxu1 %v5357_v30 }
 0xf66   :  { %3887 = vmatprep.subr.mxu1 %v4823_v0 }
 0xf67   :  { %3888 = vmatpush3.msra.mxu1 %v5361_v34 }
 0xf68   :  { %3889 = vmatprep.subr.mxu1 %v4823_v0 }
 0xf69   :  { %3890 = vmatpush3.msra.mxu1 %v5365_v36 }
 0xf6a   :  { %3891 = vmatprep.subr.mxu1 %v4823_v0 }
 0xf6b   :  { %3892 = vmatpush3.msra.mxu1 %v5369_v38 }
 0xf6c   :  { %3893 = vmatprep.subr.mxu1 %v4823_v0 }
 0xf6d   :  { %3894 = vmatpush3.msra.mxu1 %v5372_v40 }
 0xf6e   :  { %3895 = vmatprep.subr.mxu1 %v4823_v0 }
 0xf6f   :  { %3896 = vmatpush3.msra.mxu1 %v5376_v50 }
 0xf70   :  { %3897 = vmatprep.subr.mxu1 %v4823_v0 }
 0xf71   :  { %3898 = vmatpush3.msra.mxu1 %v5380_v52 }
 0xf72   :  { %3899 = vmatprep.subr.mxu1 %v4823_v0 }
 0xf73   :  { %3900 = vmatpush3.msra.mxu1 %v5384_v49 }
 0xf74   :  { %3901 = vmatprep.subr.mxu1 %v4823_v0 }
 0xf75   :  { %3902 = vmatpush3.msra.mxu1 %v5388_v55 }
 0xf76   :  { %3903 = vmatprep.subr.mxu1 %v4823_v0 }
 0xf77   :  { %3904 = vmatpush3.msra.mxu1 %v5392_v57 }
 0xf78   :  { %3905 = vmatprep.subr.mxu1 %v4823_v0 }
 0xf79   :  { %3906 = vmatpush3.msra.mxu1 %v5397_v59 }
 0xf7a   :  { %3907 = vmatprep.subr.mxu1 %v4823_v0 }
 0xf7b   :  { %3908 = vmatpush3.msra.mxu1 %v5401_v60 }
 0xf7c   :  { %3947 = vmatprep.subr.mxu1 %v4823_v0 }
0x101c   :  { %v3841_v23 = vpop.f32.mrf.mxu1 }
0x101d   :  { %v5491_v24 = vadd.f32 %v3841_v23, %v1152_v22 }
0x101e   :  { %v1220_v25 = vpop.f32.mrf.mxu1 }
0x101f   :  { %v5493_v27 = vadd.f32 %v1220_v25, %v1152_v22 }
0x1021   :  { %v1238_v28 = vrot.slane %v5493_v27, %v4946_v11  ;;  %v1231_v16 = vcombine.high %v5493_v27, %v5493_v27 }
0x1023   :  { %v1343_v29 = vadd.f32 %v1339_v17, %v1238_v28  ;;  %v1246_v39 = vcombine.high %v1238_v28, %v1238_v28  ;;  %v1245_v17 = vrot.slane %v1231_v16, %v4946_v11 }
0x1025   :  { %v3058_v31 = vmul.f32 -1.442695, %v1343_v29 }
0x1027   :  { %4518 = vpow2.f32 %v3058_v31 }
0x1028   :  { %4520 = vtanh.f32 %v1343_v29 }
0x1034   :  { %v4519_v32 = vpop.eup %4518 }
0x1035   :  { %v1348_v42 = vadd.f32 1.0, %v4519_v32  ;;  %v4521_v43 = vpop.eup %4520 }
0x1037   :  { %4522 = vrcp.f32 %v1348_v42 }
0x1044   :  { %v4523_v45 = vpop.eup %4522 }
0x1045   :  { %v1351_v48 = vsel %vm5113_vm5, %v4521_v43, %v4523_v45 }
0x1046   :  { %1352 = vrot.lane.b32.xlu0 %v1351_v48, %s4826_s3  ;;  %v1357_v15 = vmul.f32 0.0, %v1351_v48 }
0x10b8   :  { %v1353_v7 = vpop.permute.xlu0 %1352 }
0x10b9   :  { %v1354_v8 = vmul.f32 %v1353_v7, %v1351_v48 }
0x10bb   :  { %1355 = vrot.lane.b32.xlu1 %v1354_v8, %s4827_s23 }
0x112d   :  { %v1356_v26 = vpop.permute.xlu1 %1355 }
0x112e   :  { %v1358_v33 = vadd.f32 %v1357_v15, %v1356_v26 }
0x1130   :  { %4524 = vtanh.f32 %v1358_v33 }
0x113d   :  { %v4525_v35 = vpop.eup %4524 }
0x113e   :  { %v1360_v37 = vmul.f32 %v4525_v35, %v1353_v7  ;;  %v1247_v7 = vcombine.high %v1245_v17, %v1245_v17 }
0x1140   :  { %1361 = vst [vmem:[#allocation3] sm:$0x3] %v1360_v37  ;;  %3910 = vmatmul.mubr.f32.vlgmr.msra.gmra.mxu1 %v1360_v37 }
0x1141   :  { %3948 = vmatpush3.msra.mxu1 %v5337_v44  ;;  %3979 = vmatprep.mubr.msk.f32.mxu1 %vm4825_vm0, %v4823_v0 }
0x1142   :  { %3949 = vmatprep.subr.mxu1 %v4823_v0 }
0x1143   :  { %3950 = vmatpush3.msra.mxu1 %v5341_v46 }
0x1144   :  { %3951 = vmatprep.subr.mxu1 %v4823_v0 }
0x1145   :  { %3952 = vmatpush3.msra.mxu1 %v5345_v6 }
0x1146   :  { %3953 = vmatprep.subr.mxu1 %v4823_v0 }
0x1147   :  { %3954 = vmatpush3.msra.mxu1 %v5351_v9 }
0x1148   :  { %3955 = vmatprep.subr.mxu1 %v4823_v0 }
0x1149   :  { %3956 = vmatpush3.msra.mxu1 %v5357_v30 }
0x114a   :  { %3957 = vmatprep.subr.mxu1 %v4823_v0 }
0x114b   :  { %3958 = vmatpush3.msra.mxu1 %v5361_v34 }
0x114c   :  { %3959 = vmatprep.subr.mxu1 %v4823_v0 }
0x114d   :  { %3960 = vmatpush3.msra.mxu1 %v5365_v36 }
0x114e   :  { %3961 = vmatprep.subr.mxu1 %v4823_v0 }
0x114f   :  { %3962 = vmatpush3.msra.mxu1 %v5369_v38 }
0x1150   :  { %3963 = vmatprep.subr.mxu1 %v4823_v0 }
0x1151   :  { %3964 = vmatpush3.msra.mxu1 %v5372_v40 }
0x1152   :  { %3965 = vmatprep.subr.mxu1 %v4823_v0 }
0x1153   :  { %3966 = vmatpush3.msra.mxu1 %v5376_v50 }
0x1154   :  { %3967 = vmatprep.subr.mxu1 %v4823_v0 }
0x1155   :  { %3968 = vmatpush3.msra.mxu1 %v5380_v52 }
0x1156   :  { %3969 = vmatprep.subr.mxu1 %v4823_v0 }
0x1157   :  { %3970 = vmatpush3.msra.mxu1 %v5384_v49 }
0x1158   :  { %3971 = vmatprep.subr.mxu1 %v4823_v0 }
0x1159   :  { %3972 = vmatpush3.msra.mxu1 %v5388_v55 }
0x115a   :  { %3973 = vmatprep.subr.mxu1 %v4823_v0 }
0x115b   :  { %3974 = vmatpush3.msra.mxu1 %v5392_v57 }
0x115c   :  { %3975 = vmatprep.subr.mxu1 %v4823_v0 }
0x115d   :  { %3976 = vmatpush3.msra.mxu1 %v5397_v59 }
0x115e   :  { %3977 = vmatprep.subr.mxu1 %v4823_v0 }
0x115f   :  { %3978 = vmatpush3.msra.mxu1 %v5401_v60 }
0x1160   :  { %4017 = vmatprep.subr.mxu1 %v4823_v0 }
0x1200   :  { %v1428_v41 = vpop.f32.mrf.mxu1 }
0x1201   :  { %v1432_v51 = vadd.f32 %v1428_v41, %v1246_v39 }
0x1202   :  { %v3911_v53 = vpop.f32.mrf.mxu1 }
0x1203   :  { %v3059_v54 = vmul.f32 -1.442695, %v1432_v51 }
0x1205   :  { %4526 = vpow2.f32 %v3059_v54 }
0x1206   :  { %4528 = vtanh.f32 %v1432_v51 }
0x1212   :  { %v4527_v56 = vpop.eup %4526 }
0x1213   :  { %v1437_v61 = vadd.f32 1.0, %v4527_v56  ;;  %v4529_v62 = vpop.eup %4528 }
0x1215   :  { %4530 = vrcp.f32 %v1437_v61 }
0x1222   :  { %v4531_v1 = vpop.eup %4530 }
0x1223   :  { %v1440_v3 = vsel %vm5113_vm5, %v4529_v62, %v4531_v1 }
0x1224   :  { %1441 = vrot.lane.b32.xlu0 %v1440_v3, %s4826_s3  ;;  %v1446_v10 = vmul.f32 %v1440_v3, %v1358_v33 }
0x1296   :  { %v1442_v4 = vpop.permute.xlu0 %1441 }
0x1297   :  { %v1443_v5 = vmul.f32 %v1442_v4, %v1440_v3 }
0x1299   :  { %1444 = vrot.lane.b32.xlu1 %v1443_v5, %s4827_s23 }
0x130b   :  { %v1445_v12 = vpop.permute.xlu1 %1444 }
0x130c   :  { %v1447_v13 = vadd.f32 %v1446_v10, %v1445_v12 }
0x130e   :  { %4532 = vtanh.f32 %v1447_v13 }
0x131b   :  { %v4533_v47 = vpop.eup %4532 }
0x131c   :  { %v1449_v14 = vmul.f32 %v4533_v47, %v1442_v4  ;;  %v1255_v4 = vrot.slane %v5491_v24, %v4946_v11 }
0x131e   :  { %1451 = vst [vmem:[#allocation3 + $0x2] sm:$0x3] %v1449_v14  ;;  %3945 = vmatmul.mubr.f32.vlgmr.msra.gmra.mxu0 %v1449_v14 }
0x131f   :  { %3983 = vmatpush3.msra.mxu0 %v5337_v44  ;;  %4014 = vmatprep.mubr.msk.f32.mxu0 %vm4825_vm0, %v4823_v0 }
0x1320   :  { %3984 = vmatprep.subr.mxu0 %v4823_v0 }
0x1321   :  { %3985 = vmatpush3.msra.mxu0 %v5341_v46 }
0x1322   :  { %3986 = vmatprep.subr.mxu0 %v4823_v0 }
0x1323   :  { %3987 = vmatpush3.msra.mxu0 %v5345_v6 }
0x1324   :  { %3988 = vmatprep.subr.mxu0 %v4823_v0 }
0x1325   :  { %3989 = vmatpush3.msra.mxu0 %v5351_v9 }
0x1326   :  { %3990 = vmatprep.subr.mxu0 %v4823_v0 }
0x1327   :  { %3991 = vmatpush3.msra.mxu0 %v5357_v30 }
0x1328   :  { %3992 = vmatprep.subr.mxu0 %v4823_v0 }
0x1329   :  { %3993 = vmatpush3.msra.mxu0 %v5361_v34 }
0x132a   :  { %3994 = vmatprep.subr.mxu0 %v4823_v0 }
0x132b   :  { %3995 = vmatpush3.msra.mxu0 %v5365_v36 }
0x132c   :  { %3996 = vmatprep.subr.mxu0 %v4823_v0 }
0x132d   :  { %3997 = vmatpush3.msra.mxu0 %v5369_v38 }
0x132e   :  { %3998 = vmatprep.subr.mxu0 %v4823_v0 }
0x132f   :  { %3999 = vmatpush3.msra.mxu0 %v5372_v40 }
0x1330   :  { %4000 = vmatprep.subr.mxu0 %v4823_v0 }
0x1331   :  { %4001 = vmatpush3.msra.mxu0 %v5376_v50 }
0x1332   :  { %4002 = vmatprep.subr.mxu0 %v4823_v0 }
0x1333   :  { %4003 = vmatpush3.msra.mxu0 %v5380_v52 }
0x1334   :  { %4004 = vmatprep.subr.mxu0 %v4823_v0 }
0x1335   :  { %4005 = vmatpush3.msra.mxu0 %v5384_v49 }
0x1336   :  { %4006 = vmatprep.subr.mxu0 %v4823_v0 }
0x1337   :  { %4007 = vmatpush3.msra.mxu0 %v5388_v55 }
0x1338   :  { %4008 = vmatprep.subr.mxu0 %v4823_v0 }
0x1339   :  { %4009 = vmatpush3.msra.mxu0 %v5392_v57 }
0x133a   :  { %4010 = vmatprep.subr.mxu0 %v4823_v0 }
0x133b   :  { %4011 = vmatpush3.msra.mxu0 %v5397_v59 }
0x133c   :  { %4012 = vmatprep.subr.mxu0 %v4823_v0 }
0x133d   :  { %4013 = vmatpush3.msra.mxu0 %v5401_v60 }
0x133e   :  { %4052 = vmatprep.subr.mxu0 %v4823_v0 }
0x13de   :  { %v1518_v18 = vpop.f32.mrf.mxu0 }
0x13df   :  { %v1522_v19 = vadd.f32 %v1518_v18, %v1245_v17 }
0x13e0   :  { %v3946_v20 = vpop.f32.mrf.mxu0 }
0x13e1   :  { %v3060_v21 = vmul.f32 -1.442695, %v1522_v19 }
0x13e3   :  { %4534 = vpow2.f32 %v3060_v21 }
0x13e4   :  { %4536 = vtanh.f32 %v1522_v19 }
0x13f0   :  { %v4535_v22 = vpop.eup %4534 }
0x13f1   :  { %v1527_v23 = vadd.f32 1.0, %v4535_v22  ;;  %v4537_v25 = vpop.eup %4536 }
0x13f3   :  { %4538 = vrcp.f32 %v1527_v23 }
0x1400   :  { %v4539_v28 = vpop.eup %4538 }
0x1401   :  { %v1530_v29 = vsel %vm5113_vm5, %v4537_v25, %v4539_v28 }
0x1402   :  { %1531 = vrot.lane.b32.xlu0 %v1530_v29, %s4826_s3  ;;  %v1536_v32 = vmul.f32 %v1530_v29, %v1447_v13 }
0x1474   :  { %v1532_v31 = vpop.permute.xlu0 %1531 }
0x1475   :  { %v1533_v27 = vmul.f32 %v1532_v31, %v1530_v29  ;;  %v2038_v29 = vld [vmem:[#allocation3 + $0x2] sm:$0x3] }
0x1477   :  { %1534 = vrot.lane.b32.xlu1 %v1533_v27, %s4827_s23 }
0x14e9   :  { %v1535_v42 = vpop.permute.xlu1 %1534 }
0x14ea   :  { %v1537_v43 = vadd.f32 %v1536_v32, %v1535_v42  ;;  %v2037_v32 = vld [vmem:[#allocation3] sm:$0x3] }
0x14eb   :  { %v2058_v42 = vcombine.low %v2037_v32, %v2038_v29  ;;  %v5750_v29 = vld [vmem:[#allocation12 + $0x38] sm:$0xff] }
0x14ec   :  { %4540 = vtanh.f32 %v1537_v43  ;;  %v2007_v32 = vld [vmem:[#allocation10 + $0x18] sm:$0xff] }
0x14f9   :  { %v4541_v45 = vpop.eup %4540 }
0x14fa   :  { %v1539_v48 = vmul.f32 %v4541_v45, %v1532_v31 }
0x14fc   :  { %1541 = vst [vmem:[#allocation3 + $0x4] sm:$0x3] %v1539_v48  ;;  %3980 = vmatmul.mubr.f32.vlgmr.msra.gmra.mxu1 %v1539_v48  ;;  %v2066_v48 = vrot.slane %v2058_v42, %v4946_v11  ;;  %v5758_v42 = vld [vmem:[#allocation12 + $0x28] sm:$0xff] }
0x14fd   :  { %4018 = vmatpush3.msra.mxu1 %v5337_v44  ;;  %4049 = vmatprep.mubr.msk.f32.mxu1 %vm4825_vm0, %v4823_v0 }
0x14fe   :  { %4019 = vmatprep.subr.mxu1 %v4823_v0 }
0x14ff   :  { %4020 = vmatpush3.msra.mxu1 %v5341_v46 }
0x1500   :  { %4021 = vmatprep.subr.mxu1 %v4823_v0 }
0x1501   :  { %4022 = vmatpush3.msra.mxu1 %v5345_v6 }
0x1502   :  { %4023 = vmatprep.subr.mxu1 %v4823_v0 }
0x1503   :  { %4024 = vmatpush3.msra.mxu1 %v5351_v9  ;;  %v2039_v31 = vld [vmem:[#allocation3 + $0x4] sm:$0x3] }
0x1504   :  { %4025 = vmatprep.subr.mxu1 %v4823_v0 }
0x1505   :  { %4026 = vmatpush3.msra.mxu1 %v5357_v30 }
0x1506   :  { %4027 = vmatprep.subr.mxu1 %v4823_v0 }
0x1507   :  { %4028 = vmatpush3.msra.mxu1 %v5361_v34 }
0x1508   :  { %4029 = vmatprep.subr.mxu1 %v4823_v0 }
0x1509   :  { %4030 = vmatpush3.msra.mxu1 %v5365_v36 }
0x150a   :  { %4031 = vmatprep.subr.mxu1 %v4823_v0 }
0x150b   :  { %4032 = vmatpush3.msra.mxu1 %v5369_v38 }
0x150c   :  { %4033 = vmatprep.subr.mxu1 %v4823_v0 }
0x150d   :  { %4034 = vmatpush3.msra.mxu1 %v5372_v40 }
0x150e   :  { %4035 = vmatprep.subr.mxu1 %v4823_v0 }
0x150f   :  { %4036 = vmatpush3.msra.mxu1 %v5376_v50 }
0x1510   :  { %4037 = vmatprep.subr.mxu1 %v4823_v0 }
0x1511   :  { %4038 = vmatpush3.msra.mxu1 %v5380_v52 }
0x1512   :  { %4039 = vmatprep.subr.mxu1 %v4823_v0 }
0x1513   :  { %4040 = vmatpush3.msra.mxu1 %v5384_v49 }
0x1514   :  { %4041 = vmatprep.subr.mxu1 %v4823_v0 }
0x1515   :  { %4042 = vmatpush3.msra.mxu1 %v5388_v55 }
0x1516   :  { %4043 = vmatprep.subr.mxu1 %v4823_v0 }
0x1517   :  { %4044 = vmatpush3.msra.mxu1 %v5392_v57 }
0x1518   :  { %4045 = vmatprep.subr.mxu1 %v4823_v0 }
0x1519   :  { %4046 = vmatpush3.msra.mxu1 %v5397_v59 }
0x151a   :  { %4047 = vmatprep.subr.mxu1 %v4823_v0 }
0x151b   :  { %4048 = vmatpush3.msra.mxu1 %v5401_v60 }
0x151c   :  { %4087 = vmatprep.subr.mxu1 %v4823_v0 }
0x15bc   :  { %v1608_v8 = vpop.f32.mrf.mxu1 }
0x15bd   :  { %v1612_v15 = vadd.f32 %v1608_v8, %v1247_v7 }
0x15be   :  { %v3981_v26 = vpop.f32.mrf.mxu1 }
0x15bf   :  { %v3061_v33 = vmul.f32 -1.442695, %v1612_v15 }
0x15c1   :  { %4542 = vpow2.f32 %v3061_v33 }
0x15c2   :  { %4544 = vtanh.f32 %v1612_v15  ;;  %v1248_v15 = vcombine.high %v5491_v24, %v5491_v24 }
0x15c4   :  { %v1262_v26 = vrot.slane %v1248_v15, %v4946_v11  ;;  %v5770_v15 = vld [vmem:[#allocation12 + $0x10] sm:$0xff] }
0x15ce   :  { %v4543_v35 = vpop.eup %4542 }
0x15cf   :  { %v1617_v37 = vadd.f32 1.0, %v4543_v35  ;;  %v4545_v39 = vpop.eup %4544 }
0x15d1   :  { %4546 = vrcp.f32 %v1617_v37 }
0x15de   :  { %v4547_v41 = vpop.eup %4546 }
0x15df   :  { %v1620_v51 = vsel %vm5113_vm5, %v4545_v39, %v4547_v41 }
0x15e0   :  { %1621 = vrot.lane.b32.xlu0 %v1620_v51, %s4826_s3  ;;  %v1626_v56 = vmul.f32 %v1620_v51, %v1537_v43 }
0x1652   :  { %v1622_v53 = vpop.permute.xlu0 %1621 }
0x1653   :  { %v1623_v54 = vmul.f32 %v1622_v53, %v1620_v51 }
0x1655   :  { %1624 = vrot.lane.b32.xlu1 %v1623_v54, %s4827_s23 }
0x16c7   :  { %v1625_v61 = vpop.permute.xlu1 %1624 }
0x16c8   :  { %v1627_v62 = vadd.f32 %v1626_v56, %v1625_v61 }
0x16ca   :  { %4548 = vtanh.f32 %v1627_v62 }
0x16d7   :  { %v4549_v1 = vpop.eup %4548 }
0x16d8   :  { %v1629_v3 = vmul.f32 %v4549_v1, %v1622_v53 }
0x16da   :  { %1631 = vst [vmem:[#allocation3 + $0x6] sm:$0x3] %v1629_v3  ;;  %4015 = vmatmul.mubr.f32.vlgmr.msra.gmra.mxu0 %v1629_v3 }
0x16db   :  { %4053 = vmatpush3.msra.mxu0 %v5337_v44  ;;  %4084 = vmatprep.mubr.msk.f32.mxu0 %vm4825_vm0, %v4823_v0 }
0x16dc   :  { %4054 = vmatprep.subr.mxu0 %v4823_v0 }
0x16dd   :  { %4055 = vmatpush3.msra.mxu0 %v5341_v46 }
0x16de   :  { %4056 = vmatprep.subr.mxu0 %v4823_v0 }
0x16df   :  { %4057 = vmatpush3.msra.mxu0 %v5345_v6 }
0x16e0   :  { %4058 = vmatprep.subr.mxu0 %v4823_v0 }
0x16e1   :  { %4059 = vmatpush3.msra.mxu0 %v5351_v9 }
0x16e2   :  { %4060 = vmatprep.subr.mxu0 %v4823_v0 }
0x16e3   :  { %4061 = vmatpush3.msra.mxu0 %v5357_v30 }
0x16e4   :  { %4062 = vmatprep.subr.mxu0 %v4823_v0 }
0x16e5   :  { %4063 = vmatpush3.msra.mxu0 %v5361_v34 }
0x16e6   :  { %4064 = vmatprep.subr.mxu0 %v4823_v0 }
0x16e7   :  { %4065 = vmatpush3.msra.mxu0 %v5365_v36 }
0x16e8   :  { %4066 = vmatprep.subr.mxu0 %v4823_v0 }
0x16e9   :  { %4067 = vmatpush3.msra.mxu0 %v5369_v38 }
0x16ea   :  { %4068 = vmatprep.subr.mxu0 %v4823_v0 }
0x16eb   :  { %4069 = vmatpush3.msra.mxu0 %v5372_v40 }
0x16ec   :  { %4070 = vmatprep.subr.mxu0 %v4823_v0 }
0x16ed   :  { %4071 = vmatpush3.msra.mxu0 %v5376_v50 }
0x16ee   :  { %4072 = vmatprep.subr.mxu0 %v4823_v0 }
0x16ef   :  { %4073 = vmatpush3.msra.mxu0 %v5380_v52 }
0x16f0   :  { %4074 = vmatprep.subr.mxu0 %v4823_v0 }
0x16f1   :  { %4075 = vmatpush3.msra.mxu0 %v5384_v49 }
0x16f2   :  { %4076 = vmatprep.subr.mxu0 %v4823_v0 }
0x16f3   :  { %4077 = vmatpush3.msra.mxu0 %v5388_v55 }
0x16f4   :  { %4078 = vmatprep.subr.mxu0 %v4823_v0 }
0x16f5   :  { %4079 = vmatpush3.msra.mxu0 %v5392_v57 }
0x16f6   :  { %4080 = vmatprep.subr.mxu0 %v4823_v0 }
0x16f7   :  { %4081 = vmatpush3.msra.mxu0 %v5397_v59 }
0x16f8   :  { %4082 = vmatprep.subr.mxu0 %v4823_v0 }
0x16f9   :  { %4083 = vmatpush3.msra.mxu0 %v5401_v60 }
0x179a   :  { %v1698_v5 = vpop.f32.mrf.mxu0 }
0x179b   :  { %v1702_v10 = vadd.f32 %v1698_v5, %v1255_v4 }
0x179c   :  { %v4016_v12 = vpop.f32.mrf.mxu0 }
0x179d   :  { %v3062_v13 = vmul.f32 -1.442695, %v1702_v10 }
0x179f   :  { %4550 = vpow2.f32 %v3062_v13 }
0x17a0   :  { %4552 = vtanh.f32 %v1702_v10  ;;  %v1264_v10 = vcombine.high %v1262_v26, %v1262_v26 }
0x17ac   :  { %v4551_v47 = vpop.eup %4550 }
0x17ad   :  { %v1707_v14 = vadd.f32 1.0, %v4551_v47  ;;  %v4553_v16 = vpop.eup %4552 }
0x17af   :  { %4554 = vrcp.f32 %v1707_v14 }
0x17bc   :  { %v4555_v17 = vpop.eup %4554 }
0x17bd   :  { %v1710_v18 = vsel %vm5113_vm5, %v4553_v16, %v4555_v17 }
0x17be   :  { %1711 = vrot.lane.b32.xlu0 %v1710_v18, %s4826_s3  ;;  %v1716_v21 = vmul.f32 %v1710_v18, %v1627_v62 }
0x1830   :  { %v1712_v19 = vpop.permute.xlu0 %1711 }
0x1831   :  { %v1713_v20 = vmul.f32 %v1712_v19, %v1710_v18 }
0x1833   :  { %1714 = vrot.lane.b32.xlu1 %v1713_v20, %s4827_s23 }
0x18a5   :  { %v1715_v22 = vpop.permute.xlu1 %1714 }
0x18a6   :  { %v1717_v23 = vadd.f32 %v1716_v21, %v1715_v22  ;;  %v2019_v21 = vld [vmem:[#allocation10 + $0x78] sm:$0xff]  ;;  %v2018_v22 = vld [vmem:[#allocation10 + $0x70] sm:$0xff] }
0x18a7   :  { %4122 = vmatprep.subr.mxu0 %v2019_v21 }
0x18a8   :  { %4556 = vtanh.f32 %v1717_v23 }
0x18b5   :  { %v4557_v25 = vpop.eup %4556 }
0x18b6   :  { %v1719_v28 = vmul.f32 %v4557_v25, %v1712_v19  ;;  %v5715_v25 = vld [vmem:[#allocation12 + $0x78] sm:$0xff] }
0x18b8   :  { %1721 = vst [vmem:[#allocation3 + $0x8] sm:$0x3] %v1719_v28  ;;  %4050 = vmatmul.mubr.f32.vlgmr.msra.gmra.mxu1 %v1719_v28  ;;  %v2016_v28 = vld [vmem:[#allocation10 + $0x60] sm:$0xff] }
0x18b9   :  { %4088 = vmatpush3.msra.mxu1 %v5337_v44  ;;  %4119 = vmatprep.mubr.msk.f32.mxu1 %vm4825_vm0, %v4823_v0  ;;  %v1263_v44 = vcombine.high %v1255_v4, %v1255_v4 }
0x18ba   :  { %4089 = vmatprep.subr.mxu1 %v4823_v0 }
0x18bb   :  { %4090 = vmatpush3.msra.mxu1 %v5341_v46 }
0x18bc   :  { %4091 = vmatprep.subr.mxu1 %v4823_v0 }
0x18bd   :  { %4092 = vmatpush3.msra.mxu1 %v5345_v6 }
0x18be   :  { %4093 = vmatprep.subr.mxu1 %v4823_v0 }
0x18bf   :  { %4094 = vmatpush3.msra.mxu1 %v5351_v9 }
0x18c0   :  { %4095 = vmatprep.subr.mxu1 %v4823_v0 }
0x18c1   :  { %4096 = vmatpush3.msra.mxu1 %v5357_v30 }
0x18c2   :  { %4097 = vmatprep.subr.mxu1 %v4823_v0 }
0x18c3   :  { %4098 = vmatpush3.msra.mxu1 %v5361_v34 }
0x18c4   :  { %4099 = vmatprep.subr.mxu1 %v4823_v0 }
0x18c5   :  { %4100 = vmatpush3.msra.mxu1 %v5365_v36 }
0x18c6   :  { %4101 = vmatprep.subr.mxu1 %v4823_v0 }
0x18c7   :  { %4102 = vmatpush3.msra.mxu1 %v5369_v38 }
0x18c8   :  { %4103 = vmatprep.subr.mxu1 %v4823_v0 }
0x18c9   :  { %4104 = vmatpush3.msra.mxu1 %v5372_v40 }
0x18ca   :  { %4105 = vmatprep.subr.mxu1 %v4823_v0 }
0x18cb   :  { %4106 = vmatpush3.msra.mxu1 %v5376_v50 }
0x18cc   :  { %4107 = vmatprep.subr.mxu1 %v4823_v0 }
0x18cd   :  { %4108 = vmatpush3.msra.mxu1 %v5380_v52 }
0x18ce   :  { %4109 = vmatprep.subr.mxu1 %v4823_v0 }
0x18cf   :  { %4110 = vmatpush3.msra.mxu1 %v5384_v49 }
0x18d0   :  { %4111 = vmatprep.subr.mxu1 %v4823_v0 }
0x18d1   :  { %4112 = vmatpush3.msra.mxu1 %v5388_v55 }
0x18d2   :  { %4113 = vmatprep.subr.mxu1 %v4823_v0 }
0x18d3   :  { %4114 = vmatpush3.msra.mxu1 %v5392_v57 }
0x18d4   :  { %4115 = vmatprep.subr.mxu1 %v4823_v0 }
0x18d5   :  { %4116 = vmatpush3.msra.mxu1 %v5397_v59 }
0x18d6   :  { %4117 = vmatprep.subr.mxu1 %v4823_v0 }
0x18d7   :  { %4118 = vmatpush3.msra.mxu1 %v5401_v60  ;;  %v2040_v60 = vld [vmem:[#allocation3 + $0x6] sm:$0x3] }
0x18d8   :  { %4157 = vmatprep.subr.mxu1 %v4823_v0  ;;  %v2059_v27 = vcombine.low %v2039_v31, %v2040_v60  ;;  %v2009_v60 = vld [vmem:[#allocation10 + $0x28] sm:$0xff]  ;;  %v2008_v31 = vld [vmem:[#allocation10 + $0x20] sm:$0xff] }
0x18da   :  { %v2073_v43 = vrot.slane %v2059_v27, %v4946_v11  ;;  %v5754_v27 = vld [vmem:[#allocation12 + $0x30] sm:$0xff] }
0x18dc   :  { %v2074_v8 = vcombine.low %v2066_v48, %v2073_v43  ;;  %v2006_v43 = vld [vmem:[#allocation10 + $0x10] sm:$0xff]  ;;  %v2005_v48 = vld [vmem:[#allocation10 + $0x8] sm:$0xff] }
0x1978   :  { %v1788_v46 = vpop.f32.mrf.mxu1 }
0x1979   :  { %v1792_v6 = vadd.f32 %v1788_v46, %v1263_v44  ;;  %v5719_v44 = vld [vmem:[#allocation12 + $0x70] sm:$0xff]  ;;  %v2015_v46 = vld [vmem:[#allocation10 + $0x58] sm:$0xff] }
0x197a   :  { %v4051_v9 = vpop.f32.mrf.mxu1 }
0x197b   :  { %v3063_v30 = vmul.f32 -1.442695, %v1792_v6  ;;  %v2014_v9 = vld [vmem:[#allocation10 + $0x50] sm:$0xff] }
0x197d   :  { %4558 = vpow2.f32 %v3063_v30 }
0x197e   :  { %4560 = vtanh.f32 %v1792_v6  ;;  %v5723_v6 = vld [vmem:[#allocation12 + $0x68] sm:$0xff] }
0x198a   :  { %v4559_v34 = vpop.eup %4558 }
0x198b   :  { %v1797_v36 = vadd.f32 1.0, %v4559_v34  ;;  %v4561_v38 = vpop.eup %4560  ;;  %v5729_v34 = vld [vmem:[#allocation12 + $0x60] sm:$0xff] }
0x198d   :  { %4562 = vrcp.f32 %v1797_v36 }
0x199a   :  { %v4563_v40 = vpop.eup %4562 }
0x199b   :  { %v1800_v50 = vsel %vm5113_vm5, %v4561_v38, %v4563_v40  ;;  %v2013_v38 = vld [vmem:[#allocation10 + $0x48] sm:$0xff]  ;;  %v5735_v40 = vld [vmem:[#allocation12 + $0x58] sm:$0xff] }
0x199c   :  { %1801 = vrot.lane.b32.xlu0 %v1800_v50, %s4826_s3  ;;  %v1806_v55 = vmul.f32 %v1800_v50, %v1717_v23  ;;  %v2017_v23 = vld [vmem:[#allocation10 + $0x68] sm:$0xff] }
0x1a0e   :  { %v1802_v52 = vpop.permute.xlu0 %1801 }
0x1a0f   :  { %v1803_v49 = vmul.f32 %v1802_v52, %v1800_v50  ;;  %v2012_v50 = vld [vmem:[#allocation10 + $0x40] sm:$0xff] }
0x1a11   :  { %1804 = vrot.lane.b32.xlu1 %v1803_v49, %s4827_s23  ;;  %v2011_v49 = vld [vmem:[#allocation10 + $0x38] sm:$0xff] }
0x1a83   :  { %v1805_v57 = vpop.permute.xlu1 %1804 }
0x1a84   :  { %v1807_v59 = vadd.f32 %v1806_v55, %v1805_v57  ;;  %v5743_v55 = vld [vmem:[#allocation12 + $0x48] sm:$0xff]  ;;  %v2010_v57 = vld [vmem:[#allocation10 + $0x30] sm:$0xff] }
0x1a86   :  { %4564 = vtanh.f32 %v1807_v59 }
0x1a93   :  { %v4565_v45 = vpop.eup %4564 }
0x1a94   :  { %v1809_v7 = vmul.f32 %v4565_v45, %v1802_v52  ;;  %v5739_v52 = vld [vmem:[#allocation12 + $0x50] sm:$0xff]  ;;  %v5762_v45 = vld [vmem:[#allocation12 + $0x20] sm:$0xff] }
0x1a96   :  { %1811 = vst [vmem:[#allocation3 + $0xa] sm:$0x3] %v1809_v7  ;;  %4085 = vmatmul.mubr.f32.vlgmr.msra.gmra.mxu0 %v1809_v7  ;;  %v5766_v7 = vld [vmem:[#allocation12 + $0x18] sm:$0xff] }
0x1a97   :  { %4154 = vmatprep.mubr.f32.mxu0 %v2074_v8  ;;  %4123 = vmatpush3.msra.mxu0 %v2019_v21  ;;  %v2004_v8 = vld [vmem:[#allocation10] sm:$0xff] }
0x1a98   :  { %4124 = vmatprep.subr.mxu0 %v2018_v22 }
0x1a99   :  { %4125 = vmatpush3.msra.mxu0 %v2018_v22 }
0x1a9a   :  { %4126 = vmatprep.subr.mxu0 %v2017_v23 }
0x1a9b   :  { %4127 = vmatpush3.msra.mxu0 %v2017_v23 }
0x1a9c   :  { %4128 = vmatprep.subr.mxu0 %v2016_v28 }
0x1a9d   :  { %4129 = vmatpush3.msra.mxu0 %v2016_v28 }
0x1a9e   :  { %4130 = vmatprep.subr.mxu0 %v2015_v46 }
0x1a9f   :  { %4131 = vmatpush3.msra.mxu0 %v2015_v46 }
0x1aa0   :  { %4132 = vmatprep.subr.mxu0 %v2014_v9 }
0x1aa1   :  { %4133 = vmatpush3.msra.mxu0 %v2014_v9 }
0x1aa2   :  { %4134 = vmatprep.subr.mxu0 %v2013_v38 }
0x1aa3   :  { %4135 = vmatpush3.msra.mxu0 %v2013_v38 }
0x1aa4   :  { %4136 = vmatprep.subr.mxu0 %v2012_v50 }
0x1aa5   :  { %4137 = vmatpush3.msra.mxu0 %v2012_v50 }
0x1aa6   :  { %4138 = vmatprep.subr.mxu0 %v2011_v49 }
0x1aa7   :  { %4139 = vmatpush3.msra.mxu0 %v2011_v49 }
0x1aa8   :  { %4140 = vmatprep.subr.mxu0 %v2010_v57 }
0x1aa9   :  { %4141 = vmatpush3.msra.mxu0 %v2010_v57 }
0x1aaa   :  { %4142 = vmatprep.subr.mxu0 %v2009_v60 }
0x1aab   :  { %4143 = vmatpush3.msra.mxu0 %v2009_v60 }
0x1aac   :  { %4144 = vmatprep.subr.mxu0 %v2008_v31 }
0x1aad   :  { %4145 = vmatpush3.msra.mxu0 %v2008_v31 }
0x1aae   :  { %4146 = vmatprep.subr.mxu0 %v2007_v32 }
0x1aaf   :  { %4147 = vmatpush3.msra.mxu0 %v2007_v32 }
0x1ab0   :  { %4148 = vmatprep.subr.mxu0 %v2006_v43 }
0x1ab1   :  { %4149 = vmatpush3.msra.mxu0 %v2006_v43 }
0x1ab2   :  { %4150 = vmatprep.subr.mxu0 %v2005_v48 }
0x1ab3   :  { %4151 = vmatpush3.msra.mxu0 %v2005_v48 }
0x1ab4   :  { %4152 = vmatprep.subr.mxu0 %v2004_v8 }
0x1ab5   :  { %4153 = vmatpush3.msra.mxu0 %v2004_v8 }
0x1ab6   :  { %4192 = vmatprep.subr.mxu0 %v4823_v0 }
0x1b56   :  { %v1878_v33 = vpop.f32.mrf.mxu0 }
0x1b57   :  { %v1882_v35 = vadd.f32 %v1878_v33, %v1262_v26  ;;  %v5775_v26 = vld [vmem:[#allocation12 + $0x8] sm:$0xff]  ;;  %v5779_v33 = vld [vmem:[#allocation12] sm:$0xff] }
0x1b58   :  { %v4086_v37 = vpop.f32.mrf.mxu0 }
0x1b59   :  { %v3064_v39 = vmul.f32 -1.442695, %v1882_v35 }
0x1b5b   :  { %4566 = vpow2.f32 %v3064_v39 }
0x1b5c   :  { %4568 = vtanh.f32 %v1882_v35 }
0x1b68   :  { %v4567_v41 = vpop.eup %4566 }
0x1b69   :  { %v1887_v51 = vadd.f32 1.0, %v4567_v41  ;;  %v4569_v53 = vpop.eup %4568 }
0x1b6b   :  { %4570 = vrcp.f32 %v1887_v51 }
0x1b78   :  { %v4571_v54 = vpop.eup %4570 }
0x1b79   :  { %v1890_v56 = vsel %vm5113_vm5, %v4569_v53, %v4571_v54  ;;  %v2042_v53 = vld [vmem:[#allocation3 + $0xa] sm:$0x3]  ;;  %v2041_v54 = vld [vmem:[#allocation3 + $0x8] sm:$0x3] }
0x1b7a   :  { %1891 = vrot.lane.b32.xlu0 %v1890_v56, %s4826_s3  ;;  %v1896_v62 = vmul.f32 %v1890_v56, %v1807_v59  ;;  %v5747_v59 = vld [vmem:[#allocation12 + $0x40] sm:$0xff] }
0x1bec   :  { %v1892_v61 = vpop.permute.xlu0 %1891 }
0x1bed   :  { %v1893_v24 = vmul.f32 %v1892_v61, %v1890_v56  ;;  %v2075_v56 = vcombine.low %v2041_v54, %v2042_v53 }
0x1bef   :  { %1894 = vrot.lane.b32.xlu1 %v1893_v24, %s4827_s23 }
0x1c61   :  { %v1895_v1 = vpop.permute.xlu1 %1894 }
0x1c62   :  { %v5704_v3 = vadd.f32 %v1896_v62, %v1895_v1  ;;  %v2083_v1 = vrot.slane %v2075_v56, %v4946_v11 }
0x1c64   :  { %4572 = vtanh.f32 %v5704_v3 }
0x1c71   :  { %v4573_v4 = vpop.eup %4572 }
0x1c72   :  { %v1899_v5 = vmul.f32 %v4573_v4, %v1892_v61 }
0x1c74   :  { %1901 = vst [vmem:[#allocation3 + $0xc] sm:$0x3] %v1899_v5  ;;  %4120 = vmatmul.mubr.f32.vlgmr.msra.gmra.mxu1 %v1899_v5 }
0x1c75   :  { %4189 = vmatprep.mubr.msk.f32.mxu1 %vm4825_vm0, %v4823_v0  ;;  %4158 = vmatpush3.msra.mxu1 %v5715_v25 }
0x1c76   :  { %4159 = vmatprep.subr.mxu1 %v4823_v0 }
0x1c77   :  { %4160 = vmatpush3.msra.mxu1 %v5719_v44 }
0x1c78   :  { %4161 = vmatprep.subr.mxu1 %v4823_v0 }
0x1c79   :  { %4162 = vmatpush3.msra.mxu1 %v5723_v6 }
0x1c7a   :  { %4163 = vmatprep.subr.mxu1 %v4823_v0 }
0x1c7b   :  { %4164 = vmatpush3.msra.mxu1 %v5729_v34  ;;  %v2043_v61 = vld [vmem:[#allocation3 + $0xc] sm:$0x3] }
0x1c7c   :  { %4165 = vmatprep.subr.mxu1 %v4823_v0 }
0x1c7d   :  { %4166 = vmatpush3.msra.mxu1 %v5735_v40 }
0x1c7e   :  { %4167 = vmatprep.subr.mxu1 %v4823_v0 }
0x1c7f   :  { %4168 = vmatpush3.msra.mxu1 %v5739_v52 }
0x1c80   :  { %4169 = vmatprep.subr.mxu1 %v4823_v0 }
0x1c81   :  { %4170 = vmatpush3.msra.mxu1 %v5743_v55 }
0x1c82   :  { %4171 = vmatprep.subr.mxu1 %v4823_v0 }
0x1c83   :  { %4172 = vmatpush3.msra.mxu1 %v5747_v59 }
0x1c84   :  { %4173 = vmatprep.subr.mxu1 %v4823_v0 }
0x1c85   :  { %4174 = vmatpush3.msra.mxu1 %v5750_v29 }
0x1c86   :  { %4175 = vmatprep.subr.mxu1 %v4823_v0 }
0x1c87   :  { %4176 = vmatpush3.msra.mxu1 %v5754_v27 }
0x1c88   :  { %4177 = vmatprep.subr.mxu1 %v4823_v0 }
0x1c89   :  { %4178 = vmatpush3.msra.mxu1 %v5758_v42 }
0x1c8a   :  { %4179 = vmatprep.subr.mxu1 %v4823_v0 }
0x1c8b   :  { %4180 = vmatpush3.msra.mxu1 %v5762_v45 }
0x1c8c   :  { %4181 = vmatprep.subr.mxu1 %v4823_v0 }
0x1c8d   :  { %4182 = vmatpush3.msra.mxu1 %v5766_v7 }
0x1c8e   :  { %4183 = vmatprep.subr.mxu1 %v4823_v0 }
0x1c8f   :  { %4184 = vmatpush3.msra.mxu1 %v5770_v15 }
0x1c90   :  { %4185 = vmatprep.subr.mxu1 %v4823_v0 }
0x1c91   :  { %4186 = vmatpush3.msra.mxu1 %v5775_v26 }
0x1c92   :  { %4187 = vmatprep.subr.mxu1 %v4823_v0 }
0x1c93   :  { %4188 = vmatpush3.msra.mxu1 %v5779_v33 }
0x1c94   :  { %4190 = vmatmul.mubr.f32.vlgmr.msra.gmra.mxu1 %v4823_v0  ;;  %4227 = vmatprep.subr.mxu1 %v4823_v0 }
0x1c95   :  { %4228 = vmatpush3.msra.mxu1 %v5715_v25  ;;  %4259 = vmatprep.mubr.msk.f32.mxu1 %vm4825_vm0, %v4823_v0 }
0x1c96   :  { %4229 = vmatprep.subr.mxu1 %v4823_v0 }
0x1c97   :  { %4230 = vmatpush3.msra.mxu1 %v5719_v44 }
0x1c98   :  { %4231 = vmatprep.subr.mxu1 %v4823_v0 }
0x1c99   :  { %4232 = vmatpush3.msra.mxu1 %v5723_v6 }
0x1c9a   :  { %4233 = vmatprep.subr.mxu1 %v4823_v0 }
0x1c9b   :  { %4234 = vmatpush3.msra.mxu1 %v5729_v34 }
0x1c9c   :  { %4235 = vmatprep.subr.mxu1 %v4823_v0 }
0x1c9d   :  { %4236 = vmatpush3.msra.mxu1 %v5735_v40 }
0x1c9e   :  { %4237 = vmatprep.subr.mxu1 %v4823_v0 }
0x1c9f   :  { %4238 = vmatpush3.msra.mxu1 %v5739_v52 }
0x1ca0   :  { %4239 = vmatprep.subr.mxu1 %v4823_v0 }
0x1ca1   :  { %4240 = vmatpush3.msra.mxu1 %v5743_v55 }
0x1ca2   :  { %4241 = vmatprep.subr.mxu1 %v4823_v0 }
0x1ca3   :  { %4242 = vmatpush3.msra.mxu1 %v5747_v59 }
0x1ca4   :  { %4243 = vmatprep.subr.mxu1 %v4823_v0 }
0x1ca5   :  { %4244 = vmatpush3.msra.mxu1 %v5750_v29 }
0x1ca6   :  { %4245 = vmatprep.subr.mxu1 %v4823_v0 }
0x1ca7   :  { %4246 = vmatpush3.msra.mxu1 %v5754_v27 }
0x1ca8   :  { %4247 = vmatprep.subr.mxu1 %v4823_v0 }
0x1ca9   :  { %4248 = vmatpush3.msra.mxu1 %v5758_v42 }
0x1caa   :  { %4249 = vmatprep.subr.mxu1 %v4823_v0 }
0x1cab   :  { %4250 = vmatpush3.msra.mxu1 %v5762_v45 }
0x1cac   :  { %4251 = vmatprep.subr.mxu1 %v4823_v0 }
0x1cad   :  { %4252 = vmatpush3.msra.mxu1 %v5766_v7 }
0x1cae   :  { %4253 = vmatprep.subr.mxu1 %v4823_v0 }
0x1caf   :  { %4254 = vmatpush3.msra.mxu1 %v5770_v15 }
0x1cb0   :  { %4255 = vmatprep.subr.mxu1 %v4823_v0 }
0x1cb1   :  { %4256 = vmatpush3.msra.mxu1 %v5775_v26 }
0x1cb2   :  { %4257 = vmatprep.subr.mxu1 %v4823_v0 }
0x1cb3   :  { %4258 = vmatpush3.msra.mxu1 %v5779_v33 }
0x1cb4   :  { %4297 = vmatprep.subr.mxu1 %v4823_v0 }
0x1d34   :  { %v1968_v12 = vpop.f32.mrf.mxu1 }
0x1d35   :  { %v1972_v13 = vadd.f32 %v1968_v12, %v1264_v10  ;;  %v3066_v12 = vld [vmem:[%s6139_s9] ss:$0 sm:$0xff]  ;;  %s4828_s9 = smov 96  }
0x1d36   :  { %v4121_v47 = vpop.f32.mrf.mxu1 }
0x1d37   :  { %v3065_v14 = vmul.f32 -1.442695, %v1972_v13 }
0x1d39   :  { %4574 = vpow2.f32 %v3065_v14 }
0x1d3a   :  { %4576 = vtanh.f32 %v1972_v13  ;;  %v2094_v13 = vcombine.low %v3066_v12, %v3066_v12 }
0x1d3c   :  { %v2101_v47 = vrot.slane %v2094_v13, %v4946_v11 }
0x1d3e   :  { %v2102_v14 = vcombine.low %v2101_v47, %v2101_v47 }
0x1d46   :  { %v4575_v16 = vpop.eup %4574 }
0x1d47   :  { %v1977_v17 = vadd.f32 1.0, %v4575_v16  ;;  %v4577_v18 = vpop.eup %4576 }
0x1d49   :  { %4578 = vrcp.f32 %v1977_v17 }
0x1d54   :  { %v2289_v5 = vpop.f32.mrf.mxu1 }
0x1d56   :  { %v4579_v19 = vpop.eup %4578  ;;  %v4191_v10 = vpop.f32.mrf.mxu1 }
0x1d57   :  { %v5711_v20 = vsel %vm5113_vm5, %v4577_v18, %v4579_v19 }
0x1d58   :  { %1981 = vrot.lane.b32.xlu0 %v5711_v20, %s4826_s3  ;;  %v1986_v35 = vmul.f32 %v5711_v20, %v5704_v3 }
0x1dca   :  { %v5726_v30 = vpop.permute.xlu0 %1981 }
0x1dcb   :  { %v1983_v36 = vmul.f32 %v5726_v30, %v5711_v20 }
0x1dcd   :  { %1984 = vrot.lane.b32.xlu1 %v1983_v36, %s4827_s23 }
0x1e3f   :  { %v1985_v37 = vpop.permute.xlu1 %1984 }
0x1e40   :  { %v5822_v39 = vadd.f32 %v1986_v35, %v1985_v37 }
0x1e42   :  { %4580 = vtanh.f32 %v5822_v39 }
0x1e4f   :  { %v4581_v41 = vpop.eup %4580 }
0x1e50   :  { %v5826_v51 = vmul.f32 %v4581_v41, %v5726_v30 }
0x1e52   :  { %1991 = vst [vmem:[#allocation3 + $0xe] sm:$0x3] %v5826_v51 }
0x1e59   :  { %v2044_v24 = vld [vmem:[#allocation3 + $0xe] sm:$0x3] }
0x1e5a   :  { %v2076_v62 = vcombine.low %v2043_v61, %v2044_v24 }
0x1e5c   :  { %v2090_v3 = vrot.slane %v2076_v62, %v4946_v11 }
0x1e5e   :  { %v2091_v4 = vcombine.low %v2083_v1, %v2090_v3 }
0x1e60   :  { %4155 = vmatmul.mubr.f32.vlgmr.msra.gmra.mxu0 %v2091_v4 }
0x1e61   :  { %4193 = vmatpush3.msra.mxu0 %v5715_v25  ;;  %4224 = vmatprep.mubr.msk.f32.mxu0 %vm4825_vm0, %v4823_v0 }
0x1e62   :  { %4194 = vmatprep.subr.mxu0 %v4823_v0 }
0x1e63   :  { %4195 = vmatpush3.msra.mxu0 %v5719_v44 }
0x1e64   :  { %4196 = vmatprep.subr.mxu0 %v4823_v0 }
0x1e65   :  { %4197 = vmatpush3.msra.mxu0 %v5723_v6 }
0x1e66   :  { %4198 = vmatprep.subr.mxu0 %v4823_v0 }
0x1e67   :  { %4199 = vmatpush3.msra.mxu0 %v5729_v34 }
0x1e68   :  { %4200 = vmatprep.subr.mxu0 %v4823_v0 }
0x1e69   :  { %4201 = vmatpush3.msra.mxu0 %v5735_v40 }
0x1e6a   :  { %4202 = vmatprep.subr.mxu0 %v4823_v0 }
0x1e6b   :  { %4203 = vmatpush3.msra.mxu0 %v5739_v52 }
0x1e6c   :  { %4204 = vmatprep.subr.mxu0 %v4823_v0 }
0x1e6d   :  { %4205 = vmatpush3.msra.mxu0 %v5743_v55 }
0x1e6e   :  { %4206 = vmatprep.subr.mxu0 %v4823_v0 }
0x1e6f   :  { %4207 = vmatpush3.msra.mxu0 %v5747_v59 }
0x1e70   :  { %4208 = vmatprep.subr.mxu0 %v4823_v0 }
0x1e71   :  { %4209 = vmatpush3.msra.mxu0 %v5750_v29 }
0x1e72   :  { %4210 = vmatprep.subr.mxu0 %v4823_v0 }
0x1e73   :  { %4211 = vmatpush3.msra.mxu0 %v5754_v27 }
0x1e74   :  { %4212 = vmatprep.subr.mxu0 %v4823_v0 }
0x1e75   :  { %4213 = vmatpush3.msra.mxu0 %v5758_v42 }
0x1e76   :  { %4214 = vmatprep.subr.mxu0 %v4823_v0 }
0x1e77   :  { %4215 = vmatpush3.msra.mxu0 %v5762_v45 }
0x1e78   :  { %4216 = vmatprep.subr.mxu0 %v4823_v0 }
0x1e79   :  { %4217 = vmatpush3.msra.mxu0 %v5766_v7 }
0x1e7a   :  { %4218 = vmatprep.subr.mxu0 %v4823_v0 }
0x1e7b   :  { %4219 = vmatpush3.msra.mxu0 %v5770_v15 }
0x1e7c   :  { %4220 = vmatprep.subr.mxu0 %v4823_v0 }
0x1e7d   :  { %4221 = vmatpush3.msra.mxu0 %v5775_v26 }
0x1e7e   :  { %4222 = vmatprep.subr.mxu0 %v4823_v0 }
0x1e7f   :  { %4223 = vmatpush3.msra.mxu0 %v5779_v33 }
0x1e80   :  { %4262 = vmatprep.subr.mxu0 %v4823_v0 }
0x1f20   :  { %v4156_v16 = vpop.f32.mrf.mxu0 }
0x1f21   :  { %v5869_v17 = vadd.f32 %v4156_v16, %v2102_v14 }
0x1f22   :  { %v2170_v18 = vpop.f32.mrf.mxu0 }
0x1f23   :  { %v5871_v19 = vadd.f32 %v2170_v18, %v2102_v14 }
0x1f25   :  { %v2188_v20 = vrot.slane %v5871_v19, %v4946_v11  ;;  %v2181_v10 = vcombine.high %v5871_v19, %v5871_v19 }
0x1f27   :  { %v2293_v21 = vadd.f32 %v2289_v5, %v2188_v20  ;;  %v2196_v32 = vcombine.high %v2188_v20, %v2188_v20  ;;  %v2195_v12 = vrot.slane %v2181_v10, %v4946_v11 }
0x1f29   :  { %v3067_v22 = vmul.f32 -1.442695, %v2293_v21 }
0x1f2b   :  { %4582 = vpow2.f32 %v3067_v22 }
0x1f2c   :  { %4584 = vtanh.f32 %v2293_v21 }
0x1f38   :  { %v4583_v23 = vpop.eup %4582 }
0x1f39   :  { %v2298_v28 = vadd.f32 1.0, %v4583_v23  ;;  %v4585_v46 = vpop.eup %4584 }
0x1f3b   :  { %4586 = vrcp.f32 %v2298_v28 }
0x1f48   :  { %v4587_v9 = vpop.eup %4586 }
0x1f49   :  { %v2301_v30 = vsel %vm5113_vm5, %v4585_v46, %v4587_v9 }
0x1f4a   :  { %2302 = vrot.lane.b32.xlu0 %v2301_v30, %s4826_s3  ;;  %v2307_v50 = vmul.f32 0.0, %v2301_v30 }
0x1fbc   :  { %v2303_v36 = vpop.permute.xlu0 %2302 }
0x1fbd   :  { %v2304_v38 = vmul.f32 %v2303_v36, %v2301_v30 }
0x1fbf   :  { %2305 = vrot.lane.b32.xlu1 %v2304_v38, %s4827_s23 }
0x2031   :  { %v2306_v49 = vpop.permute.xlu1 %2305 }
0x2032   :  { %v2308_v57 = vadd.f32 %v2307_v50, %v2306_v49  ;;  %v2197_v50 = vcombine.high %v2195_v12, %v2195_v12 }
0x2034   :  { %4588 = vtanh.f32 %v2308_v57 }
0x2041   :  { %v4589_v60 = vpop.eup %4588 }
0x2042   :  { %v2310_v31 = vmul.f32 %v4589_v60, %v2303_v36 }
0x2044   :  { %2311 = vst [vmem:[#allocation2] sm:$0x3] %v2310_v31  ;;  %4225 = vmatmul.mubr.f32.vlgmr.msra.gmra.mxu0 %v2310_v31 }
0x2045   :  { %4263 = vmatpush3.msra.mxu0 %v5715_v25  ;;  %4294 = vmatprep.mubr.msk.f32.mxu0 %vm4825_vm0, %v4823_v0 }
0x2046   :  { %4264 = vmatprep.subr.mxu0 %v4823_v0 }
0x2047   :  { %4265 = vmatpush3.msra.mxu0 %v5719_v44 }
0x2048   :  { %4266 = vmatprep.subr.mxu0 %v4823_v0 }
0x2049   :  { %4267 = vmatpush3.msra.mxu0 %v5723_v6 }
0x204a   :  { %4268 = vmatprep.subr.mxu0 %v4823_v0 }
0x204b   :  { %4269 = vmatpush3.msra.mxu0 %v5729_v34 }
0x204c   :  { %4270 = vmatprep.subr.mxu0 %v4823_v0 }
0x204d   :  { %4271 = vmatpush3.msra.mxu0 %v5735_v40 }
0x204e   :  { %4272 = vmatprep.subr.mxu0 %v4823_v0 }
0x204f   :  { %4273 = vmatpush3.msra.mxu0 %v5739_v52 }
0x2050   :  { %4274 = vmatprep.subr.mxu0 %v4823_v0 }
0x2051   :  { %4275 = vmatpush3.msra.mxu0 %v5743_v55 }
0x2052   :  { %4276 = vmatprep.subr.mxu0 %v4823_v0 }
0x2053   :  { %4277 = vmatpush3.msra.mxu0 %v5747_v59 }
0x2054   :  { %4278 = vmatprep.subr.mxu0 %v4823_v0 }
0x2055   :  { %4279 = vmatpush3.msra.mxu0 %v5750_v29 }
0x2056   :  { %4280 = vmatprep.subr.mxu0 %v4823_v0 }
0x2057   :  { %4281 = vmatpush3.msra.mxu0 %v5754_v27 }
0x2058   :  { %4282 = vmatprep.subr.mxu0 %v4823_v0 }
0x2059   :  { %4283 = vmatpush3.msra.mxu0 %v5758_v42 }
0x205a   :  { %4284 = vmatprep.subr.mxu0 %v4823_v0 }
0x205b   :  { %4285 = vmatpush3.msra.mxu0 %v5762_v45 }
0x205c   :  { %4286 = vmatprep.subr.mxu0 %v4823_v0 }
0x205d   :  { %4287 = vmatpush3.msra.mxu0 %v5766_v7 }
0x205e   :  { %4288 = vmatprep.subr.mxu0 %v4823_v0 }
0x205f   :  { %4289 = vmatpush3.msra.mxu0 %v5770_v15 }
0x2060   :  { %4290 = vmatprep.subr.mxu0 %v4823_v0 }
0x2061   :  { %4291 = vmatpush3.msra.mxu0 %v5775_v26 }
0x2062   :  { %4292 = vmatprep.subr.mxu0 %v4823_v0 }
0x2063   :  { %4293 = vmatpush3.msra.mxu0 %v5779_v33 }
0x2064   :  { %4332 = vmatprep.subr.mxu0 %v4823_v0 }
0x2104   :  { %v2378_v43 = vpop.f32.mrf.mxu0 }
0x2105   :  { %v2382_v48 = vadd.f32 %v2378_v43, %v2196_v32 }
0x2106   :  { %v4226_v8 = vpop.f32.mrf.mxu0 }
0x2107   :  { %v3068_v35 = vmul.f32 -1.442695, %v2382_v48 }
0x2109   :  { %4590 = vpow2.f32 %v3068_v35 }
0x210a   :  { %4592 = vtanh.f32 %v2382_v48 }
0x2116   :  { %v4591_v37 = vpop.eup %4590 }
0x2117   :  { %v2387_v41 = vadd.f32 1.0, %v4591_v37  ;;  %v4593_v53 = vpop.eup %4592 }
0x2119   :  { %4594 = vrcp.f32 %v2387_v41 }
0x2126   :  { %v4595_v54 = vpop.eup %4594 }
0x2127   :  { %v2390_v56 = vsel %vm5113_vm5, %v4593_v53, %v4595_v54 }
0x2128   :  { %2391 = vrot.lane.b32.xlu0 %v2390_v56, %s4826_s3  ;;  %v2396_v62 = vmul.f32 %v2390_v56, %v2308_v57 }
0x219a   :  { %v2392_v61 = vpop.permute.xlu0 %2391 }
0x219b   :  { %v2393_v24 = vmul.f32 %v2392_v61, %v2390_v56 }
0x219d   :  { %2394 = vrot.lane.b32.xlu1 %v2393_v24, %s4827_s23 }
0x220f   :  { %v2395_v1 = vpop.permute.xlu1 %2394 }
0x2210   :  { %v2397_v3 = vadd.f32 %v2396_v62, %v2395_v1  ;;  %v2205_v62 = vrot.slane %v5869_v17, %v4946_v11 }
0x2212   :  { %4596 = vtanh.f32 %v2397_v3 }
0x221f   :  { %v4597_v4 = vpop.eup %4596 }
0x2220   :  { %v2399_v5 = vmul.f32 %v4597_v4, %v2392_v61 }
0x2222   :  { %2400 = vst [vmem:[#allocation2 + $0x2] sm:$0x3] %v2399_v5  ;;  %4260 = vmatmul.mubr.f32.vlgmr.msra.gmra.mxu1 %v2399_v5 }
0x2223   :  { %4298 = vmatpush3.msra.mxu1 %v5715_v25  ;;  %4329 = vmatprep.mubr.msk.f32.mxu1 %vm4825_vm0, %v4823_v0 }
0x2224   :  { %4299 = vmatprep.subr.mxu1 %v4823_v0 }
0x2225   :  { %4300 = vmatpush3.msra.mxu1 %v5719_v44 }
0x2226   :  { %4301 = vmatprep.subr.mxu1 %v4823_v0 }
0x2227   :  { %4302 = vmatpush3.msra.mxu1 %v5723_v6 }
0x2228   :  { %4303 = vmatprep.subr.mxu1 %v4823_v0 }
0x2229   :  { %4304 = vmatpush3.msra.mxu1 %v5729_v34 }
0x222a   :  { %4305 = vmatprep.subr.mxu1 %v4823_v0 }
0x222b   :  { %4306 = vmatpush3.msra.mxu1 %v5735_v40 }
0x222c   :  { %4307 = vmatprep.subr.mxu1 %v4823_v0 }
0x222d   :  { %4308 = vmatpush3.msra.mxu1 %v5739_v52 }
0x222e   :  { %4309 = vmatprep.subr.mxu1 %v4823_v0 }
0x222f   :  { %4310 = vmatpush3.msra.mxu1 %v5743_v55 }
0x2230   :  { %4311 = vmatprep.subr.mxu1 %v4823_v0 }
0x2231   :  { %4312 = vmatpush3.msra.mxu1 %v5747_v59 }
0x2232   :  { %4313 = vmatprep.subr.mxu1 %v4823_v0 }
0x2233   :  { %4314 = vmatpush3.msra.mxu1 %v5750_v29 }
0x2234   :  { %4315 = vmatprep.subr.mxu1 %v4823_v0 }
0x2235   :  { %4316 = vmatpush3.msra.mxu1 %v5754_v27 }
0x2236   :  { %4317 = vmatprep.subr.mxu1 %v4823_v0 }
0x2237   :  { %4318 = vmatpush3.msra.mxu1 %v5758_v42 }
0x2238   :  { %4319 = vmatprep.subr.mxu1 %v4823_v0 }
0x2239   :  { %4320 = vmatpush3.msra.mxu1 %v5762_v45 }
0x223a   :  { %4321 = vmatprep.subr.mxu1 %v4823_v0 }
0x223b   :  { %4322 = vmatpush3.msra.mxu1 %v5766_v7 }
0x223c   :  { %4323 = vmatprep.subr.mxu1 %v4823_v0 }
0x223d   :  { %4324 = vmatpush3.msra.mxu1 %v5770_v15 }
0x223e   :  { %4325 = vmatprep.subr.mxu1 %v4823_v0 }
0x223f   :  { %4326 = vmatpush3.msra.mxu1 %v5775_v26 }
0x2240   :  { %4327 = vmatprep.subr.mxu1 %v4823_v0 }
0x2241   :  { %4328 = vmatpush3.msra.mxu1 %v5779_v33 }
0x2242   :  { %4367 = vmatprep.subr.mxu1 %v4823_v0 }
0x22e2   :  { %v2467_v13 = vpop.f32.mrf.mxu1 }
0x22e3   :  { %v2471_v47 = vadd.f32 %v2467_v13, %v2195_v12 }
0x22e4   :  { %v4261_v14 = vpop.f32.mrf.mxu1 }
0x22e5   :  { %v3069_v16 = vmul.f32 -1.442695, %v2471_v47 }
0x22e7   :  { %4598 = vpow2.f32 %v3069_v16 }
0x22e8   :  { %4600 = vtanh.f32 %v2471_v47 }
0x22f4   :  { %v4599_v18 = vpop.eup %4598 }
0x22f5   :  { %v2476_v20 = vadd.f32 1.0, %v4599_v18  ;;  %v4601_v21 = vpop.eup %4600 }
0x22f7   :  { %4602 = vrcp.f32 %v2476_v20 }
0x2304   :  { %v4603_v22 = vpop.eup %4602 }
0x2305   :  { %v2479_v23 = vsel %vm5113_vm5, %v4601_v21, %v4603_v22 }
0x2306   :  { %2480 = vrot.lane.b32.xlu0 %v2479_v23, %s4826_s3  ;;  %v2485_v46 = vmul.f32 %v2479_v23, %v2397_v3 }
0x2378   :  { %v2481_v28 = vpop.permute.xlu0 %2480 }
0x2379   :  { %v2482_v19 = vmul.f32 %v2481_v28, %v2479_v23 }
0x237b   :  { %2483 = vrot.lane.b32.xlu1 %v2482_v19, %s4827_s23  ;;  %v2198_v19 = vcombine.high %v5869_v17, %v5869_v17 }
0x23ed   :  { %v2484_v9 = vpop.permute.xlu1 %2483 }
0x23ee   :  { %v2486_v30 = vadd.f32 %v2485_v46, %v2484_v9  ;;  %v2212_v46 = vrot.slane %v2198_v19, %v4946_v11 }
0x23f0   :  { %4604 = vtanh.f32 %v2486_v30 }
0x23fd   :  { %v4605_v36 = vpop.eup %4604 }
0x23fe   :  { %v2488_v38 = vmul.f32 %v4605_v36, %v2481_v28 }
0x2400   :  { %2489 = vst [vmem:[#allocation2 + $0x4] sm:$0x3] %v2488_v38  ;;  %4295 = vmatmul.mubr.f32.vlgmr.msra.gmra.mxu0 %v2488_v38 }
0x2401   :  { %4333 = vmatpush3.msra.mxu0 %v5715_v25  ;;  %4364 = vmatprep.mubr.msk.f32.mxu0 %vm4825_vm0, %v4823_v0 }
0x2402   :  { %4334 = vmatprep.subr.mxu0 %v4823_v0 }
0x2403   :  { %4335 = vmatpush3.msra.mxu0 %v5719_v44 }
0x2404   :  { %4336 = vmatprep.subr.mxu0 %v4823_v0 }
0x2405   :  { %4337 = vmatpush3.msra.mxu0 %v5723_v6 }
0x2406   :  { %4338 = vmatprep.subr.mxu0 %v4823_v0 }
0x2407   :  { %4339 = vmatpush3.msra.mxu0 %v5729_v34 }
0x2408   :  { %4340 = vmatprep.subr.mxu0 %v4823_v0 }
0x2409   :  { %4341 = vmatpush3.msra.mxu0 %v5735_v40 }
0x240a   :  { %4342 = vmatprep.subr.mxu0 %v4823_v0 }
0x240b   :  { %4343 = vmatpush3.msra.mxu0 %v5739_v52 }
0x240c   :  { %4344 = vmatprep.subr.mxu0 %v4823_v0 }
0x240d   :  { %4345 = vmatpush3.msra.mxu0 %v5743_v55 }
0x240e   :  { %4346 = vmatprep.subr.mxu0 %v4823_v0 }
0x240f   :  { %4347 = vmatpush3.msra.mxu0 %v5747_v59 }
0x2410   :  { %4348 = vmatprep.subr.mxu0 %v4823_v0 }
0x2411   :  { %4349 = vmatpush3.msra.mxu0 %v5750_v29 }
0x2412   :  { %4350 = vmatprep.subr.mxu0 %v4823_v0 }
0x2413   :  { %4351 = vmatpush3.msra.mxu0 %v5754_v27 }
0x2414   :  { %4352 = vmatprep.subr.mxu0 %v4823_v0 }
0x2415   :  { %4353 = vmatpush3.msra.mxu0 %v5758_v42 }
0x2416   :  { %4354 = vmatprep.subr.mxu0 %v4823_v0 }
0x2417   :  { %4355 = vmatpush3.msra.mxu0 %v5762_v45 }
0x2418   :  { %4356 = vmatprep.subr.mxu0 %v4823_v0 }
0x2419   :  { %4357 = vmatpush3.msra.mxu0 %v5766_v7 }
0x241a   :  { %4358 = vmatprep.subr.mxu0 %v4823_v0 }
0x241b   :  { %4359 = vmatpush3.msra.mxu0 %v5770_v15 }
0x241c   :  { %4360 = vmatprep.subr.mxu0 %v4823_v0 }
0x241d   :  { %4361 = vmatpush3.msra.mxu0 %v5775_v26 }
0x241e   :  { %4362 = vmatprep.subr.mxu0 %v4823_v0 }
0x241f   :  { %4363 = vmatpush3.msra.mxu0 %v5779_v33 }
0x2420   :  { %4402 = vmatprep.subr.mxu0 %v4823_v0 }
0x24c0   :  { %v2556_v49 = vpop.f32.mrf.mxu0 }
0x24c1   :  { %v2560_v57 = vadd.f32 %v2556_v49, %v2197_v50 }
0x24c2   :  { %v4296_v60 = vpop.f32.mrf.mxu0 }
0x24c3   :  { %v3070_v31 = vmul.f32 -1.442695, %v2560_v57 }
0x24c5   :  { %4606 = vpow2.f32 %v3070_v31 }
0x24c6   :  { %4608 = vtanh.f32 %v2560_v57 }
0x24d2   :  { %v4607_v32 = vpop.eup %4606 }
0x24d3   :  { %v2565_v43 = vadd.f32 1.0, %v4607_v32  ;;  %v4609_v48 = vpop.eup %4608 }
0x24d5   :  { %4610 = vrcp.f32 %v2565_v43 }
0x24e2   :  { %v4611_v8 = vpop.eup %4610 }
0x24e3   :  { %v2568_v35 = vsel %vm5113_vm5, %v4609_v48, %v4611_v8 }
0x24e4   :  { %2569 = vrot.lane.b32.xlu0 %v2568_v35, %s4826_s3  ;;  %v2574_v53 = vmul.f32 %v2568_v35, %v2486_v30 }
0x2556   :  { %v2570_v37 = vpop.permute.xlu0 %2569 }
0x2557   :  { %v2571_v41 = vmul.f32 %v2570_v37, %v2568_v35 }
0x2559   :  { %2572 = vrot.lane.b32.xlu1 %v2571_v41, %s4827_s23 }
0x25cb   :  { %v2573_v54 = vpop.permute.xlu1 %2572 }
0x25cc   :  { %v2575_v56 = vadd.f32 %v2574_v53, %v2573_v54 }
0x25ce   :  { %4612 = vtanh.f32 %v2575_v56 }
0x25db   :  { %v4613_v61 = vpop.eup %4612 }
0x25dc   :  { %v2577_v24 = vmul.f32 %v4613_v61, %v2570_v37  ;;  %v2214_v37 = vcombine.high %v2212_v46, %v2212_v46 }
0x25de   :  { %2578 = vst [vmem:[#allocation2 + $0x6] sm:$0x3] %v2577_v24  ;;  %4330 = vmatmul.mubr.f32.vlgmr.msra.gmra.mxu1 %v2577_v24 }
0x25df   :  { %4368 = vmatpush3.msra.mxu1 %v5715_v25  ;;  %4399 = vmatprep.mubr.msk.f32.mxu1 %vm4825_vm0, %v4823_v0 }
0x25e0   :  { %4369 = vmatprep.subr.mxu1 %v4823_v0 }
0x25e1   :  { %4370 = vmatpush3.msra.mxu1 %v5719_v44 }
0x25e2   :  { %4371 = vmatprep.subr.mxu1 %v4823_v0 }
0x25e3   :  { %4372 = vmatpush3.msra.mxu1 %v5723_v6 }
0x25e4   :  { %4373 = vmatprep.subr.mxu1 %v4823_v0 }
0x25e5   :  { %4374 = vmatpush3.msra.mxu1 %v5729_v34 }
0x25e6   :  { %4375 = vmatprep.subr.mxu1 %v4823_v0 }
0x25e7   :  { %4376 = vmatpush3.msra.mxu1 %v5735_v40 }
0x25e8   :  { %4377 = vmatprep.subr.mxu1 %v4823_v0 }
0x25e9   :  { %4378 = vmatpush3.msra.mxu1 %v5739_v52 }
0x25ea   :  { %4379 = vmatprep.subr.mxu1 %v4823_v0 }
0x25eb   :  { %4380 = vmatpush3.msra.mxu1 %v5743_v55 }
0x25ec   :  { %4381 = vmatprep.subr.mxu1 %v4823_v0 }
0x25ed   :  { %4382 = vmatpush3.msra.mxu1 %v5747_v59 }
0x25ee   :  { %4383 = vmatprep.subr.mxu1 %v4823_v0 }
0x25ef   :  { %4384 = vmatpush3.msra.mxu1 %v5750_v29 }
0x25f0   :  { %4385 = vmatprep.subr.mxu1 %v4823_v0 }
0x25f1   :  { %4386 = vmatpush3.msra.mxu1 %v5754_v27 }
0x25f2   :  { %4387 = vmatprep.subr.mxu1 %v4823_v0 }
0x25f3   :  { %4388 = vmatpush3.msra.mxu1 %v5758_v42 }
0x25f4   :  { %4389 = vmatprep.subr.mxu1 %v4823_v0 }
0x25f5   :  { %4390 = vmatpush3.msra.mxu1 %v5762_v45 }
0x25f6   :  { %4391 = vmatprep.subr.mxu1 %v4823_v0 }
0x25f7   :  { %4392 = vmatpush3.msra.mxu1 %v5766_v7 }
0x25f8   :  { %4393 = vmatprep.subr.mxu1 %v4823_v0 }
0x25f9   :  { %4394 = vmatpush3.msra.mxu1 %v5770_v15 }
0x25fa   :  { %4395 = vmatprep.subr.mxu1 %v4823_v0 }
0x25fb   :  { %4396 = vmatpush3.msra.mxu1 %v5775_v26 }
0x25fc   :  { %4397 = vmatprep.subr.mxu1 %v4823_v0 }
0x25fd   :  { %4398 = vmatpush3.msra.mxu1 %v5779_v33 }
0x269e   :  { %v2645_v1 = vpop.f32.mrf.mxu1 }
0x269f   :  { %v2649_v3 = vadd.f32 %v2645_v1, %v2205_v62 }
0x26a0   :  { %v4331_v4 = vpop.f32.mrf.mxu1 }
0x26a1   :  { %v3071_v5 = vmul.f32 -1.442695, %v2649_v3  ;;  %v2947_v4 = vld [vmem:[#allocation2] sm:$0x3] }
0x26a3   :  { %4614 = vpow2.f32 %v3071_v5  ;;  %v2949_v5 = vld [vmem:[#allocation2 + $0x4] sm:$0x3] }
0x26a4   :  { %4616 = vtanh.f32 %v2649_v3 }
0x26b0   :  { %v4615_v10 = vpop.eup %4614 }
0x26b1   :  { %v2654_v12 = vadd.f32 1.0, %v4615_v10  ;;  %v4617_v13 = vpop.eup %4616 }
0x26b3   :  { %4618 = vrcp.f32 %v2654_v12 }
0x26c0   :  { %v4619_v47 = vpop.eup %4618 }
0x26c1   :  { %v2657_v14 = vsel %vm5113_vm5, %v4617_v13, %v4619_v47  ;;  %v2948_v47 = vld [vmem:[#allocation2 + $0x2] sm:$0x3] }
0x26c2   :  { %2658 = vrot.lane.b32.xlu0 %v2657_v14, %s4826_s3  ;;  %v2663_v20 = vmul.f32 %v2657_v14, %v2575_v56 }
0x2734   :  { %v2659_v16 = vpop.permute.xlu0 %2658 }
0x2735   :  { %v2660_v18 = vmul.f32 %v2659_v16, %v2657_v14 }
0x2737   :  { %2661 = vrot.lane.b32.xlu1 %v2660_v18, %s4827_s23 }
0x27a9   :  { %v2662_v21 = vpop.permute.xlu1 %2661 }
0x27aa   :  { %v2664_v22 = vadd.f32 %v2663_v20, %v2662_v21 }
0x27ac   :  { %4620 = vtanh.f32 %v2664_v22 }
0x27b9   :  { %v4621_v23 = vpop.eup %4620 }
0x27ba   :  { %v2666_v28 = vmul.f32 %v4621_v23, %v2659_v16  ;;  %v2950_v16 = vld [vmem:[#allocation2 + $0x6] sm:$0x3] }
0x27bc   :  { %2667 = vst [vmem:[#allocation2 + $0x8] sm:$0x3] %v2666_v28  ;;  %4365 = vmatmul.mubr.f32.vlgmr.msra.gmra.mxu0 %v2666_v28 }
0x27bd   :  { %4403 = vmatpush3.msra.mxu0 %v5715_v25  ;;  %4434 = vmatprep.mubr.msk.f32.mxu0 %vm4825_vm0, %v4823_v0  ;;  %v2213_v25 = vcombine.high %v2205_v62, %v2205_v62 }
0x27be   :  { %4404 = vmatprep.subr.mxu0 %v4823_v0 }
0x27bf   :  { %4405 = vmatpush3.msra.mxu0 %v5719_v44 }
0x27c0   :  { %4406 = vmatprep.subr.mxu0 %v4823_v0 }
0x27c1   :  { %4407 = vmatpush3.msra.mxu0 %v5723_v6 }
0x27c2   :  { %4408 = vmatprep.subr.mxu0 %v4823_v0 }
0x27c3   :  { %4409 = vmatpush3.msra.mxu0 %v5729_v34  ;;  %v2951_v10 = vld [vmem:[#allocation2 + $0x8] sm:$0x3] }
0x27c4   :  { %4410 = vmatprep.subr.mxu0 %v4823_v0 }
0x27c5   :  { %4411 = vmatpush3.msra.mxu0 %v5735_v40 }
0x27c6   :  { %4412 = vmatprep.subr.mxu0 %v4823_v0 }
0x27c7   :  { %4413 = vmatpush3.msra.mxu0 %v5739_v52 }
0x27c8   :  { %4414 = vmatprep.subr.mxu0 %v4823_v0 }
0x27c9   :  { %4415 = vmatpush3.msra.mxu0 %v5743_v55 }
0x27ca   :  { %4416 = vmatprep.subr.mxu0 %v4823_v0 }
0x27cb   :  { %4417 = vmatpush3.msra.mxu0 %v5747_v59 }
0x27cc   :  { %4418 = vmatprep.subr.mxu0 %v4823_v0 }
0x27cd   :  { %4419 = vmatpush3.msra.mxu0 %v5750_v29 }
0x27ce   :  { %4420 = vmatprep.subr.mxu0 %v4823_v0 }
0x27cf   :  { %4421 = vmatpush3.msra.mxu0 %v5754_v27 }
0x27d0   :  { %4422 = vmatprep.subr.mxu0 %v4823_v0 }
0x27d1   :  { %4423 = vmatpush3.msra.mxu0 %v5758_v42 }
0x27d2   :  { %4424 = vmatprep.subr.mxu0 %v4823_v0 }
0x27d3   :  { %4425 = vmatpush3.msra.mxu0 %v5762_v45 }
0x27d4   :  { %4426 = vmatprep.subr.mxu0 %v4823_v0 }
0x27d5   :  { %4427 = vmatpush3.msra.mxu0 %v5766_v7 }
0x27d6   :  { %4428 = vmatprep.subr.mxu0 %v4823_v0 }
0x27d7   :  { %4429 = vmatpush3.msra.mxu0 %v5770_v15 }
0x27d8   :  { %4430 = vmatprep.subr.mxu0 %v4823_v0 }
0x27d9   :  { %4431 = vmatpush3.msra.mxu0 %v5775_v26 }
0x27da   :  { %4432 = vmatprep.subr.mxu0 %v4823_v0 }
0x27db   :  { %4433 = vmatpush3.msra.mxu0 %v5779_v33 }
0x287c   :  { %v2734_v44 = vpop.f32.mrf.mxu0 }
0x287d   :  { %v2738_v6 = vadd.f32 %v2734_v44, %v2213_v25 }
0x287e   :  { %v4366_v34 = vpop.f32.mrf.mxu0 }
0x287f   :  { %v3072_v40 = vmul.f32 -1.442695, %v2738_v6 }
0x2881   :  { %4622 = vpow2.f32 %v3072_v40 }
0x2882   :  { %4624 = vtanh.f32 %v2738_v6 }
0x288e   :  { %v4623_v52 = vpop.eup %4622 }
0x288f   :  { %v2743_v55 = vadd.f32 1.0, %v4623_v52  ;;  %v4625_v59 = vpop.eup %4624 }
0x2891   :  { %4626 = vrcp.f32 %v2743_v55 }
0x289e   :  { %v4627_v29 = vpop.eup %4626 }
0x289f   :  { %v2746_v27 = vsel %vm5113_vm5, %v4625_v59, %v4627_v29 }
0x28a0   :  { %2747 = vrot.lane.b32.xlu0 %v2746_v27, %s4826_s3  ;;  %v2752_v45 = vmul.f32 %v2746_v27, %v2664_v22 }
0x2912   :  { %v2748_v0 = vpop.permute.xlu0 %2747 }
0x2913   :  { %v2749_v42 = vmul.f32 %v2748_v0, %v2746_v27 }
0x2915   :  { %2750 = vrot.lane.b32.xlu1 %v2749_v42, %s4827_s23 }
0x2987   :  { %v2751_v7 = vpop.permute.xlu1 %2750 }
0x2988   :  { %v2753_v15 = vadd.f32 %v2752_v45, %v2751_v7 }
0x298a   :  { %4628 = vtanh.f32 %v2753_v15 }
0x2997   :  { %v4629_v26 = vpop.eup %4628 }
0x2998   :  { %v2755_v33 = vmul.f32 %v4629_v26, %v2748_v0 }
0x299a   :  { %2756 = vst [vmem:[#allocation2 + $0xa] sm:$0x3] %v2755_v33  ;;  %4400 = vmatmul.mubr.f32.vlgmr.msra.gmra.mxu1 %v2755_v33 }
0x2a5a   :  { %v2823_v9 = vpop.f32.mrf.mxu1 }
0x2a5b   :  { %v2827_v30 = vadd.f32 %v2823_v9, %v2212_v46 }
0x2a5c   :  { %v4401_v36 = vpop.f32.mrf.mxu1 }
0x2a5d   :  { %v3073_v38 = vmul.f32 -1.442695, %v2827_v30 }
0x2a5f   :  { %4630 = vpow2.f32 %v3073_v38 }
0x2a60   :  { %4632 = vtanh.f32 %v2827_v30 }
0x2a6c   :  { %v4631_v50 = vpop.eup %4630 }
0x2a6d   :  { %v2832_v49 = vadd.f32 1.0, %v4631_v50  ;;  %v4633_v57 = vpop.eup %4632 }
0x2a6f   :  { %4634 = vrcp.f32 %v2832_v49 }
0x2a7c   :  { %v4635_v60 = vpop.eup %4634 }
0x2a7d   :  { %v2835_v31 = vsel %vm5113_vm5, %v4633_v57, %v4635_v60 }
0x2a7e   :  { %2836 = vrot.lane.b32.xlu0 %v2835_v31, %s4826_s3  ;;  %v2841_v11 = vmul.f32 %v2835_v31, %v2753_v15 }
0x2af0   :  { %v2837_v32 = vpop.permute.xlu0 %2836 }
0x2af1   :  { %v2838_v17 = vmul.f32 %v2837_v32, %v2835_v31 }
0x2af3   :  { %2839 = vrot.lane.b32.xlu1 %v2838_v17, %s4827_s23 }
0x2b65   :  { %v2840_v43 = vpop.permute.xlu1 %2839 }
0x2b66   :  { %v2842_v48 = vadd.f32 %v2841_v11, %v2840_v43 }
0x2b68   :  { %4636 = vtanh.f32 %v2842_v48 }
0x2b75   :  { %v4637_v8 = vpop.eup %4636 }
0x2b76   :  { %v2844_v35 = vmul.f32 %v4637_v8, %v2837_v32 }
0x2b78   :  { %2845 = vst [vmem:[#allocation2 + $0xc] sm:$0x3] %v2844_v35  ;;  %4435 = vmatmul.mubr.f32.vlgmr.msra.gmra.mxu0 %v2844_v35 }
0x2b7f   :  { %v2953_v40 = vld [vmem:[#allocation2 + $0xc] sm:$0x3] }
0x2c38   :  { %v2912_v41 = vpop.f32.mrf.mxu0 }
0x2c39   :  { %v2916_v53 = vadd.f32 %v2912_v41, %v2214_v37 }
0x2c3a   :  { %v4436_v54 = vpop.f32.mrf.mxu0 }
0x2c3b   :  { %v3074_v56 = vmul.f32 -1.442695, %v2916_v53 }
0x2c3d   :  { %4638 = vpow2.f32 %v3074_v56 }
0x2c3e   :  { %4640 = vtanh.f32 %v2916_v53 }
0x2c4a   :  { %v4639_v61 = vpop.eup %4638 }
0x2c4b   :  { %v2921_v24 = vadd.f32 1.0, %v4639_v61  ;;  %v4641_v62 = vpop.eup %4640 }
0x2c4d   :  { %4642 = vrcp.f32 %v2921_v24 }
0x2c5a   :  { %v4643_v1 = vpop.eup %4642 }
0x2c5b   :  { %v2924_v3 = vsel %vm5113_vm5, %v4641_v62, %v4643_v1 }
0x2c5c   :  { %2925 = vrot.lane.b32.xlu0 %v2924_v3, %s4826_s3  ;;  %v2930_v20 = vmul.f32 %v2924_v3, %v2842_v48 }
0x2c60   :  { %1044 = vrot.lane.b32.xlu0 %v5448_v2, %s4828_s9 }
0x2c64   :  { %1999 = vrot.lane.b32.xlu0 %v5822_v39, %s4828_s9 }
0x2c68   :  { %2963 = vrot.lane.b32.xlu0 %v2947_v4, %s4828_s9 }
0x2c6c   :  { %2967 = vrot.lane.b32.xlu0 %v2949_v5, %s4828_s9 }
0x2c70   :  { %2971 = vrot.lane.b32.xlu0 %v2951_v10, %s4828_s9 }
0x2cce   :  { %v2926_v58 = vpop.permute.xlu0 %2925 }
0x2ccf   :  { %v2927_v12 = vmul.f32 %v2926_v58, %v2924_v3 }
0x2cd1   :  { %2928 = vrot.lane.b32.xlu1 %v2927_v12, %s4827_s23 }
0x2cd2   :  { %v1045_v13 = vpop.permute.xlu0 %1044 }
0x2cd3   :  { %1048 = vst.msk [vmem:[#allocation14] sm:$0x3] %vm1047_vm6, %v1045_v13 }
0x2cd5   :  { %1993 = vrot.lane.b32.xlu1 %v5826_v51, %s4828_s9  ;;  %v2952_v51 = vld [vmem:[#allocation2 + $0xa] sm:$0x3] }
0x2cd6   :  { %v2000_v2 = vpop.permute.xlu0 %1999 }
0x2cd7   :  { %2003 = vst.msk [vmem:[#allocation16 + $0x2] sm:$0x3] %vm1047_vm6, %v2000_v2 }
0x2cd9   :  { %1050 = vrot.lane.b32.xlu1 %v5444_v63, %s4828_s9 }
0x2cda   :  { %v2964_v39 = vpop.permute.xlu0 %2963 }
0x2cdb   :  { %2987 = vst.msk [vmem:[#allocation13] sm:$0x3] %vm1047_vm6, %v2964_v39 }
0x2cdd   :  { %2965 = vrot.lane.b32.xlu1 %v2948_v47, %s4828_s9 }
0x2cde   :  { %v2968_v14 = vpop.permute.xlu0 %2967 }
0x2cdf   :  { %2989 = vst.msk [vmem:[#allocation13 + $0x4] sm:$0x3] %vm1047_vm6, %v2968_v14 }
0x2ce1   :  { %2969 = vrot.lane.b32.xlu1 %v2950_v16, %s4828_s9 }
0x2ce2   :  { %v2972_v18 = vpop.permute.xlu0 %2971 }
0x2ce3   :  { %2991 = vst.msk [vmem:[#allocation13 + $0x8] sm:$0x3] %vm1047_vm6, %v2972_v18 }
0x2ce5   :  { %2973 = vrot.lane.b32.xlu1 %v2952_v51, %s4828_s9 }
0x2d43   :  { %v2929_v63 = vpop.permute.xlu1 %2928 }
0x2d44   :  { %v2931_v21 = vadd.f32 %v2930_v20, %v2929_v63 }
0x2d46   :  { %4644 = vtanh.f32 %v2931_v21  ;;  %2942 = vrot.lane.b32.xlu1 %v2931_v21, %s4828_s9 }
0x2d47   :  { %v1994_v22 = vpop.permute.xlu1 %1993 }
0x2d48   :  { %1997 = vst.msk [vmem:[#allocation14 + $0x2] sm:$0x3] %vm1047_vm6, %v1994_v22 }
0x2d4b   :  { %v1051_v23 = vpop.permute.xlu1 %1050 }
0x2d4c   :  { %1053 = vst.msk [vmem:[#allocation16] sm:$0x3] %vm1047_vm6, %v1051_v23 }
0x2d4f   :  { %v2966_v28 = vpop.permute.xlu1 %2965 }
0x2d50   :  { %2988 = vst.msk [vmem:[#allocation13 + $0x2] sm:$0x3] %vm1047_vm6, %v2966_v28 }
0x2d53   :  { %v4645_v25 = vpop.eup %4644  ;;  %v2970_v44 = vpop.permute.xlu1 %2969 }
0x2d54   :  { %2990 = vst.msk [vmem:[#allocation13 + $0x6] sm:$0x3] %vm1047_vm6, %v2970_v44  ;;  %v2933_v6 = vmul.f32 %v4645_v25, %v2926_v58 }
0x2d56   :  { %2936 = vrot.lane.b32.xlu0 %v2933_v6, %s4828_s9  ;;  %2934 = vst [vmem:[#allocation2 + $0xe] sm:$0x3] %v2933_v6 }
0x2d57   :  { %v2974_v34 = vpop.permute.xlu1 %2973 }
0x2d58   :  { %2992 = vst.msk [vmem:[#allocation13 + $0xa] sm:$0x3] %vm1047_vm6, %v2974_v34 }
0x2d5a   :  { %2975 = vrot.lane.b32.xlu0 %v2953_v40, %s4828_s9 }
0x2d5d   :  { %v2954_v52 = vld [vmem:[#allocation2 + $0xe] sm:$0x3] }
0x2d5e   :  { %2977 = vrot.lane.b32.xlu1 %v2954_v52, %s4828_s9 }
0x2db8   :  { %v2943_v55 = vpop.permute.xlu1 %2942 }
0x2db9   :  { %2946 = vst.msk [vmem:[#allocation16 + $0x4] sm:$0x3] %vm1047_vm6, %v2943_v55 }
0x2dc8   :  { %v2937_v59 = vpop.permute.xlu0 %2936 }
0x2dc9   :  { %2940 = vst.msk [vmem:[#allocation14 + $0x4] sm:$0x3] %vm1047_vm6, %v2937_v59 }
0x2dca   :  { %4757 = shalt.err (!%p4754_p1)
}
0x2dcb   :  { %s4831_s29 = smov 2   ;;  %s4766_s14 = scalar_lea.vmem %s3025_s26, 96 }
0x2dcc   :  { %3018 = dma.vmem_to_hbm [thread:$0]  %s3013_s5, 96, %s6141_s11, [#allocation15], %s4827_s23, %s4827_s23, %s4831_s29  }
0x2dcd   :  { %p4767_p2 = scmp.ne.s32.totalorder %s3025_s26, %s4766_s14  ;;  %p4771_p3 = scmp.lt.s32.totalorder %s3025_s26, %s3025_s26 }
0x2dce   :  { %p4772_p4 = scmp.lt.s32.totalorder %s4766_s14, %s4766_s14 }
0x2dd0   :  { %p4773_p5 = por %p4772_p4, %p4771_p3 }
0x2dd2   :  { %p4774_p6 = pnand %p4773_p5, %p4767_p2 }
0x2dd4   :  { %4777 = shalt.err (!%p4774_p6)
}
0x2dd5   :  { %3030 = dma.vmem_to_hbm [thread:$0]  %s3025_s26, 96, %s6142_s12, [#allocation15], %s4827_s23, %s4827_s23, %s4831_s29   ;;  %v2976_v29 = vpop.permute.xlu0 %2975  ;;  %v2978_v27 = vpop.permute.xlu1 %2977 }
0x2dd6   :  { %s4832_s16 = smov [#allocation13]   ;;  %2993 = vst.msk [vmem:[#allocation13 + $0xc] sm:$0x3] %vm1047_vm6, %v2976_v29  ;;  %2994 = vst.msk [vmem:[#allocation13 + $0xe] sm:$0x3] %vm1047_vm6, %v2978_v27 }
0x2dd7   :  { %s3000_s17 = sshll.u32 %s4832_s16, 4  ;;  %s3001_s17 = int_to_ptr.vmem [resolvable:$true] %s3000_s17 }
0x2dd8   :  { %s4786_s11 = scalar_lea.vmem %s3001_s17, 256  ;;  %p4791_p8 = scmp.lt.s32.totalorder %s3001_s17, %s3001_s17 }
0x2dd9   :  { %p4787_p7 = scmp.ne.s32.totalorder %s3001_s17, %s4786_s11  ;;  %p4792_p9 = scmp.lt.s32.totalorder %s4786_s11, %s4786_s11 }
0x2ddb   :  { %p4793_p10 = por %p4792_p9, %p4791_p8 }
0x2ddd   :  { %p4794_p11 = pnand %p4793_p10, %p4787_p7 }
0x2ddf   :  { %4797 = shalt.err (!%p4794_p11)
}
0x2de0   :  { %3006 = dma.vmem_to_hbm [thread:$0]  %s3001_s17, 256, %s6140_s10, [#allocation6], %s4827_s23, %s4827_s23, %s4831_s29  }
0x2de1   :  { %4812 = dma.done.wait [#allocation6], 256  }
0x2de2   :  { %4813 = vsyncadd [#allocation6], 4294967040 }
0x2de3   :  { %4814 = dma.done.wait [#allocation15], 192  }
0x2de4   :  { %4815 = vsyncadd [#allocation15], 4294967104 }
0x2de5   :  { %3040 = vsyncpa [#allocation5], 1 }
0x2de6   :  { %3041 = vsyncpa [#allocation8], 1 }
0x2de7   :  { %3042 = vsyncpa [#allocation11], 1 }
0x2de8   :  { %3043 = vsyncpa [#allocation6], 1 }
0x2de9   :  { %3044 = vsyncpa [#allocation15], 1 }

</bundles_post_ra>
